<compile_context>
chip_gen: v7x
topology: tpu7x:2x2x1
jax: 0.10.0
libtpu: 0.0.40
codegen_flags: <defaults>
</compile_context>

<pallas_src>
import numpy as np
import jax
import jax.numpy as jnp
from jax.experimental import pallas as pl
from jax.experimental.pallas import tpu as pltpu  # noqa: F401  (TPU backend)

CLAMP_MIN = -2.0
CLAMP_MAX = -0.7
BN_EPS = 0.1
GROUPS = 32
C_IN = 64
C_OUT = 128
KH = KW = 2
PAD = 1
TAPS = KH * KW

# MXU operand dtype. f32 keeps the result within the 5e-3 check; bf16 is a
# one-line switch if a looser tolerance is acceptable (kernel is DMA-bound
# here, so wall-clock impact at this size is negligible either way).
MATMUL_DTYPE = jnp.float32


def make_fused_kernel(Wp, sp, n_valid, n_invalid):
    # Flat-spatial shift of tap (kh, kw) on the (N, Hp, Wp)-flattened axis.
    tap_shifts = tuple(kh * Wp + kw for kh in range(KH) for kw in range(KW))
    inv_count = 1.0 / float(n_valid)
    pad_sum = float(n_invalid) * CLAMP_MAX
    pad_sumsq = float(n_invalid) * CLAMP_MAX * CLAMP_MAX

    def kernel(x_ref, w_ref, gamma_ref, beta_ref, o_ref):
        # x_ref     : (C_IN, sp_wide)  channel-major padded input, flat (N,Hp,Wp)
        #             spatial axis, zero-extended past `sp` for the tap shifts.
        # w_ref     : (C_OUT, TAPS*C_IN) dense block-diagonal per-tap weights.
        # gamma_ref : (C_OUT, 1), beta_ref : (C_OUT, 1)
        # o_ref     : (C_OUT, sp)
        x = x_ref[...]
        # In-VMEM im2col: tap (kh, kw) is the flat input shifted by kh*Wp+kw.
        slab = jnp.concatenate([x[:, d:d + sp] for d in tap_shifts], axis=0)
        acc = jnp.dot(w_ref[...].astype(MATMUL_DTYPE),
                      slab.astype(MATMUL_DTYPE),
                      preferred_element_type=jnp.float32)          # (C_OUT, sp)

        # clamp_min(-2) then clamp_max(-0.7)
        y = jnp.minimum(jnp.maximum(acc, CLAMP_MIN), CLAMP_MAX)

        # Batch statistics over valid output positions only. Invalid ("ring")
        # positions read only zero padding -> conv == 0 -> clamp == CLAMP_MAX,
        # so their contribution to sum / sumsq is a known constant that is
        # subtracted analytically (exact; no mask needed).
        s = jnp.sum(y, axis=1, keepdims=True) - pad_sum            # (C_OUT, 1)
        ss = jnp.sum(y * y, axis=1, keepdims=True) - pad_sumsq
        mean = s * inv_count
        var = ss * inv_count - mean * mean          # biased batch variance
        inv_std = jax.lax.rsqrt(var + BN_EPS)
        scale = gamma_ref[...] * inv_std
        shift = beta_ref[...] - mean * scale
        o_ref[...] = y * scale + shift              # ring rows normalized too;
                                                    # wrapper slices them away.

    return kernel


def build_dense_weight(conv_w):
    # conv_w: PyTorch layout (C_OUT, C_IN//GROUPS, KH, KW)
    # -> dense block-diagonal (C_OUT, TAPS*C_IN); columns are tap-major
    #    [tap0 | tap1 | tap2 | tap3] x C_IN, matching the in-kernel slab.
    cw = np.asarray(conv_w, np.float32)
    cin_g = C_IN // GROUPS
    cout_g = C_OUT // GROUPS
    w = np.zeros((C_OUT, TAPS, C_IN), np.float32)
    for g in range(GROUPS):
        for kh in range(KH):
            for kw in range(KW):
                w[g * cout_g:(g + 1) * cout_g,
                  kh * KW + kw,
                  g * cin_g:(g + 1) * cin_g] = cw[g * cout_g:(g + 1) * cout_g, :, kh, kw]
    return jnp.asarray(w.reshape(C_OUT, TAPS * C_IN))


@jax.jit
def model_forward(x_nchw, w_dense, gamma, beta):
    N, C, H, W = x_nchw.shape
    Hp, Wp = H + 2 * PAD, W + 2 * PAD
    Ho, Wo = Hp - KH + 1, Wp - KW + 1
    sp = N * Hp * Wp                                  # flat padded-grid size
    max_shift = (KH - 1) * Wp + (KW - 1)
    sp_wide = ((sp + max_shift + 7) // 8) * 8         # zero-extension for shifts
    n_valid = N * Ho * Wo
    n_invalid = sp - n_valid

    # Layout-only glue (small, fused by XLA): NCHW -> channel-major
    # (C, N, Hp, Wp) zero-padded, flattened spatial, zero-extended tail.
    xc = jnp.transpose(x_nchw, (1, 0, 2, 3)).astype(jnp.float32)
    xp = jnp.pad(xc, ((0, 0), (0, 0), (PAD, PAD), (PAD, PAD)))
    xf = jnp.pad(xp.reshape(C, sp), ((0, 0), (0, sp_wide - sp)))

    out_t = pl.pallas_call(
        make_fused_kernel(Wp, sp, n_valid, n_invalid),
        out_shape=jax.ShapeDtypeStruct((C_OUT, sp), jnp.float32),
        grid=(1,),
        in_specs=[
            pl.BlockSpec((C_IN, sp_wide), lambda i: (0, 0)),
            pl.BlockSpec((C_OUT, TAPS * C_IN), lambda i: (0, 0)),
            pl.BlockSpec((C_OUT, 1), lambda i: (0, 0)),
            pl.BlockSpec((C_OUT, 1), lambda i: (0, 0)),
        ],
        out_specs=pl.BlockSpec((C_OUT, sp), lambda i: (0, 0)),
    )(xf,
      w_dense.astype(MATMUL_DTYPE),
      gamma.reshape(C_OUT, 1).astype(jnp.float32),
      beta.reshape(C_OUT, 1).astype(jnp.float32))

    # Glue: drop the padded ring and go back to NCHW. The 17-wide inner dim
    # only appears in this single final fused slice+transpose copy.
    out = out_t.reshape(C_OUT, N, Hp, Wp)[:, :, :Ho, :Wo]
    return jnp.transpose(out, (1, 0, 2, 3))


def reference_forward(x_nchw, conv_w, gamma, beta):
    v1 = jax.lax.conv_general_dilated(
        x_nchw, conv_w, window_strides=(1, 1),
        padding=((PAD, PAD), (PAD, PAD)),
        dimension_numbers=("NCHW", "OIHW", "NCHW"),
        feature_group_count=GROUPS)
    v3 = jnp.clip(v1, CLAMP_MIN, CLAMP_MAX)
    mean = v3.mean(axis=(0, 2, 3), keepdims=True)
    var = v3.var(axis=(0, 2, 3), keepdims=True)      # biased batch variance
    g = gamma.reshape(1, C_OUT, 1, 1)
    b = beta.reshape(1, C_OUT, 1, 1)
    return (v3 - mean) / jnp.sqrt(var + BN_EPS) * g + b


if __name__ == "__main__":
    key = jax.random.PRNGKey(0)
    k_x, k_w = jax.random.split(key)

    # Small shapes consistent with the module: batch=2, 64 in-channels, 16x16.
    x1 = jax.random.normal(k_x, (2, C_IN, 16, 16), dtype=jnp.float32)
    # Conv weight, PyTorch layout (out, in/groups, kH, kW); deterministic init.
    conv_w = 0.1 * jax.random.normal(k_w, (C_OUT, C_IN // GROUPS, KH, KW),
                                     dtype=jnp.float32)
    # BatchNorm affine params (PyTorch defaults: weight=1, bias=0).
    # TODO(synk): running_mean/running_var/num_batches_tracked updates
    # (momentum=10) are not modeled; they do not affect this forward output.
    gamma = jnp.ones((C_OUT,), jnp.float32)
    beta = jnp.zeros((C_OUT,), jnp.float32)

    w_dense = build_dense_weight(conv_w)

    out = jax.block_until_ready(model_forward(x1, w_dense, gamma, beta))
    ref = jax.block_until_ready(reference_forward(x1, conv_w, gamma, beta))

    err = float(jnp.max(jnp.abs(out - ref)))
    assert out.shape == (2, C_OUT, 17, 17), out.shape
    assert err < 5e-3, f"max abs diff too large: {err}"
    print("KERNEL_OK")
</pallas_src>

<mosaic_0001>
module attributes {stable_mosaic.version = 11 : i64} {
  func.func @kernel(%arg0: i32, %arg1: memref<64x672xf32, #tpu.memory_space<vmem>>, %arg2: memref<128x256xf32, #tpu.memory_space<vmem>>, %arg3: memref<128x1xf32, #tpu.memory_space<vmem>>, %arg4: memref<128x1xf32, #tpu.memory_space<vmem>>, %arg5: memref<128x648xf32, #tpu.memory_space<vmem>>) attributes {dimension_semantics = [#tpu.dimension_semantics<arbitrary>], iteration_bounds = array<i64: 1>, scalar_prefetch = 0 : i64, scratch_operands = 0 : i64, tpu.core_type = #tpu.core_type<tc>, window_params = [{pipeline_mode = #tpu.pipeline_mode<synchronous>, transform_indices = @transform_0, window_bounds = array<i64: 64, 672>}, {pipeline_mode = #tpu.pipeline_mode<synchronous>, transform_indices = @transform_1, window_bounds = array<i64: 128, 256>}, {pipeline_mode = #tpu.pipeline_mode<synchronous>, transform_indices = @transform_2, window_bounds = array<i64: 128, 1>}, {pipeline_mode = #tpu.pipeline_mode<synchronous>, transform_indices = @transform_3, window_bounds = array<i64: 128, 1>}, {pipeline_mode = #tpu.pipeline_mode<synchronous>, transform_indices = @transform_4, window_bounds = array<i64: 128, 648>}]} {
    %c0 = arith.constant 0 : index
    %c0_0 = arith.constant 0 : index
    %0 = vector.load %arg1[%c0, %c0_0] : memref<64x672xf32, #tpu.memory_space<vmem>>, vector<64x672xf32>
    %1 = vector.extract_strided_slice %0 {offsets = [0, 0], sizes = [64, 648], strides = [1, 1]} : vector<64x672xf32> to vector<64x648xf32>
    %2 = vector.extract_strided_slice %0 {offsets = [0, 1], sizes = [64, 648], strides = [1, 1]} : vector<64x672xf32> to vector<64x648xf32>
    %3 = vector.extract_strided_slice %0 {offsets = [0, 18], sizes = [64, 648], strides = [1, 1]} : vector<64x672xf32> to vector<64x648xf32>
    %4 = vector.extract_strided_slice %0 {offsets = [0, 19], sizes = [64, 648], strides = [1, 1]} : vector<64x672xf32> to vector<64x648xf32>
    %5 = tpu.concatenate %1, %2, %3, %4 in 0 : vector<64x648xf32>, vector<64x648xf32>, vector<64x648xf32>, vector<64x648xf32> -> vector<256x648xf32>
    %c0_1 = arith.constant 0 : index
    %c0_2 = arith.constant 0 : index
    %6 = vector.load %arg2[%c0_1, %c0_2] : memref<128x256xf32, #tpu.memory_space<vmem>>, vector<128x256xf32>
    %cst = arith.constant dense<0.000000e+00> : vector<128x648xf32>
    %7 = tpu.matmul %6, %5, %cst {dimension_numbers = #tpu.dot_dimension_numbers<[1], [0], [0], [1], [0, 0, 1, 1], [], []>} : vector<128x256xf32>, vector<256x648xf32>, vector<128x648xf32> -> vector<128x648xf32>
    %cst_3 = arith.constant -2.000000e+00 : f32
    %8 = vector.broadcast %cst_3 : f32 to vector<128x648xf32>
    %9 = arith.maximumf %7, %8 : vector<128x648xf32>
    %cst_4 = arith.constant -0.699999988 : f32
    %10 = vector.broadcast %cst_4 : f32 to vector<128x648xf32>
    %11 = arith.minimumf %9, %10 : vector<128x648xf32>
    %cst_5 = arith.constant dense<0.000000e+00> : vector<128xf32>
    %12 = vector.multi_reduction <add>, %11, %cst_5 [1] : vector<128x648xf32> to vector<128xf32>
    %13 = vector.shape_cast %12 : vector<128xf32> to vector<128x1xf32>
    %cst_6 = arith.constant -4.900000e+01 : f32
    %14 = vector.broadcast %cst_6 : f32 to vector<128x1xf32>
    %15 = arith.subf %13, %14 : vector<128x1xf32>
    %16 = arith.mulf %11, %11 : vector<128x648xf32>
    %cst_7 = arith.constant dense<0.000000e+00> : vector<128xf32>
    %17 = vector.multi_reduction <add>, %16, %cst_7 [1] : vector<128x648xf32> to vector<128xf32>
    %18 = vector.shape_cast %17 : vector<128xf32> to vector<128x1xf32>
    %cst_8 = arith.constant 3.430000e+01 : f32
    %19 = vector.broadcast %cst_8 : f32 to vector<128x1xf32>
    %20 = arith.subf %18, %19 : vector<128x1xf32>
    %cst_9 = arith.constant 0.00173010386 : f32
    %21 = vector.broadcast %cst_9 : f32 to vector<128x1xf32>
    %22 = arith.mulf %15, %21 : vector<128x1xf32>
    %cst_10 = arith.constant 0.00173010386 : f32
    %23 = vector.broadcast %cst_10 : f32 to vector<128x1xf32>
    %24 = arith.mulf %20, %23 : vector<128x1xf32>
    %25 = arith.mulf %22, %22 : vector<128x1xf32>
    %26 = arith.subf %24, %25 : vector<128x1xf32>
    %cst_11 = arith.constant 1.000000e-01 : f32
    %27 = vector.broadcast %cst_11 : f32 to vector<128x1xf32>
    %28 = arith.addf %26, %27 : vector<128x1xf32>
    %29 = math.rsqrt %28 : vector<128x1xf32>
    %c0_12 = arith.constant 0 : index
    %c0_13 = arith.constant 0 : index
    %30 = vector.load %arg3[%c0_12, %c0_13] : memref<128x1xf32, #tpu.memory_space<vmem>>, vector<128x1xf32>
    %31 = arith.mulf %30, %29 : vector<128x1xf32>
    %c0_14 = arith.constant 0 : index
    %c0_15 = arith.constant 0 : index
    %32 = vector.load %arg4[%c0_14, %c0_15] : memref<128x1xf32, #tpu.memory_space<vmem>>, vector<128x1xf32>
    %33 = arith.mulf %22, %31 : vector<128x1xf32>
    %34 = arith.subf %32, %33 : vector<128x1xf32>
    %35 = vector.broadcast %31 : vector<128x1xf32> to vector<128x648xf32>
    %36 = arith.mulf %11, %35 : vector<128x648xf32>
    %37 = vector.broadcast %34 : vector<128x1xf32> to vector<128x648xf32>
    %38 = arith.addf %36, %37 : vector<128x648xf32>
    %c0_16 = arith.constant 0 : index
    %c0_17 = arith.constant 0 : index
    %39 = vector.load %arg5[%c0_16, %c0_17] : memref<128x648xf32, #tpu.memory_space<vmem>>, vector<128x648xf32>
    tpu.vector_store %arg5[%c0_16, %c0_17], %38 {strides = array<i32>} : memref<128x648xf32, #tpu.memory_space<vmem>>, vector<128x648xf32>,
    return
  }
  func.func @transform_0(%arg0: i32) -> (i32, i32) {
    %c0_i32 = arith.constant 0 : i32
    %c0_i32_0 = arith.constant 0 : i32
    %c0_i32_1 = arith.constant 0 : i32
    return %c0_i32, %c0_i32_0 : i32, i32
  }
  func.func @transform_1(%arg0: i32) -> (i32, i32) {
    %c0_i32 = arith.constant 0 : i32
    %c0_i32_0 = arith.constant 0 : i32
    %c0_i32_1 = arith.constant 0 : i32
    return %c0_i32, %c0_i32_0 : i32, i32
  }
  func.func @transform_2(%arg0: i32) -> (i32, i32) {
    %c0_i32 = arith.constant 0 : i32
    %c0_i32_0 = arith.constant 0 : i32
    %c0_i32_1 = arith.constant 0 : i32
    return %c0_i32, %c0_i32_0 : i32, i32
  }
  func.func @transform_3(%arg0: i32) -> (i32, i32) {
    %c0_i32 = arith.constant 0 : i32
    %c0_i32_0 = arith.constant 0 : i32
    %c0_i32_1 = arith.constant 0 : i32
    return %c0_i32, %c0_i32_0 : i32, i32
  }
  func.func @transform_4(%arg0: i32) -> (i32, i32) {
    %c0_i32 = arith.constant 0 : i32
    %c0_i32_0 = arith.constant 0 : i32
    %c0_i32_1 = arith.constant 0 : i32
    return %c0_i32, %c0_i32_0 : i32, i32
  }
}

</mosaic_0001>

<bundles_post_ra>
// kernel: model_forward.1
= control target key start
LH: loop header
LB: loop body
LE: loop exit
PB: predicated region body
PF: predicated region fallthrough
CT: control target
= control target key end

     0   :  { %s3051_s5 = smov 127   ;;  %s3052_s20 = smov 110   ;;  %vm209_vm0 = vcmask 1039360   ;;  %vm394_vm1 = vcmask 900096   ;;  %vm579_vm2 = vcmask 891904   ;;  %vm1379_vm3 = vcmask 64512   ;;  %s5556_s0 = inlined_call_operand.vmem [shape: f32[64,672], index: 0, kind: input, shape index: {}]   ;;  %s5557_s1 = inlined_call_operand.vmem [shape: f32[128,256], index: 1, kind: input, shape index: {}]   ;;  %s5558_s2 = inlined_call_operand.vmem [shape: f32[128,1], index: 2, kind: input, shape index: {}]   ;;  %s5559_s3 = inlined_call_operand.vmem [shape: f32[128,1], index: 3, kind: input, shape index: {}]   ;;  %s5560_s4 = inlined_call_operand.vmem [shape: f32[128,648], index: 4, kind: output, shape index: {}]  }
   0x1   :  { %v24_v0 = vld [vmem:[%s5556_s0 + $0x38] sm:$0xff]  ;;  %v3086_v1 = vld [vmem:[%s5556_s0 + $0x40] sm:$0xff]  ;;  %v18_v2 = vld [vmem:[%s5556_s0 + $0x8] sm:$0xff]  ;;  %s3053_s21 = smov 109  }
   0x2   :  { %v3092_v3 = vpack.i.bf16 %v3086_v1, %v24_v0  ;;  %v3097_v4 = vld [vmem:[%s5556_s0 + $0x10] sm:$0xff]  ;;  %v26_v5 = vld [vmem:[%s5556_s0 + $0x48] sm:$0xff]  ;;  %v2420_v7 = vpack.c.bf16 %v24_v0, %v18_v2  ;;  %v20_v9 = vld [vmem:[%s5556_s0 + $0x18] sm:$0xff] }
   0x3   :  { %v27_v6 = vld [vmem:[%s5556_s0 + $0x50] sm:$0xff]  ;;  %v3106_v8 = vpack.i.bf16 %v3097_v4, %v18_v2  ;;  %v21_v10 = vld [vmem:[%s5556_s0 + $0x20] sm:$0xff]  ;;  %v30_v13 = vld [vmem:[%s5556_s0 + $0x68] sm:$0xff]  ;;  %v2484_v45 = vpack.c.bf16 %v26_v5, %v20_v9  ;;  %v2486_v47 = vpack.c.bf16 %v3086_v1, %v3097_v4 }
   0x4   :  { %2659 = vrot.lane.b32.xlu1 %v3092_v3, %s3051_s5  ;;  %v3116_v11 = vpack.i.bf16 %v27_v6, %v26_v5  ;;  %v3120_v12 = vpack.i.bf16 %v21_v10, %v20_v9  ;;  %v3128_v14 = vld [vmem:[%s5556_s0 + $0x70] sm:$0xff]  ;;  %v17_v15 = vld [vmem:[%s5556_s0] sm:$0xff]  ;;  %2421 = vmatprep.subr.bf16.mxu0 %v2420_v7  ;;  %v36_v18 = vld [vmem:[%s5556_s0 + $0x98] sm:$0xff] }
   0x5   :  { %2649 = vrot.lane.b32.xlu0 %v3106_v8, %s3051_s5  ;;  %v23_v16 = vld [vmem:[%s5556_s0 + $0x30] sm:$0xff]  ;;  %v3137_v17 = vpack.i.bf16 %v3128_v14, %v30_v13  ;;  %v3145_v19 = vld [vmem:[%s5556_s0 + $0xa0] sm:$0xff]  ;;  %v32_v24 = vld [vmem:[%s5556_s0 + $0x78] sm:$0xff]  ;;  %v2424_v50 = vpack.c.bf16 %v36_v18, %v30_v13  ;;  %2485 = vmatprep.subr.bf16.mxu1 %v2484_v45 }
   0x6   :  { %v3149_v20 = vpack.i.bf16 %v23_v16, %v17_v15  ;;  %v3152_v21 = vpack.i.bf16 %v3145_v19, %v36_v18  ;;  %v29_v22 = vld [vmem:[%s5556_s0 + $0x60] sm:$0xff]  ;;  %v35_v23 = vld [vmem:[%s5556_s0 + $0x90] sm:$0xff]  ;;  %v38_v27 = vld [vmem:[%s5556_s0 + $0xa8] sm:$0xff]  ;;  %v2422_v41 = vpack.c.bf16 %v23_v16, %v17_v15  ;;  %2487 = vmatpush1.bf16.msra.mxu1 %v2486_v47  ;;  %v2490_v58 = vpack.c.bf16 %v3145_v19, %v3128_v14 }
   0x7   :  { %v33_v25 = vld [vmem:[%s5556_s0 + $0x80] sm:$0xff]  ;;  %v3168_v26 = vpack.i.bf16 %v35_v23, %v29_v22  ;;  %v39_v28 = vld [vmem:[%s5556_s0 + $0xb0] sm:$0xff]  ;;  %v42_v30 = vld [vmem:[%s5556_s0 + $0xc8] sm:$0xff]  ;;  %v2426_v51 = vpack.c.bf16 %v35_v23, %v29_v22  ;;  %v2488_v55 = vpack.c.bf16 %v38_v27, %v32_v24 }
   0x8   :  { %2664 = vrot.lane.b32.xlu1 %v3116_v11, %s3051_s5  ;;  %v3180_v29 = vpack.i.bf16 %v33_v25, %v32_v24  ;;  %v43_v31 = vld [vmem:[%s5556_s0 + $0xd0] sm:$0xff]  ;;  %v48_v32 = vld [vmem:[%s5556_s0 + $0xf8] sm:$0xff]  ;;  %v49_v33 = vld [vmem:[%s5556_s0 + $0x100] sm:$0xff]  ;;  %v3199_v36 = vpack.i.bf16 %v39_v28, %v38_v27  ;;  %2423 = vmatpush1.bf16.msra.mxu0 %v2422_v41 }
   0x9   :  { %2654 = vrot.lane.b32.xlu0 %v3120_v12, %s3051_s5  ;;  %v54_v34 = vld [vmem:[%s5556_s0 + $0x128] sm:$0xff]  ;;  %v3197_v35 = vpack.i.bf16 %v43_v31, %v42_v30  ;;  %v55_v37 = vld [vmem:[%s5556_s0 + $0x130] sm:$0xff]  ;;  %v41_v38 = vld [vmem:[%s5556_s0 + $0xc0] sm:$0xff]  ;;  %v3210_v40 = vpack.i.bf16 %v49_v33, %v48_v32  ;;  %v2428_v56 = vpack.c.bf16 %v48_v32, %v42_v30  ;;  %2425 = vmatprep.subr.bf16.mxu0 %v2424_v50 }
   0xa   :  { %v47_v39 = vld [vmem:[%s5556_s0 + $0xf0] sm:$0xff]  ;;  %v60_v42 = vld [vmem:[%s5556_s0 + $0x158] sm:$0xff]  ;;  %v61_v43 = vld [vmem:[%s5556_s0 + $0x160] sm:$0xff]  ;;  %v3220_v44 = vpack.i.bf16 %v55_v37, %v54_v34  ;;  %2489 = vmatprep.subr.bf16.mxu1 %v2488_v55  ;;  %v2494_v4 = vpack.c.bf16 %v49_v33, %v43_v31 }
   0xb   :  { %v3222_v46 = vpack.i.bf16 %v47_v39, %v41_v38  ;;  %v44_v48 = vld [vmem:[%s5556_s0 + $0xd8] sm:$0xff]  ;;  %v45_v49 = vld [vmem:[%s5556_s0 + $0xe0] sm:$0xff]  ;;  %v3234_v52 = vpack.i.bf16 %v61_v43, %v60_v42  ;;  %v59_v54 = vld [vmem:[%s5556_s0 + $0x150] sm:$0xff]  ;;  %v2430_v63 = vpack.c.bf16 %v47_v39, %v41_v38  ;;  %v2432_v0 = vpack.c.bf16 %v60_v42, %v54_v34  ;;  %2491 = vmatpush1.bf16.msra.mxu1 %v2490_v58 }
   0xc   :  { %2674 = vrot.lane.b32.xlu1 %v3137_v17, %s3051_s5  ;;  %v53_v53 = vld [vmem:[%s5556_s0 + $0x120] sm:$0xff]  ;;  %v50_v57 = vld [vmem:[%s5556_s0 + $0x108] sm:$0xff]  ;;  %v3251_v60 = vpack.i.bf16 %v45_v49, %v44_v48  ;;  %v51_v62 = vld [vmem:[%s5556_s0 + $0x110] sm:$0xff]  ;;  %2427 = vmatpush1.bf16.msra.mxu0 %v2426_v51  ;;  %v2498_v9 = vpack.c.bf16 %v61_v43, %v55_v37 }
   0xd   :  { %2669 = vrot.lane.b32.xlu0 %v3149_v20, %s3051_s5  ;;  %v3247_v59 = vpack.i.bf16 %v59_v54, %v53_v53  ;;  %v2492_v61 = vpack.c.bf16 %v50_v57, %v44_v48  ;;  %2429 = vmatprep.subr.bf16.mxu0 %v2428_v56  ;;  %v56_v1 = vld [vmem:[%s5556_s0 + $0x138] sm:$0xff]  ;;  %v62_v2 = vld [vmem:[%s5556_s0 + $0x168] sm:$0xff]  ;;  %v2713_v5 = vpack.i.bf16 %v51_v62, %v50_v57  ;;  %v57_v10 = vld [vmem:[%s5556_s0 + $0x140] sm:$0xff] }
   0xe   :  { %v2496_v6 = vpack.c.bf16 %v62_v2, %v56_v1  ;;  %v2434_v7 = vpack.c.bf16 %v59_v54, %v53_v53  ;;  %v2728_v13 = vpack.i.bf16 %v57_v10, %v56_v1  ;;  %v63_v14 = vld [vmem:[%s5556_s0 + $0x170] sm:$0xff]  ;;  %v3374_v16 = vld [vmem:[%s5556_s0 + $0x28] sm:$0xff]  ;;  %v3401_v27 = vld [vmem:[%s5556_s0 + $0x178] sm:$0xff] }
   0xf   :  { %2493 = vmatprep.subr.bf16.mxu1 %v2492_v61  ;;  %v2738_v15 = vpack.i.bf16 %v63_v14, %v62_v2  ;;  %v3409_v30 = vld [vmem:[%s5556_s0 + $0xe8] sm:$0xff]  ;;  %v3414_v31 = vld [vmem:[%s5556_s0 + $0x118] sm:$0xff] }
  0x10   :  { %2684 = vrot.lane.b32.xlu1 %v3152_v21, %s3051_s5  ;;  %2431 = vmatpush1.bf16.msra.mxu0 %v2430_v63 }
  0x11   :  { %2679 = vrot.lane.b32.xlu0 %v3180_v29, %s3051_s5  ;;  %2433 = vmatprep.subr.bf16.mxu0 %v2432_v0 }
  0x12   :  { %2495 = vmatpush1.bf16.msra.mxu1 %v2494_v4 }
  0x13   :  { %2497 = vmatprep.subr.bf16.mxu1 %v2496_v6 }
  0x14   :  { %2694 = vrot.lane.b32.xlu1 %v3168_v26, %s3051_s5  ;;  %2435 = vmatpush1.bf16.msra.mxu0 %v2434_v7 }
  0x15   :  { %2689 = vrot.lane.b32.xlu0 %v3199_v36, %s3051_s5 }
  0x16   :  { %2499 = vmatpush1.bf16.msra.mxu1 %v2498_v9 }
  0x18   :  { %2704 = vrot.lane.b32.xlu1 %v3251_v60, %s3051_s5 }
  0x19   :  { %2699 = vrot.lane.b32.xlu0 %v3197_v35, %s3051_s5 }
  0x1c   :  { %2714 = vrot.lane.b32.xlu1 %v2713_v5, %s3051_s5 }
  0x1d   :  { %2709 = vrot.lane.b32.xlu0 %v3210_v40, %s3051_s5 }
  0x20   :  { %2724 = vrot.lane.b32.xlu1 %v3220_v44, %s3051_s5 }
  0x21   :  { %2719 = vrot.lane.b32.xlu0 %v3222_v46, %s3051_s5 }
  0x24   :  { %2734 = vrot.lane.b32.xlu1 %v3234_v52, %s3051_s5 }
  0x25   :  { %2729 = vrot.lane.b32.xlu0 %v2728_v13, %s3051_s5 }
  0x28   :  { %2744 = vrot.lane.b32.xlu1 %v3247_v59, %s3051_s5 }
  0x29   :  { %2739 = vrot.lane.b32.xlu0 %v2738_v15, %s3051_s5 }
  0x2c   :  { %2754 = vrot.lane.b32.xlu1 %v3120_v12, %s3052_s20 }
  0x2d   :  { %2749 = vrot.lane.b32.xlu0 %v3106_v8, %s3052_s20 }
  0x30   :  { %2764 = vrot.lane.b32.xlu1 %v3116_v11, %s3052_s20 }
  0x31   :  { %2759 = vrot.lane.b32.xlu0 %v3092_v3, %s3052_s20 }
  0x34   :  { %2774 = vrot.lane.b32.xlu1 %v3137_v17, %s3052_s20 }
  0x35   :  { %2769 = vrot.lane.b32.xlu0 %v3149_v20, %s3052_s20 }
  0x38   :  { %2784 = vrot.lane.b32.xlu1 %v3152_v21, %s3052_s20 }
  0x39   :  { %2779 = vrot.lane.b32.xlu0 %v3180_v29, %s3052_s20 }
  0x3c   :  { %2794 = vrot.lane.b32.xlu1 %v3168_v26, %s3052_s20 }
  0x3d   :  { %2789 = vrot.lane.b32.xlu0 %v3199_v36, %s3052_s20 }
  0x40   :  { %2804 = vrot.lane.b32.xlu1 %v3251_v60, %s3052_s20 }
  0x41   :  { %2799 = vrot.lane.b32.xlu0 %v3197_v35, %s3052_s20 }
  0x44   :  { %2814 = vrot.lane.b32.xlu1 %v2713_v5, %s3052_s20 }
  0x45   :  { %2809 = vrot.lane.b32.xlu0 %v3210_v40, %s3052_s20 }
  0x48   :  { %2824 = vrot.lane.b32.xlu1 %v3220_v44, %s3052_s20 }
  0x49   :  { %2819 = vrot.lane.b32.xlu0 %v3222_v46, %s3052_s20 }
  0x4c   :  { %2834 = vrot.lane.b32.xlu1 %v3234_v52, %s3052_s20 }
  0x4d   :  { %2829 = vrot.lane.b32.xlu0 %v2728_v13, %s3052_s20 }
  0x50   :  { %2844 = vrot.lane.b32.xlu1 %v3247_v59, %s3052_s20 }
  0x51   :  { %2839 = vrot.lane.b32.xlu0 %v2738_v15, %s3052_s20 }
  0x54   :  { %2854 = vrot.lane.b32.xlu1 %v3120_v12, %s3053_s21 }
  0x55   :  { %2849 = vrot.lane.b32.xlu0 %v3106_v8, %s3053_s21  ;;  %v3364_v8 = vld [vmem:[%s5556_s0 + $0x88] sm:$0xff] }
  0x58   :  { %2864 = vrot.lane.b32.xlu1 %v3116_v11, %s3053_s21  ;;  %v3369_v11 = vld [vmem:[%s5556_s0 + $0xb8] sm:$0xff] }
  0x59   :  { %2859 = vrot.lane.b32.xlu0 %v3092_v3, %s3053_s21  ;;  %v669_v3 = vld [vmem:[%s5557_s1 + $0x8] sm:$0xff]  ;;  %v3385_v23 = vpack.i.bf16 %v3369_v11, %v3364_v8 }
  0x5a   :  { %764 = vmatprep.mubr.f32.mxu0 %v669_v3  ;;  %925 = vmatprep.mubr.f32.mxu1 %v669_v3 }
  0x5c   :  { %2874 = vrot.lane.b32.xlu1 %v3137_v17, %s3053_s21  ;;  %v3379_v17 = vld [vmem:[%s5556_s0 + $0x58] sm:$0xff] }
  0x5d   :  { %2869 = vrot.lane.b32.xlu0 %v3149_v20, %s3053_s21  ;;  %v3390_v24 = vpack.i.bf16 %v3379_v17, %v3374_v16 }
  0x60   :  { %2884 = vrot.lane.b32.xlu1 %v3152_v21, %s3053_s21 }
  0x61   :  { %2879 = vrot.lane.b32.xlu0 %v3180_v29, %s3053_s21 }
  0x64   :  { %2894 = vrot.lane.b32.xlu1 %v3168_v26, %s3053_s21  ;;  %v3396_v26 = vld [vmem:[%s5556_s0 + $0x148] sm:$0xff] }
  0x65   :  { %2889 = vrot.lane.b32.xlu0 %v3199_v36, %s3053_s21  ;;  %v3426_v38 = vpack.i.bf16 %v3401_v27, %v3396_v26 }
  0x68   :  { %2904 = vrot.lane.b32.xlu1 %v3251_v60, %s3053_s21 }
  0x69   :  { %2899 = vrot.lane.b32.xlu0 %v3197_v35, %s3053_s21 }
  0x6c   :  { %2914 = vrot.lane.b32.xlu1 %v2713_v5, %s3053_s21 }
  0x6d   :  { %2909 = vrot.lane.b32.xlu0 %v3210_v40, %s3053_s21  ;;  %v3435_v40 = vpack.i.bf16 %v3414_v31, %v3409_v30 }
  0x70   :  { %2924 = vrot.lane.b32.xlu1 %v3220_v44, %s3053_s21 }
  0x71   :  { %2919 = vrot.lane.b32.xlu0 %v3222_v46, %s3053_s21 }
  0x74   :  { %2934 = vrot.lane.b32.xlu1 %v3234_v52, %s3053_s21 }
  0x75   :  { %2929 = vrot.lane.b32.xlu0 %v2728_v13, %s3053_s21 }
  0x76   :  { %v2660_v12 = vpop.permute.xlu1 %2659 }
  0x77   :  { %v2662_v18 = vunpack.i.h.bf16 %v2660_v12  ;;  %v2661_v19 = vunpack.i.l.bf16 %v2660_v12  ;;  %v2650_v20 = vpop.permute.xlu0 %2649 }
  0x78   :  { %v2652_v21 = vunpack.i.h.bf16 %v2650_v20  ;;  %v2651_v22 = vunpack.i.l.bf16 %v2650_v20  ;;  %2944 = vrot.lane.b32.xlu1 %v3247_v59, %s3053_s21 }
  0x79   :  { %2939 = vrot.lane.b32.xlu0 %v2738_v15, %s3053_s21  ;;  %v216_v25 = vsel %vm209_vm0, %v2661_v19, %v2662_v18 }
  0x7a   :  { %v3403_v28 = vpop.permute.xlu1 %2664  ;;  %v211_v29 = vsel %vm209_vm0, %v2651_v22, %v2652_v21 }
  0x7b   :  { %v2667_v32 = vunpack.i.h.bf16 %v3403_v28  ;;  %v2666_v33 = vunpack.i.l.bf16 %v3403_v28  ;;  %v3418_v34 = vpop.permute.xlu0 %2654  ;;  %v2436_v35 = vpack.c.bf16 %v216_v25, %v211_v29 }
  0x7c   :  { %v2657_v36 = vunpack.i.h.bf16 %v3418_v34  ;;  %v2656_v37 = vunpack.i.l.bf16 %v3418_v34  ;;  %2954 = vrot.lane.b32.xlu1 %v3385_v23, %s3051_s5 }
  0x7d   :  { %2949 = vrot.lane.b32.xlu0 %v3390_v24, %s3051_s5  ;;  %2437 = vmatprep.subr.bf16.mxu0 %v2436_v35  ;;  %v218_v39 = vsel %vm209_vm0, %v2666_v33, %v2667_v32  ;;  %v217_v41 = vsel %vm209_vm0, %v2662_v18, %v2666_v33 }
  0x7e   :  { %v2675_v42 = vpop.permute.xlu1 %2674  ;;  %v213_v43 = vsel %vm209_vm0, %v2656_v37, %v2657_v36  ;;  %v212_v44 = vsel %vm209_vm0, %v2652_v21, %v2656_v37 }
  0x7f   :  { %v2677_v45 = vunpack.i.h.bf16 %v2675_v42  ;;  %v2676_v46 = vunpack.i.l.bf16 %v2675_v42  ;;  %v2670_v47 = vpop.permute.xlu0 %2669  ;;  %v2500_v48 = vpack.c.bf16 %v218_v39, %v213_v43  ;;  %v2502_v49 = vpack.c.bf16 %v217_v41, %v212_v44 }
  0x80   :  { %v2672_v50 = vunpack.i.h.bf16 %v2670_v47  ;;  %v2671_v51 = vunpack.i.l.bf16 %v2670_v47  ;;  %2964 = vrot.lane.b32.xlu1 %v3426_v38, %s3051_s5 }
  0x81   :  { %2501 = vmatprep.subr.bf16.mxu1 %v2500_v48  ;;  %2959 = vrot.lane.b32.xlu0 %v3435_v40, %s3051_s5  ;;  %v221_v59 = vsel %vm209_vm0, %v2676_v46, %v2677_v45 }
  0x82   :  { %2503 = vmatpush1.bf16.msra.mxu1 %v2502_v49  ;;  %v2685_v52 = vpop.permute.xlu1 %2684  ;;  %v210_v53 = vsel %vm209_vm0, %v2671_v51, %v2651_v22  ;;  %v215_v54 = vsel %vm209_vm0, %v2672_v50, %v2661_v19 }
  0x83   :  { %v2687_v55 = vunpack.i.h.bf16 %v2685_v52  ;;  %v2686_v56 = vunpack.i.l.bf16 %v2685_v52  ;;  %v3448_v57 = vpop.permute.xlu0 %2679  ;;  %v2438_v58 = vpack.c.bf16 %v215_v54, %v210_v53 }
  0x84   :  { %2974 = vrot.lane.b32.xlu1 %v3385_v23, %s3052_s20  ;;  %v2682_v60 = vunpack.i.h.bf16 %v3448_v57  ;;  %v2681_v61 = vunpack.i.l.bf16 %v3448_v57 }
  0x85   :  { %2969 = vrot.lane.b32.xlu0 %v3390_v24, %s3052_s20  ;;  %2439 = vmatpush1.bf16.msra.mxu0 %v2438_v58  ;;  %v226_v62 = vsel %vm209_vm0, %v2686_v56, %v2687_v55 }
  0x86   :  { %v2695_v63 = vpop.permute.xlu1 %2694  ;;  %v2440_v0 = vpack.c.bf16 %v226_v62, %v221_v59  ;;  %v223_v10 = vsel %vm209_vm0, %v2681_v61, %v2682_v60  ;;  %v222_v3 = vsel %vm209_vm0, %v2677_v45, %v2681_v61 }
  0x87   :  { %v2697_v1 = vunpack.i.h.bf16 %v2695_v63  ;;  %v2696_v2 = vunpack.i.l.bf16 %v2695_v63  ;;  %v3458_v4 = vpop.permute.xlu0 %2689 }
  0x88   :  { %v2692_v5 = vunpack.i.h.bf16 %v3458_v4  ;;  %v2691_v6 = vunpack.i.l.bf16 %v3458_v4  ;;  %2984 = vrot.lane.b32.xlu1 %v3426_v38, %s3052_s20  ;;  %2441 = vmatprep.subr.bf16.mxu0 %v2440_v0 }
  0x89   :  { %2979 = vrot.lane.b32.xlu0 %v3435_v40, %s3052_s20  ;;  %v220_v7 = vsel %vm209_vm0, %v2696_v2, %v2676_v46  ;;  %v225_v9 = vsel %vm209_vm0, %v2697_v1, %v2686_v56 }
  0x8a   :  { %v3471_v13 = vpop.permute.xlu1 %2704  ;;  %v2442_v14 = vpack.c.bf16 %v225_v9, %v220_v7  ;;  %v228_v15 = vsel %vm209_vm0, %v2691_v6, %v2692_v5  ;;  %v227_v12 = vsel %vm209_vm0, %v2687_v55, %v2691_v6 }
  0x8b   :  { %v5569_v18 = vunpack.i.h.bf16 %v3471_v13  ;;  %v2700_v19 = vpop.permute.xlu0 %2699  ;;  %v2504_v20 = vpack.c.bf16 %v228_v15, %v223_v10  ;;  %v2506_v21 = vpack.c.bf16 %v227_v12, %v222_v3  ;;  %v2706_v22 = vunpack.i.l.bf16 %v3471_v13 }
  0x8c   :  { %2994 = vrot.lane.b32.xlu1 %v3385_v23, %s3053_s21  ;;  %2443 = vmatpush1.bf16.msra.mxu0 %v2442_v14  ;;  %v2702_v25 = vunpack.i.h.bf16 %v2700_v19  ;;  %v2701_v29 = vunpack.i.l.bf16 %v2700_v19 }
  0x8d   :  { %2989 = vrot.lane.b32.xlu0 %v3390_v24, %s3053_s21  ;;  %2505 = vmatprep.subr.bf16.mxu1 %v2504_v20  ;;  %v233_v23 = vsel %vm209_vm0, %v2706_v22, %v5569_v18 }
  0x8e   :  { %2507 = vmatpush1.bf16.msra.mxu1 %v2506_v21  ;;  %v3484_v33 = vpop.permute.xlu1 %2714  ;;  %v231_v24 = vsel %vm209_vm0, %v2701_v29, %v2702_v25  ;;  %v232_v47 = vsel %vm209_vm0, %v2702_v25, %v2706_v22 }
  0x8f   :  { %v5570_v35 = vunpack.i.h.bf16 %v3484_v33  ;;  %v2716_v37 = vunpack.i.l.bf16 %v3484_v33  ;;  %v2710_v39 = vpop.permute.xlu0 %2709 }
  0x90   :  { %v2712_v41 = vunpack.i.h.bf16 %v2710_v39  ;;  %v2711_v42 = vunpack.i.l.bf16 %v2710_v39  ;;  %3004 = vrot.lane.b32.xlu1 %v3426_v38, %s3053_s21 }
  0x91   :  { %2999 = vrot.lane.b32.xlu0 %v3435_v40, %s3053_s21  ;;  %v238_v43 = vsel %vm209_vm0, %v2716_v37, %v5570_v35 }
  0x92   :  { %v2725_v44 = vpop.permute.xlu1 %2724  ;;  %v236_v45 = vsel %vm209_vm0, %v2711_v42, %v2712_v41  ;;  %v2508_v46 = vpack.c.bf16 %v238_v43, %v233_v23  ;;  %v237_v48 = vsel %vm209_vm0, %v2712_v41, %v2716_v37 }
  0x93   :  { %v2727_v49 = vunpack.i.h.bf16 %v2725_v44  ;;  %v2726_v50 = vunpack.i.l.bf16 %v2725_v44  ;;  %v2720_v38 = vpop.permute.xlu0 %2719  ;;  %v2444_v51 = vpack.c.bf16 %v236_v45, %v231_v24  ;;  %v2510_v52 = vpack.c.bf16 %v237_v48, %v232_v47 }
  0x94   :  { %v2722_v40 = vunpack.i.h.bf16 %v2720_v38  ;;  %v2721_v53 = vunpack.i.l.bf16 %v2720_v38  ;;  %2509 = vmatprep.subr.bf16.mxu1 %v2508_v46 }
  0x95   :  { %2445 = vmatprep.subr.bf16.mxu0 %v2444_v51  ;;  %2511 = vmatpush1.bf16.msra.mxu1 %v2510_v52  ;;  %v241_v63 = vsel %vm209_vm0, %v2726_v50, %v2727_v49 }
  0x96   :  { %v2735_v54 = vpop.permute.xlu1 %2734  ;;  %v230_v55 = vsel %vm209_vm0, %v2721_v53, %v2701_v29  ;;  %v235_v56 = vsel %vm209_vm0, %v2722_v40, %v2711_v42 }
  0x97   :  { %v2737_v58 = vunpack.i.h.bf16 %v2735_v54  ;;  %v2736_v59 = vunpack.i.l.bf16 %v2735_v54  ;;  %v3504_v61 = vpop.permute.xlu0 %2729  ;;  %v2446_v62 = vpack.c.bf16 %v235_v56, %v230_v55 }
  0x98   :  { %v5568_v0 = vunpack.i.h.bf16 %v3504_v61  ;;  %v2731_v1 = vunpack.i.l.bf16 %v3504_v61 }
  0x99   :  { %2447 = vmatpush1.bf16.msra.mxu0 %v2446_v62  ;;  %v246_v2 = vsel %vm209_vm0, %v2736_v59, %v2737_v58 }
  0x9a   :  { %v2745_v6 = vpop.permute.xlu1 %2744  ;;  %v2448_v7 = vpack.c.bf16 %v246_v2, %v241_v63  ;;  %v243_v20 = vsel %vm209_vm0, %v2731_v1, %v5568_v0  ;;  %v242_v29 = vsel %vm209_vm0, %v2727_v49, %v2731_v1 }
  0x9b   :  { %v2747_v9 = vunpack.i.h.bf16 %v2745_v6  ;;  %v2746_v10 = vunpack.i.l.bf16 %v2745_v6  ;;  %v3510_v14 = vpop.permute.xlu0 %2739 }
  0x9c   :  { %v5567_v15 = vunpack.i.h.bf16 %v3510_v14  ;;  %v2741_v3 = vunpack.i.l.bf16 %v3510_v14  ;;  %2449 = vmatprep.subr.bf16.mxu0 %v2448_v7 }
  0x9d   :  { %v240_v12 = vsel %vm209_vm0, %v2746_v10, %v2726_v50  ;;  %v245_v19 = vsel %vm209_vm0, %v2747_v9, %v2736_v59 }
  0x9e   :  { %v3519_v21 = vpop.permute.xlu1 %2754  ;;  %v2450_v22 = vpack.c.bf16 %v245_v19, %v240_v12  ;;  %v248_v25 = vsel %vm209_vm0, %v2741_v3, %v5567_v15  ;;  %v247_v37 = vsel %vm209_vm0, %v2737_v58, %v2741_v3 }
  0x9f   :  { %v5565_v39 = vunpack.i.h.bf16 %v3519_v21  ;;  %v2750_v23 = vpop.permute.xlu0 %2749  ;;  %v2512_v41 = vpack.c.bf16 %v248_v25, %v243_v20  ;;  %v2514_v42 = vpack.c.bf16 %v247_v37, %v242_v29  ;;  %v2756_v24 = vunpack.i.l.bf16 %v3519_v21 }
  0xa0   :  { %2451 = vmatpush1.bf16.msra.mxu0 %v2450_v22  ;;  %v2752_v43 = vunpack.i.h.bf16 %v2750_v23  ;;  %v2751_v44 = vunpack.i.l.bf16 %v2750_v23 }
  0xa1   :  { %2513 = vmatprep.subr.bf16.mxu1 %v2512_v41  ;;  %v398_v49 = vsel %vm394_vm1, %v2756_v24, %v5565_v39 }
  0xa2   :  { %2515 = vmatpush1.bf16.msra.mxu1 %v2514_v42  ;;  %v3528_v45 = vpop.permute.xlu1 %2764  ;;  %v396_v51 = vsel %vm394_vm1, %v2751_v44, %v2752_v43  ;;  %v397_v55 = vsel %vm394_vm1, %v2752_v43, %v2756_v24 }
  0xa3   :  { %v5566_v46 = vunpack.i.h.bf16 %v3528_v45  ;;  %v2766_v47 = vunpack.i.l.bf16 %v3528_v45  ;;  %v2760_v48 = vpop.permute.xlu0 %2759 }
  0xa4   :  { %v2762_v50 = vunpack.i.h.bf16 %v2760_v48  ;;  %v2761_v38 = vunpack.i.l.bf16 %v2760_v48 }
  0xa5   :  { %v403_v52 = vsel %vm394_vm1, %v2766_v47, %v5566_v46 }
  0xa6   :  { %v2775_v40 = vpop.permute.xlu1 %2774  ;;  %v401_v53 = vsel %vm394_vm1, %v2761_v38, %v2762_v50  ;;  %v2516_v54 = vpack.c.bf16 %v403_v52, %v398_v49  ;;  %v402_v56 = vsel %vm394_vm1, %v2762_v50, %v2766_v47 }
  0xa7   :  { %v2777_v58 = vunpack.i.h.bf16 %v2775_v40  ;;  %v2776_v59 = vunpack.i.l.bf16 %v2775_v40  ;;  %v2770_v62 = vpop.permute.xlu0 %2769  ;;  %v2452_v63 = vpack.c.bf16 %v401_v53, %v396_v51  ;;  %v2518_v1 = vpack.c.bf16 %v402_v56, %v397_v55 }
  0xa8   :  { %v2772_v2 = vunpack.i.h.bf16 %v2770_v62  ;;  %v2771_v6 = vunpack.i.l.bf16 %v2770_v62  ;;  %2517 = vmatprep.subr.bf16.mxu1 %v2516_v54 }
  0xa9   :  { %2453 = vmatprep.subr.bf16.mxu0 %v2452_v63  ;;  %2519 = vmatpush1.bf16.msra.mxu1 %v2518_v1  ;;  %v406_v22 = vsel %vm394_vm1, %v2776_v59, %v2777_v58 }
  0xaa   :  { %v2785_v7 = vpop.permute.xlu1 %2784  ;;  %v395_v9 = vsel %vm394_vm1, %v2771_v6, %v2751_v44  ;;  %v400_v10 = vsel %vm394_vm1, %v2772_v2, %v2761_v38 }
  0xab   :  { %v2787_v3 = vunpack.i.h.bf16 %v2785_v7  ;;  %v2786_v12 = vunpack.i.l.bf16 %v2785_v7  ;;  %v3544_v19 = vpop.permute.xlu0 %2779  ;;  %v2454_v20 = vpack.c.bf16 %v400_v10, %v395_v9 }
  0xac   :  { %v5564_v25 = vunpack.i.h.bf16 %v3544_v19  ;;  %v2781_v29 = vunpack.i.l.bf16 %v3544_v19 }
  0xad   :  { %2455 = vmatpush1.bf16.msra.mxu0 %v2454_v20  ;;  %v411_v37 = vsel %vm394_vm1, %v2786_v12, %v2787_v3 }
  0xae   :  { %v2795_v23 = vpop.permute.xlu1 %2794  ;;  %v2456_v41 = vpack.c.bf16 %v411_v37, %v406_v22  ;;  %v408_v50 = vsel %vm394_vm1, %v2781_v29, %v5564_v25  ;;  %v407_v40 = vsel %vm394_vm1, %v2777_v58, %v2781_v29 }
  0xaf   :  { %v2797_v42 = vunpack.i.h.bf16 %v2795_v23  ;;  %v2796_v24 = vunpack.i.l.bf16 %v2795_v23  ;;  %v3550_v43 = vpop.permute.xlu0 %2789 }
  0xb0   :  { %v5563_v44 = vunpack.i.h.bf16 %v3550_v43  ;;  %v2791_v47 = vunpack.i.l.bf16 %v3550_v43  ;;  %2457 = vmatprep.subr.bf16.mxu0 %v2456_v41 }
  0xb1   :  { %v405_v48 = vsel %vm394_vm1, %v2796_v24, %v2776_v59  ;;  %v410_v49 = vsel %vm394_vm1, %v2797_v42, %v2786_v12 }
  0xb2   :  { %v3559_v38 = vpop.permute.xlu1 %2804  ;;  %v2458_v51 = vpack.c.bf16 %v410_v49, %v405_v48  ;;  %v413_v52 = vsel %vm394_vm1, %v2791_v47, %v5563_v44  ;;  %v412_v53 = vsel %vm394_vm1, %v2787_v3, %v2791_v47 }
  0xb3   :  { %v5561_v54 = vunpack.i.h.bf16 %v3559_v38  ;;  %v2800_v55 = vpop.permute.xlu0 %2799  ;;  %v2520_v56 = vpack.c.bf16 %v413_v52, %v408_v50  ;;  %v2522_v59 = vpack.c.bf16 %v412_v53, %v407_v40  ;;  %v2806_v62 = vunpack.i.l.bf16 %v3559_v38 }
  0xb4   :  { %2459 = vmatpush1.bf16.msra.mxu0 %v2458_v51  ;;  %v2802_v63 = vunpack.i.h.bf16 %v2800_v55  ;;  %v2801_v1 = vunpack.i.l.bf16 %v2800_v55 }
  0xb5   :  { %2521 = vmatprep.subr.bf16.mxu1 %v2520_v56  ;;  %v418_v9 = vsel %vm394_vm1, %v2806_v62, %v5561_v54 }
  0xb6   :  { %2523 = vmatpush1.bf16.msra.mxu1 %v2522_v59  ;;  %v3568_v2 = vpop.permute.xlu1 %2814  ;;  %v416_v12 = vsel %vm394_vm1, %v2801_v1, %v2802_v63  ;;  %v417_v23 = vsel %vm394_vm1, %v2802_v63, %v2806_v62 }
  0xb7   :  { %v5562_v6 = vunpack.i.h.bf16 %v3568_v2  ;;  %v2816_v58 = vunpack.i.l.bf16 %v3568_v2  ;;  %v2810_v7 = vpop.permute.xlu0 %2809 }
  0xb8   :  { %v2812_v10 = vunpack.i.h.bf16 %v2810_v7  ;;  %v2811_v3 = vunpack.i.l.bf16 %v2810_v7 }
  0xb9   :  { %v423_v20 = vsel %vm394_vm1, %v2816_v58, %v5562_v6 }
  0xba   :  { %v2825_v22 = vpop.permute.xlu1 %2824  ;;  %v421_v29 = vsel %vm394_vm1, %v2811_v3, %v2812_v10  ;;  %v2524_v37 = vpack.c.bf16 %v423_v20, %v418_v9  ;;  %v422_v41 = vsel %vm394_vm1, %v2812_v10, %v2816_v58 }
  0xbb   :  { %v2827_v42 = vunpack.i.h.bf16 %v2825_v22  ;;  %v2826_v24 = vunpack.i.l.bf16 %v2825_v22  ;;  %v2820_v47 = vpop.permute.xlu0 %2819  ;;  %v2460_v48 = vpack.c.bf16 %v421_v29, %v416_v12  ;;  %v2526_v49 = vpack.c.bf16 %v422_v41, %v417_v23 }
  0xbc   :  { %v2822_v50 = vunpack.i.h.bf16 %v2820_v47  ;;  %v2821_v51 = vunpack.i.l.bf16 %v2820_v47  ;;  %2525 = vmatprep.subr.bf16.mxu1 %v2524_v37 }
  0xbd   :  { %2461 = vmatprep.subr.bf16.mxu0 %v2460_v48  ;;  %2527 = vmatpush1.bf16.msra.mxu1 %v2526_v49  ;;  %v426_v63 = vsel %vm394_vm1, %v2826_v24, %v2827_v42 }
  0xbe   :  { %v2835_v52 = vpop.permute.xlu1 %2834  ;;  %v415_v40 = vsel %vm394_vm1, %v2821_v51, %v2801_v1  ;;  %v420_v53 = vsel %vm394_vm1, %v2822_v50, %v2811_v3 }
  0xbf   :  { %v2837_v55 = vunpack.i.h.bf16 %v2835_v52  ;;  %v2836_v56 = vunpack.i.l.bf16 %v2835_v52  ;;  %v3584_v59 = vpop.permute.xlu0 %2829  ;;  %v2462_v62 = vpack.c.bf16 %v420_v53, %v415_v40 }
  0xc0   :  { %v2832_v58 = vunpack.i.h.bf16 %v3584_v59  ;;  %v2831_v7 = vunpack.i.l.bf16 %v3584_v59 }
  0xc1   :  { %2463 = vmatpush1.bf16.msra.mxu0 %v2462_v62  ;;  %v431_v9 = vsel %vm394_vm1, %v2836_v56, %v2837_v55 }
  0xc2   :  { %v2845_v10 = vpop.permute.xlu1 %2844  ;;  %v2464_v12 = vpack.c.bf16 %v431_v9, %v426_v63  ;;  %v428_v41 = vsel %vm394_vm1, %v2831_v7, %v2832_v58  ;;  %v427_v50 = vsel %vm394_vm1, %v2827_v42, %v2831_v7 }
  0xc3   :  { %v2847_v20 = vunpack.i.h.bf16 %v2845_v10  ;;  %v2846_v1 = vunpack.i.l.bf16 %v2845_v10  ;;  %v3590_v22 = vpop.permute.xlu0 %2839 }
  0xc4   :  { %v2842_v3 = vunpack.i.h.bf16 %v3590_v22  ;;  %v2841_v29 = vunpack.i.l.bf16 %v3590_v22  ;;  %2465 = vmatprep.subr.bf16.mxu0 %v2464_v12  ;;  %v3049_v22 = vld [vmem:[%s5556_s0 + $0x170] sm:$0xff] }
  0xc5   :  { %v425_v37 = vsel %vm394_vm1, %v2846_v1, %v2826_v24  ;;  %v430_v23 = vsel %vm394_vm1, %v2847_v20, %v2836_v56 }
  0xc6   :  { %v3599_v47 = vpop.permute.xlu1 %2854  ;;  %v2466_v48 = vpack.c.bf16 %v430_v23, %v425_v37  ;;  %v433_v49 = vsel %vm394_vm1, %v2841_v29, %v2842_v3  ;;  %v432_v51 = vsel %vm394_vm1, %v2837_v55, %v2841_v29 }
  0xc7   :  { %v2857_v52 = vunpack.i.h.bf16 %v3599_v47  ;;  %v2850_v24 = vpop.permute.xlu0 %2849  ;;  %v2528_v40 = vpack.c.bf16 %v433_v49, %v428_v41  ;;  %v2530_v53 = vpack.c.bf16 %v432_v51, %v427_v50  ;;  %v2856_v56 = vunpack.i.l.bf16 %v3599_v47 }
  0xc8   :  { %2467 = vmatpush1.bf16.msra.mxu0 %v2466_v48  ;;  %v2852_v62 = vunpack.i.h.bf16 %v2850_v24  ;;  %v2851_v63 = vunpack.i.l.bf16 %v2850_v24 }
  0xc9   :  { %2529 = vmatprep.subr.bf16.mxu1 %v2528_v40  ;;  %v583_v7 = vsel %vm579_vm2, %v2856_v56, %v2857_v52 }
  0xca   :  { %2531 = vmatpush1.bf16.msra.mxu1 %v2530_v53  ;;  %v3608_v9 = vpop.permute.xlu1 %2864  ;;  %v581_v1 = vsel %vm579_vm2, %v2851_v63, %v2852_v62  ;;  %v582_v48 = vsel %vm579_vm2, %v2852_v62, %v2856_v56 }
  0xcb   :  { %v2867_v10 = vunpack.i.h.bf16 %v3608_v9  ;;  %v2866_v42 = vunpack.i.l.bf16 %v3608_v9  ;;  %v2860_v55 = vpop.permute.xlu0 %2859 }
  0xcc   :  { %v2862_v12 = vunpack.i.h.bf16 %v2860_v55  ;;  %v2861_v20 = vunpack.i.l.bf16 %v2860_v55 }
  0xcd   :  { %v588_v29 = vsel %vm579_vm2, %v2866_v42, %v2867_v10 }
  0xce   :  { %v2875_v37 = vpop.permute.xlu1 %2874  ;;  %v586_v23 = vsel %vm579_vm2, %v2861_v20, %v2862_v12  ;;  %v2532_v41 = vpack.c.bf16 %v588_v29, %v583_v7  ;;  %v587_v49 = vsel %vm579_vm2, %v2862_v12, %v2866_v42 }
  0xcf   :  { %v2877_v50 = vunpack.i.h.bf16 %v2875_v37  ;;  %v2876_v51 = vunpack.i.l.bf16 %v2875_v37  ;;  %v2870_v24 = vpop.permute.xlu0 %2869  ;;  %v2468_v40 = vpack.c.bf16 %v586_v23, %v581_v1  ;;  %v2534_v53 = vpack.c.bf16 %v587_v49, %v582_v48 }
  0xd0   :  { %v2872_v55 = vunpack.i.h.bf16 %v2870_v24  ;;  %v2871_v54 = vunpack.i.l.bf16 %v2870_v24  ;;  %2533 = vmatprep.subr.bf16.mxu1 %v2532_v41 }
  0xd1   :  { %2469 = vmatprep.subr.bf16.mxu0 %v2468_v40  ;;  %2535 = vmatpush1.bf16.msra.mxu1 %v2534_v53  ;;  %v591_v42 = vsel %vm579_vm2, %v2876_v51, %v2877_v50 }
  0xd2   :  { %v2885_v6 = vpop.permute.xlu1 %2884  ;;  %v580_v44 = vsel %vm579_vm2, %v2871_v54, %v2851_v63  ;;  %v585_v25 = vsel %vm579_vm2, %v2872_v55, %v2861_v20 }
  0xd3   :  { %v2887_v7 = vunpack.i.h.bf16 %v2885_v6  ;;  %v2886_v29 = vunpack.i.l.bf16 %v2885_v6  ;;  %v3624_v56 = vpop.permute.xlu0 %2879  ;;  %v2470_v62 = vpack.c.bf16 %v585_v25, %v580_v44 }
  0xd4   :  { %v2882_v12 = vunpack.i.h.bf16 %v3624_v56  ;;  %v2881_v1 = vunpack.i.l.bf16 %v3624_v56 }
  0xd5   :  { %2471 = vmatpush1.bf16.msra.mxu0 %v2470_v62  ;;  %v596_v37 = vsel %vm579_vm2, %v2886_v29, %v2887_v7 }
  0xd6   :  { %v2895_v23 = vpop.permute.xlu1 %2894  ;;  %v2472_v41 = vpack.c.bf16 %v596_v37, %v591_v42  ;;  %v593_v49 = vsel %vm579_vm2, %v2881_v1, %v2882_v12  ;;  %v592_v55 = vsel %vm579_vm2, %v2877_v50, %v2881_v1 }
  0xd7   :  { %v2897_v48 = vunpack.i.h.bf16 %v2895_v23  ;;  %v2896_v54 = vunpack.i.l.bf16 %v2895_v23  ;;  %v3630_v63 = vpop.permute.xlu0 %2889 }
  0xd8   :  { %v2892_v6 = vunpack.i.h.bf16 %v3630_v63  ;;  %v2891_v20 = vunpack.i.l.bf16 %v3630_v63  ;;  %2473 = vmatprep.subr.bf16.mxu0 %v2472_v41 }
  0xd9   :  { %v590_v25 = vsel %vm579_vm2, %v2896_v54, %v2876_v51  ;;  %v595_v44 = vsel %vm579_vm2, %v2897_v48, %v2886_v29 }
  0xda   :  { %v3639_v24 = vpop.permute.xlu1 %2904  ;;  %v2474_v40 = vpack.c.bf16 %v595_v44, %v590_v25  ;;  %v598_v53 = vsel %vm579_vm2, %v2891_v20, %v2892_v6  ;;  %v597_v62 = vsel %vm579_vm2, %v2887_v7, %v2891_v20 }
  0xdb   :  { %v5571_v42 = vunpack.i.h.bf16 %v3639_v24  ;;  %v2900_v51 = vpop.permute.xlu0 %2899  ;;  %v2536_v37 = vpack.c.bf16 %v598_v53, %v593_v49  ;;  %v2538_v29 = vpack.c.bf16 %v597_v62, %v592_v55  ;;  %v2906_v23 = vunpack.i.l.bf16 %v3639_v24 }
  0xdc   :  { %2475 = vmatpush1.bf16.msra.mxu0 %v2474_v40  ;;  %v2902_v41 = vunpack.i.h.bf16 %v2900_v51  ;;  %v2901_v48 = vunpack.i.l.bf16 %v2900_v51 }
  0xdd   :  { %2537 = vmatprep.subr.bf16.mxu1 %v2536_v37  ;;  %v603_v7 = vsel %vm579_vm2, %v2906_v23, %v5571_v42 }
  0xde   :  { %2539 = vmatpush1.bf16.msra.mxu1 %v2538_v29  ;;  %v3648_v54 = vpop.permute.xlu1 %2914  ;;  %v601_v49 = vsel %vm579_vm2, %v2901_v48, %v2902_v41  ;;  %v602_v51 = vsel %vm579_vm2, %v2902_v41, %v2906_v23 }
  0xdf   :  { %v5572_v25 = vunpack.i.h.bf16 %v3648_v54  ;;  %v2916_v50 = vunpack.i.l.bf16 %v3648_v54  ;;  %v2910_v1 = vpop.permute.xlu0 %2909 }
  0xe0   :  { %v2912_v20 = vunpack.i.h.bf16 %v2910_v1  ;;  %v2911_v44 = vunpack.i.l.bf16 %v2910_v1 }
  0xe1   :  { %v608_v40 = vsel %vm579_vm2, %v2916_v50, %v5572_v25 }
  0xe2   :  { %v2925_v53 = vpop.permute.xlu1 %2924  ;;  %v606_v55 = vsel %vm579_vm2, %v2911_v44, %v2912_v20  ;;  %v2540_v62 = vpack.c.bf16 %v608_v40, %v603_v7  ;;  %v607_v37 = vsel %vm579_vm2, %v2912_v20, %v2916_v50 }
  0xe3   :  { %v2927_v29 = vunpack.i.h.bf16 %v2925_v53  ;;  %v2926_v39 = vunpack.i.l.bf16 %v2925_v53  ;;  %v2920_v46 = vpop.permute.xlu0 %2919  ;;  %v2476_v15 = vpack.c.bf16 %v606_v55, %v601_v49  ;;  %v2542_v0 = vpack.c.bf16 %v607_v37, %v602_v51 }
  0xe4   :  { %v2922_v1 = vunpack.i.h.bf16 %v2920_v46  ;;  %v2921_v18 = vunpack.i.l.bf16 %v2920_v46  ;;  %2541 = vmatprep.subr.bf16.mxu1 %v2540_v62  ;;  %v2548_v62 = vpack.c.bf16 %v3379_v17, %v3374_v16  ;;  %v3693_v16 = vld [vmem:[%s5557_s1] sm:$0xff]  ;;  %v3042_v17 = vld [vmem:[%s5556_s0 + $0x50] sm:$0xff] }
  0xe5   :  { %2477 = vmatprep.subr.bf16.mxu0 %v2476_v15  ;;  %2543 = vmatpush1.bf16.msra.mxu1 %v2542_v0  ;;  %v611_v50 = vsel %vm579_vm2, %v2926_v39, %v2927_v29 }
  0xe6   :  { %v2935_v35 = vpop.permute.xlu1 %2934  ;;  %v600_v42 = vsel %vm579_vm2, %v2921_v18, %v2901_v48  ;;  %v605_v25 = vsel %vm579_vm2, %v2922_v1, %v2911_v44 }
  0xe7   :  { %v2937_v7 = vunpack.i.h.bf16 %v2935_v35  ;;  %v2936_v40 = vunpack.i.l.bf16 %v2935_v35  ;;  %v3664_v23 = vpop.permute.xlu0 %2929  ;;  %v2478_v41 = vpack.c.bf16 %v605_v25, %v600_v42 }
  0xe8   :  { %v2932_v20 = vunpack.i.h.bf16 %v3664_v23  ;;  %v2931_v49 = vunpack.i.l.bf16 %v3664_v23  ;;  %v5642_v23 = vunpack.i.h.bf16 %v3648_v54 }
  0xe9   :  { %2479 = vmatpush1.bf16.msra.mxu0 %v2478_v41  ;;  %v616_v15 = vsel %vm579_vm2, %v2936_v40, %v2937_v7 }
  0xea   :  { %v2945_v0 = vpop.permute.xlu1 %2944  ;;  %v2480_v46 = vpack.c.bf16 %v616_v15, %v611_v50  ;;  %v613_v55 = vsel %vm579_vm2, %v2931_v49, %v2932_v20  ;;  %v612_v41 = vsel %vm579_vm2, %v2927_v29, %v2931_v49  ;;  %v3043_v29 = vld [vmem:[%s5556_s0 + $0x20] sm:$0xff] }
  0xeb   :  { %v2947_v53 = vunpack.i.h.bf16 %v2945_v0  ;;  %v2946_v18 = vunpack.i.l.bf16 %v2945_v0  ;;  %v3670_v48 = vpop.permute.xlu0 %2939  ;;  %v2550_v49 = vpack.c.bf16 %v3042_v17, %v3043_v29  ;;  %v2552_v0 = vpack.c.bf16 %v3369_v11, %v3364_v8  ;;  %v3044_v8 = vld [vmem:[%s5556_s0 + $0x80] sm:$0xff]  ;;  %v3045_v11 = vld [vmem:[%s5556_s0 + $0xb0] sm:$0xff]  ;;  %v3764_v29 = vld [vmem:[%s5557_s1 + $0x38] sm:$0xff] }
  0xec   :  { %v2942_v35 = vunpack.i.h.bf16 %v3670_v48  ;;  %v2941_v44 = vunpack.i.l.bf16 %v3670_v48  ;;  %2481 = vmatprep.subr.bf16.mxu0 %v2480_v46  ;;  %v5643_v48 = vunpack.i.h.bf16 %v3639_v24  ;;  %v3907_v24 = vld [vmem:[%s5557_s1 + $0x68] sm:$0xff] }
  0xed   :  { %v610_v42 = vsel %vm579_vm2, %v2946_v18, %v2926_v39  ;;  %v615_v25 = vsel %vm579_vm2, %v2947_v53, %v2936_v40  ;;  %v3717_v18 = vld [vmem:[%s5557_s1 + $0x10] sm:$0xff] }
  0xee   :  { %v3681_v51 = vpop.permute.xlu1 %2954  ;;  %v2482_v37 = vpack.c.bf16 %v615_v25, %v610_v42  ;;  %v618_v1 = vsel %vm579_vm2, %v2941_v44, %v2942_v35  ;;  %v617_v39 = vsel %vm579_vm2, %v2937_v7, %v2941_v44  ;;  %v3704_v7 = vld [vmem:[%s5557_s1 + $0x18] sm:$0xff]  ;;  %v2554_v44 = vpack.c.bf16 %v3045_v11, %v3044_v8  ;;  %v3731_v25 = vld [vmem:[%s5557_s1 + $0x28] sm:$0xff]  ;;  %v3782_v11 = vld [vmem:[%s5557_s1 + $0x30] sm:$0xff] }
  0xef   :  { %v3688_v50 = vpop.permute.xlu0 %2949  ;;  %v2544_v40 = vpack.c.bf16 %v618_v1, %v613_v55  ;;  %v2546_v15 = vpack.c.bf16 %v617_v39, %v612_v41  ;;  %v3046_v1 = vld [vmem:[%s5556_s0 + $0xe0] sm:$0xff]  ;;  %v3047_v41 = vld [vmem:[%s5556_s0 + $0x110] sm:$0xff] }
  0xf0   :  { %2483 = vmatpush1.bf16.msra.mxu0 %v2482_v37  ;;  %v2556_v37 = vpack.c.bf16 %v3414_v31, %v3409_v30  ;;  %v2558_v39 = vpack.c.bf16 %v3047_v41, %v3046_v1  ;;  %v2952_v17 = vunpack.i.h.bf16 %v3688_v50  ;;  %v2957_v41 = vunpack.i.h.bf16 %v3681_v51 }
  0xf1   :  { %2545 = vmatprep.subr.bf16.mxu1 %v2544_v40  ;;  %2549 = vmatprep.subr.bf16.mxu0 %v2548_v62 }
  0xf2   :  { %2547 = vmatpush1.bf16.msra.mxu1 %v2546_v15  ;;  %v3708_v46 = vpop.permute.xlu1 %2964  ;;  %v229_v47 = vsel %vm209_vm0, %v2692_v5, %v2957_v41 }
  0xf3   :  { %v3710_v53 = vpop.permute.xlu0 %2959  ;;  %765 = vmatmul.mubr.f32.vlgmr.msra.gmra.mrb[0].mxu0 %v3693_v16  ;;  %2612 = vmatprep.subr.bf16.mxu1 %v2548_v62  ;;  %v3740_v62 = vld [vmem:[%s5557_s1 + $0x20] sm:$0xff] }
  0xf4   :  { %2551 = vmatpush1.bf16.msra.mxu0 %v2550_v49  ;;  %770 = vmatprep.mubr.f32.mxu0 %v3704_v7 }
  0xf5   :  { %926 = vmatmul.mubr.f32.vlgmr.msra.gmra.mrb[0].mxu1 %v3693_v16  ;;  %2553 = vmatprep.subr.bf16.mxu0 %v2552_v0 }
  0xf6   :  { %2628 = vmatpush1.bf16.msra.mxu1 %v2550_v49  ;;  %v3726_v42 = vpop.permute.xlu1 %2974  ;;  %931 = vmatprep.mubr.f32.mxu1 %v3704_v7  ;;  %v2560_v49 = vpack.c.bf16 %v3401_v27, %v3396_v26  ;;  %v2951_v26 = vunpack.i.l.bf16 %v3688_v50 }
  0xf7   :  { %v3733_v55 = vpop.permute.xlu0 %2969  ;;  %771 = vmatmul.mubr.f32.gmra.mrb[2].mxu0 %v3717_v18  ;;  %2613 = vmatprep.subr.bf16.mxu1 %v2552_v0 }
  0xf8   :  { %2555 = vmatpush1.bf16.msra.mxu0 %v2554_v44  ;;  %776 = vmatprep.mubr.f32.mxu0 %v3731_v25  ;;  %v214_v56 = vsel %vm209_vm0, %v2657_v36, %v2951_v26 }
  0xf9   :  { %932 = vmatmul.mubr.f32.gmra.mrb[2].mxu1 %v3717_v18  ;;  %2557 = vmatprep.subr.bf16.mxu0 %v2556_v37 }
  0xfa   :  { %2629 = vmatpush1.bf16.msra.mxu1 %v2554_v44  ;;  %v3752_v40 = vpop.permute.xlu1 %2984  ;;  %937 = vmatprep.mubr.f32.mxu1 %v3731_v25  ;;  %v2956_v44 = vunpack.i.l.bf16 %v3681_v51  ;;  %v3828_v51 = vld [vmem:[%s5557_s1 + $0x40] sm:$0xff] }
  0xfb   :  { %v2987_v15 = vunpack.i.h.bf16 %v3752_v40  ;;  %v2986_v30 = vunpack.i.l.bf16 %v3752_v40  ;;  %v3756_v31 = vpop.permute.xlu0 %2979  ;;  %777 = vmatmul.mubr.f32.gmra.mrb[4].mxu0 %v3740_v62  ;;  %2614 = vmatprep.subr.bf16.mxu1 %v2556_v37 }
  0xfc   :  { %2559 = vmatpush1.bf16.msra.mxu0 %v2558_v39  ;;  %782 = vmatprep.mubr.f32.mxu0 %v3764_v29  ;;  %v224_v34 = vsel %vm209_vm0, %v2682_v60, %v2956_v44 }
  0xfd   :  { %v429_v0 = vsel %vm394_vm1, %v2832_v58, %v2986_v30  ;;  %v434_v8 = vsel %vm394_vm1, %v2842_v3, %v2987_v15  ;;  %938 = vmatmul.mubr.f32.gmra.mrb[4].mxu1 %v3740_v62  ;;  %v3048_v58 = vld [vmem:[%s5556_s0 + $0x140] sm:$0xff]  ;;  %2561 = vmatprep.subr.bf16.mxu0 %v2560_v49  ;;  %v2570_v54 = vpack.c.bf16 %v229_v47, %v224_v34 }
  0xfe   :  { %v3785_v27 = vpack.c.bf16 %v434_v8, %v429_v0  ;;  %2630 = vmatpush1.bf16.msra.mxu1 %v2558_v39  ;;  %v3787_v59 = vpop.permute.xlu1 %2994  ;;  %v2562_v3 = vpack.c.bf16 %v3049_v22, %v3048_v58  ;;  %943 = vmatprep.mubr.f32.mxu1 %v3764_v29  ;;  %v219_v39 = vsel %vm209_vm0, %v2667_v32, %v2952_v17  ;;  %v3812_v58 = vld [vmem:[%s5557_s1 + $0x48] sm:$0xff]  ;;  %v3921_v47 = vld [vmem:[%s5557_s1 + $0x60] sm:$0xff] }
  0xff   :  { %v2997_v37 = vunpack.i.h.bf16 %v3787_v59  ;;  %v2996_v50 = vunpack.i.l.bf16 %v3787_v59  ;;  %v3798_v1 = vpop.permute.xlu0 %2989  ;;  %783 = vmatmul.mubr.f32.gmra.mrb[6].mxu0 %v3782_v11  ;;  %v2564_v22 = vpack.c.bf16 %v2952_v17, %v2951_v26  ;;  %2615 = vmatprep.subr.bf16.mxu1 %v2560_v49  ;;  %v2566_v26 = vpack.c.bf16 %v219_v39, %v214_v56 }
 0x100   :  { %v2992_v0 = vunpack.i.h.bf16 %v3798_v1  ;;  %v2991_v8 = vunpack.i.l.bf16 %v3798_v1  ;;  %2563 = vmatpush1.bf16.msra.mxu0 %v2562_v3  ;;  %788 = vmatprep.mubr.f32.mxu0 %v3812_v58  ;;  %v2966_v56 = vunpack.i.l.bf16 %v3708_v46 }
 0x101   :  { %v594_v28 = vsel %vm579_vm2, %v2882_v12, %v2996_v50  ;;  %v599_v32 = vsel %vm579_vm2, %v2892_v6, %v2997_v37  ;;  %944 = vmatmul.mubr.f32.gmra.mrb[6].mxu1 %v3782_v11  ;;  %2565 = vmatprep.subr.bf16.mxu0 %v2564_v22  ;;  %v2600_v1 = vpack.c.bf16 %v2997_v37, %v2996_v50  ;;  %v697_v37 = vld [vmem:[%s5557_s1 + $0xe8] sm:$0xff]  ;;  %v696_v50 = vld [vmem:[%s5557_s1 + $0xe0] sm:$0xff] }
 0x102   :  { %v3833_v17 = vpack.c.bf16 %v599_v32, %v594_v28  ;;  %v589_v12 = vsel %vm579_vm2, %v2867_v10, %v2992_v0  ;;  %v584_v63 = vsel %vm579_vm2, %v2857_v52, %v2991_v8  ;;  %v3845_v6 = vpop.permute.xlu1 %3004  ;;  %2631 = vmatpush1.bf16.msra.mxu1 %v2562_v3  ;;  %v2568_v52 = vpack.c.bf16 %v2957_v41, %v2956_v44  ;;  %v3879_v44 = vld [vmem:[%s5557_s1 + $0x58] sm:$0xff]  ;;  %v3897_v28 = vld [vmem:[%s5557_s1 + $0x50] sm:$0xff] }
 0x103   :  { %v3850_v36 = vpack.c.bf16 %v589_v12, %v584_v63  ;;  %v3007_v9 = vunpack.i.h.bf16 %v3845_v6  ;;  %v3006_v10 = vunpack.i.l.bf16 %v3845_v6  ;;  %v3854_v49 = vpop.permute.xlu0 %2999  ;;  %789 = vmatmul.mubr.f32.gmra.mrb[8].mxu0 %v3828_v51  ;;  %949 = vmatprep.mubr.f32.mxu1 %v3812_v58  ;;  %v2962_v3 = vunpack.i.h.bf16 %v3710_v53 }
 0x104   :  { %v3002_v57 = vunpack.i.h.bf16 %v3854_v49  ;;  %v3001_v60 = vunpack.i.l.bf16 %v3854_v49  ;;  %v2961_v41 = vunpack.i.l.bf16 %v3710_v53  ;;  %2616 = vmatprep.subr.bf16.mxu1 %v2564_v22  ;;  %2567 = vmatpush1.bf16.msra.mxu0 %v2566_v26  ;;  %v2967_v22 = vunpack.i.h.bf16 %v3708_v46  ;;  %v698_v49 = vld [vmem:[%s5557_s1 + $0xf0] sm:$0xff] }
 0x105   :  { %v614_v4 = vsel %vm579_vm2, %v2932_v20, %v3006_v10  ;;  %v619_v5 = vsel %vm579_vm2, %v2942_v35, %v3007_v9  ;;  %950 = vmatmul.mubr.f32.gmra.mrb[8].mxu1 %v3828_v51  ;;  %794 = vmatprep.mubr.f32.mxu0 %v3879_v44  ;;  %v5644_v12 = vunpack.i.h.bf16 %v3484_v33  ;;  %v2596_v40 = vpack.c.bf16 %v2992_v0, %v2991_v8  ;;  %v695_v0 = vld [vmem:[%s5557_s1 + $0xd8] sm:$0xff] }
 0x106   :  { %v3882_v39 = vpack.c.bf16 %v619_v5, %v614_v4  ;;  %v609_v20 = vsel %vm579_vm2, %v5642_v23, %v3002_v57  ;;  %v604_v35 = vsel %vm579_vm2, %v5643_v48, %v3001_v60  ;;  %2632 = vmatpush1.bf16.msra.mxu1 %v2566_v26  ;;  %955 = vmatprep.mubr.f32.mxu1 %v3879_v44  ;;  %v5645_v26 = vunpack.i.h.bf16 %v3471_v13  ;;  %v3929_v13 = vld [vmem:[%s5557_s1 + $0x78] sm:$0xff] }
 0x107   :  { %v3899_v53 = vpack.c.bf16 %v609_v20, %v604_v35  ;;  %v2572_v32 = vpack.c.bf16 %v2962_v3, %v2961_v41  ;;  %795 = vmatmul.mubr.f32.gmra.mrb[10].mxu0 %v3897_v28  ;;  %2569 = vmatprep.subr.bf16.mxu0 %v2568_v52  ;;  %v239_v63 = vsel %vm209_vm0, %v5644_v12, %v2962_v3  ;;  %v5647_v4 = vunpack.i.h.bf16 %v3510_v14  ;;  %v3943_v20 = vld [vmem:[%s5557_s1 + $0x70] sm:$0xff]  ;;  %v3965_v12 = vld [vmem:[%s5557_s1 + $0x80] sm:$0xff] }
 0x108   :  { %v234_v34 = vsel %vm209_vm0, %v5645_v26, %v2961_v41  ;;  %2617 = vmatprep.subr.bf16.mxu1 %v2568_v52  ;;  %2571 = vmatpush1.bf16.msra.mxu0 %v2570_v54  ;;  %v2576_v33 = vpack.c.bf16 %v2967_v22, %v2966_v56  ;;  %v5646_v52 = vunpack.i.h.bf16 %v3504_v61  ;;  %v2972_v41 = vunpack.i.h.bf16 %v3733_v55 }
 0x109   :  { %956 = vmatmul.mubr.f32.gmra.mrb[10].mxu1 %v3897_v28  ;;  %800 = vmatprep.mubr.f32.mxu0 %v3907_v24  ;;  %v2574_v46 = vpack.c.bf16 %v239_v63, %v234_v34  ;;  %v249_v5 = vsel %vm209_vm0, %v5647_v4, %v2967_v22  ;;  %v2971_v23 = vunpack.i.l.bf16 %v3733_v55  ;;  %v3951_v55 = vld [vmem:[%s5557_s1 + $0x88] sm:$0xff]  ;;  %v2977_v48 = vunpack.i.h.bf16 %v3726_v42 }
 0x10a   :  { %2633 = vmatpush1.bf16.msra.mxu1 %v2570_v54  ;;  %961 = vmatprep.mubr.f32.mxu1 %v3907_v24  ;;  %v244_v3 = vsel %vm209_vm0, %v5646_v52, %v2966_v56  ;;  %v2976_v35 = vunpack.i.l.bf16 %v3726_v42  ;;  %v5648_v54 = vunpack.i.h.bf16 %v3528_v45  ;;  %v5649_v22 = vunpack.i.h.bf16 %v3519_v21  ;;  %v3973_v21 = vld [vmem:[%s5557_s1 + $0x98] sm:$0xff] }
 0x10b   :  { %801 = vmatmul.mubr.f32.gmra.mrb[12].mxu0 %v3921_v47  ;;  %2573 = vmatprep.subr.bf16.mxu0 %v2572_v32  ;;  %v2578_v61 = vpack.c.bf16 %v249_v5, %v244_v3  ;;  %v2580_v14 = vpack.c.bf16 %v2972_v41, %v2971_v23  ;;  %v5650_v63 = vunpack.i.h.bf16 %v3544_v19  ;;  %v5651_v34 = vunpack.i.h.bf16 %v3550_v43  ;;  %v3987_v3 = vld [vmem:[%s5557_s1 + $0x90] sm:$0xff] }
 0x10c   :  { %2618 = vmatprep.subr.bf16.mxu1 %v2572_v32  ;;  %2575 = vmatpush1.bf16.msra.mxu0 %v2574_v46  ;;  %v404_v32 = vsel %vm394_vm1, %v5648_v54, %v2972_v41  ;;  %v399_v56 = vsel %vm394_vm1, %v5649_v22, %v2971_v23  ;;  %v2584_v45 = vpack.c.bf16 %v2977_v48, %v2976_v35  ;;  %v2981_v52 = vunpack.i.l.bf16 %v3756_v31 }
 0x10d   :  { %962 = vmatmul.mubr.f32.gmra.mrb[12].mxu1 %v3921_v47  ;;  %806 = vmatprep.mubr.f32.mxu0 %v3929_v13  ;;  %v2582_v42 = vpack.c.bf16 %v404_v32, %v399_v56  ;;  %v409_v26 = vsel %vm394_vm1, %v5650_v63, %v2976_v35  ;;  %v5652_v4 = vunpack.i.h.bf16 %v3568_v2  ;;  %v5653_v41 = vunpack.i.h.bf16 %v3559_v38 }
 0x10e   :  { %2634 = vmatpush1.bf16.msra.mxu1 %v2574_v46  ;;  %967 = vmatprep.mubr.f32.mxu1 %v3929_v13  ;;  %v2982_v46 = vunpack.i.h.bf16 %v3756_v31  ;;  %v3995_v31 = vld [vmem:[%s5557_s1 + $0xa8] sm:$0xff]  ;;  %v2592_v38 = vpack.c.bf16 %v2987_v15, %v2986_v30  ;;  %v4043_v30 = vld [vmem:[%s5557_s1 + $0xc0] sm:$0xff]  ;;  %v2604_v59 = vpack.c.bf16 %v3002_v57, %v3001_v60  ;;  %v2608_v8 = vpack.c.bf16 %v3007_v9, %v3006_v10 }
 0x10f   :  { %807 = vmatmul.mubr.f32.gmra.mrb[14].mxu0 %v3943_v20  ;;  %2577 = vmatprep.subr.bf16.mxu0 %v2576_v33  ;;  %v419_v23 = vsel %vm394_vm1, %v5653_v41, %v2981_v52  ;;  %v4037_v15 = vld [vmem:[%s5557_s1 + $0xc8] sm:$0xff] }
 0x110   :  { %2619 = vmatprep.subr.bf16.mxu1 %v2576_v33  ;;  %2579 = vmatpush1.bf16.msra.mxu0 %v2578_v61  ;;  %v414_v33 = vsel %vm394_vm1, %v5651_v34, %v2977_v48  ;;  %v2588_v43 = vpack.c.bf16 %v2982_v46, %v2981_v52  ;;  %v424_v5 = vsel %vm394_vm1, %v5652_v4, %v2982_v46  ;;  %v4025_v48 = vld [vmem:[%s5557_s1 + $0xb0] sm:$0xff] }
 0x111   :  { %968 = vmatmul.mubr.f32.gmra.mrb[14].mxu1 %v3943_v20  ;;  %812 = vmatprep.mubr.f32.mxu0 %v3951_v55  ;;  %v2586_v19 = vpack.c.bf16 %v414_v33, %v409_v26  ;;  %v2590_v2 = vpack.c.bf16 %v424_v5, %v419_v23 }
 0x112   :  { %2635 = vmatpush1.bf16.msra.mxu1 %v2578_v61  ;;  %973 = vmatprep.mubr.f32.mxu1 %v3951_v55  ;;  %v4007_v61 = vld [vmem:[%s5557_s1 + $0xa0] sm:$0xff] }
 0x113   :  { %813 = vmatmul.mubr.f32.gmra.mrb[16].mxu0 %v3965_v12  ;;  %2581 = vmatprep.subr.bf16.mxu0 %v2580_v14 }
 0x114   :  { %2620 = vmatprep.subr.bf16.mxu1 %v2580_v14  ;;  %2583 = vmatpush1.bf16.msra.mxu0 %v2582_v42  ;;  %v4019_v14 = vld [vmem:[%s5557_s1 + $0xb8] sm:$0xff] }
 0x115   :  { %974 = vmatmul.mubr.f32.gmra.mrb[16].mxu1 %v3965_v12  ;;  %818 = vmatprep.mubr.f32.mxu0 %v3973_v21 }
 0x116   :  { %2636 = vmatpush1.bf16.msra.mxu1 %v2582_v42  ;;  %979 = vmatprep.mubr.f32.mxu1 %v3973_v21 }
 0x117   :  { %819 = vmatmul.mubr.f32.gmra.mrb[18].mxu0 %v3987_v3  ;;  %2585 = vmatprep.subr.bf16.mxu0 %v2584_v45 }
 0x118   :  { %2621 = vmatprep.subr.bf16.mxu1 %v2584_v45  ;;  %2587 = vmatpush1.bf16.msra.mxu0 %v2586_v19 }
 0x119   :  { %980 = vmatmul.mubr.f32.gmra.mrb[18].mxu1 %v3987_v3  ;;  %824 = vmatprep.mubr.f32.mxu0 %v3995_v31 }
 0x11a   :  { %2637 = vmatpush1.bf16.msra.mxu1 %v2586_v19  ;;  %985 = vmatprep.mubr.f32.mxu1 %v3995_v31 }
 0x11b   :  { %825 = vmatmul.mubr.f32.gmra.mrb[20].mxu0 %v4007_v61  ;;  %2589 = vmatprep.subr.bf16.mxu0 %v2588_v43 }
 0x11c   :  { %2622 = vmatprep.subr.bf16.mxu1 %v2588_v43  ;;  %2591 = vmatpush1.bf16.msra.mxu0 %v2590_v2 }
 0x11d   :  { %986 = vmatmul.mubr.f32.gmra.mrb[20].mxu1 %v4007_v61  ;;  %830 = vmatprep.mubr.f32.mxu0 %v4019_v14 }
 0x11e   :  { %2638 = vmatpush1.bf16.msra.mxu1 %v2590_v2  ;;  %991 = vmatprep.mubr.f32.mxu1 %v4019_v14 }
 0x11f   :  { %831 = vmatmul.mubr.f32.gmra.mrb[22].mxu0 %v4025_v48  ;;  %2593 = vmatprep.subr.bf16.mxu0 %v2592_v38 }
 0x120   :  { %2623 = vmatprep.subr.bf16.mxu1 %v2592_v38  ;;  %2595 = vmatpush1.bf16.msra.mxu0 %v3785_v27 }
 0x121   :  { %992 = vmatmul.mubr.f32.gmra.mrb[22].mxu1 %v4025_v48  ;;  %836 = vmatprep.mubr.f32.mxu0 %v4037_v15 }
 0x122   :  { %2639 = vmatpush1.bf16.msra.mxu1 %v3785_v27  ;;  %997 = vmatprep.mubr.f32.mxu1 %v4037_v15  ;;  %v694_v27 = vld [vmem:[%s5557_s1 + $0xd0] sm:$0xff] }
 0x123   :  { %837 = vmatmul.mubr.f32.gmra.mrb[24].mxu0 %v4043_v30  ;;  %2597 = vmatprep.subr.bf16.mxu0 %v2596_v40 }
 0x124   :  { %2624 = vmatprep.subr.bf16.mxu1 %v2596_v40  ;;  %2599 = vmatpush1.bf16.msra.mxu0 %v3850_v36 }
 0x125   :  { %998 = vmatmul.mubr.f32.gmra.mrb[24].mxu1 %v4043_v30  ;;  %842 = vmatprep.mubr.f32.mxu0 %v695_v0 }
 0x126   :  { %2640 = vmatpush1.bf16.msra.mxu1 %v3850_v36  ;;  %1003 = vmatprep.mubr.f32.mxu1 %v695_v0  ;;  %v699_v36 = vld [vmem:[%s5557_s1 + $0xf8] sm:$0xff] }
 0x127   :  { %843 = vmatmul.mubr.f32.gmra.mrb[26].mxu0 %v694_v27  ;;  %2601 = vmatprep.subr.bf16.mxu0 %v2600_v1 }
 0x128   :  { %2625 = vmatprep.subr.bf16.mxu1 %v2600_v1  ;;  %2603 = vmatpush1.bf16.msra.mxu0 %v3833_v17 }
 0x129   :  { %1004 = vmatmul.mubr.f32.gmra.mrb[26].mxu1 %v694_v27  ;;  %848 = vmatprep.mubr.f32.mxu0 %v697_v37 }
 0x12a   :  { %2641 = vmatpush1.bf16.msra.mxu1 %v3833_v17  ;;  %1009 = vmatprep.mubr.f32.mxu1 %v697_v37  ;;  %v3050_v17 = vld [vmem:[%s5557_s1 + $0x8] sm:$0xff] }
 0x12b   :  { %849 = vmatmul.mubr.f32.gmra.mrb[28].mxu0 %v696_v50  ;;  %2605 = vmatprep.subr.bf16.mxu0 %v2604_v59 }
 0x12c   :  { %2626 = vmatprep.subr.bf16.mxu1 %v2604_v59  ;;  %2607 = vmatpush1.bf16.msra.mxu0 %v3899_v53 }
 0x12d   :  { %1010 = vmatmul.mubr.f32.gmra.mrb[28].mxu1 %v696_v50  ;;  %854 = vmatprep.mubr.f32.mxu0 %v699_v36 }
 0x12e   :  { %2642 = vmatpush1.bf16.msra.mxu1 %v3899_v53  ;;  %1015 = vmatprep.mubr.f32.mxu1 %v699_v36 }
 0x12f   :  { %855 = vmatmul.mubr.f32.gmra.mrb[30].mxu0 %v698_v49  ;;  %2609 = vmatprep.subr.bf16.mxu0 %v2608_v8 }
 0x130   :  { %2627 = vmatprep.subr.bf16.mxu1 %v2608_v8  ;;  %2611 = vmatpush1.bf16.msra.mxu0 %v3882_v39 }
 0x131   :  { %1016 = vmatmul.mubr.f32.gmra.mrb[30].mxu1 %v698_v49  ;;  %1086 = vmatprep.mubr.f32.mxu0 %v3050_v17 }
 0x132   :  { %2643 = vmatpush1.bf16.msra.mxu1 %v3882_v39  ;;  %1134 = vmatprep.mubr.f32.mxu1 %v3951_v55 }
 0x133   :  { %1087 = vmatmul.mubr.f32.vlgmr.msra.gmra.mrb[32].mxu0 %v3693_v16 }
 0x134   :  { %1092 = vmatprep.mubr.f32.mxu0 %v3704_v7 }
 0x135   :  { %1135 = vmatmul.mubr.f32.vlgmr.msra.gmra.mrb[32].mxu1 %v3965_v12 }
 0x136   :  { %1140 = vmatprep.mubr.f32.mxu1 %v3973_v21 }
 0x137   :  { %1093 = vmatmul.mubr.f32.gmra.mrb[34].mxu0 %v3717_v18 }
 0x138   :  { %1098 = vmatprep.mubr.f32.mxu0 %v3731_v25 }
 0x139   :  { %1141 = vmatmul.mubr.f32.gmra.mrb[34].mxu1 %v3987_v3 }
 0x13a   :  { %1146 = vmatprep.mubr.f32.mxu1 %v3995_v31 }
 0x13b   :  { %1099 = vmatmul.mubr.f32.gmra.mrb[36].mxu0 %v3740_v62 }
 0x13c   :  { %1104 = vmatprep.mubr.f32.mxu0 %v3764_v29 }
 0x13d   :  { %1147 = vmatmul.mubr.f32.gmra.mrb[36].mxu1 %v4007_v61 }
 0x13e   :  { %1152 = vmatprep.mubr.f32.mxu1 %v4019_v14 }
 0x13f   :  { %1105 = vmatmul.mubr.f32.gmra.mrb[38].mxu0 %v3782_v11 }
 0x140   :  { %1110 = vmatprep.mubr.f32.mxu0 %v3812_v58 }
 0x141   :  { %1153 = vmatmul.mubr.f32.gmra.mrb[38].mxu1 %v4025_v48 }
 0x142   :  { %1158 = vmatprep.mubr.f32.mxu1 %v4037_v15 }
 0x143   :  { %1111 = vmatmul.mubr.f32.gmra.mrb[40].mxu0 %v3828_v51 }
 0x144   :  { %1116 = vmatprep.mubr.f32.mxu0 %v3879_v44 }
 0x145   :  { %1159 = vmatmul.mubr.f32.gmra.mrb[40].mxu1 %v4043_v30 }
 0x146   :  { %1164 = vmatprep.mubr.f32.mxu1 %v695_v0 }
 0x147   :  { %1117 = vmatmul.mubr.f32.gmra.mrb[42].mxu0 %v3897_v28 }
 0x148   :  { %1122 = vmatprep.mubr.f32.mxu0 %v3907_v24 }
 0x149   :  { %1165 = vmatmul.mubr.f32.gmra.mrb[42].mxu1 %v694_v27 }
 0x14a   :  { %1170 = vmatprep.mubr.f32.mxu1 %v697_v37 }
 0x14b   :  { %1123 = vmatmul.mubr.f32.gmra.mrb[44].mxu0 %v3921_v47 }
 0x14c   :  { %1128 = vmatprep.mubr.f32.mxu0 %v3929_v13 }
 0x14d   :  { %1171 = vmatmul.mubr.f32.gmra.mrb[44].mxu1 %v696_v50 }
 0x14e   :  { %1176 = vmatprep.mubr.f32.mxu1 %v699_v36 }
 0x14f   :  { %1129 = vmatmul.mubr.f32.gmra.mrb[46].mxu0 %v3943_v20 }
 0x151   :  { %1177 = vmatmul.mubr.f32.gmra.mrb[46].mxu1 %v698_v49 }
 0x1c6   :  { %v766_v16 = vpop.f32.mrb[0].mxu0 }
 0x1c7   :  { %v768_v7 = vpop.f32.mrb[1].mxu0  ;;  %v1183_v57 = vmax.f32 %v766_v16, -2.0 }
 0x1c8   :  { %v927_v18 = vpop.f32.mrb[0].mxu1  ;;  %v1184_v60 = vmax.f32 %v768_v7, -2.0 }
 0x1c9   :  { %v929_v25 = vpop.f32.mrb[1].mxu1  ;;  %v4123_v24 = vmin.f32 %v1183_v57, -0.7  ;;  %v1185_v20 = vmax.f32 %v927_v18, -2.0 }
 0x1ca   :  { %v772_v62 = vpop.f32.mrb[2].mxu0  ;;  %v4125_v47 = vmin.f32 %v1184_v60, -0.7  ;;  %v1186_v12 = vmax.f32 %v929_v25, -2.0 }
 0x1cb   :  { %v774_v29 = vpop.f32.mrb[3].mxu0  ;;  %5654 = vst [vmem:[#allocation2_spill] sm:$0xff] %v4123_v24  ;;  %v1189_v54 = vmax.f32 %v772_v62, -2.0  ;;  %v4137_v21 = vmin.f32 %v1185_v20, -0.7  ;;  %v1520_v26 = vmul.f32 %v4123_v24, %v4123_v24 }
 0x1cc   :  { %v933_v11 = vpop.f32.mrb[2].mxu1  ;;  %5655 = vst [vmem:[#allocation3_spill] sm:$0xff] %v4125_v47  ;;  %v1190_v32 = vmax.f32 %v774_v29, -2.0  ;;  %v1375_v56 = vadd.f32 %v4125_v47, %v4123_v24  ;;  %v1521_v34 = vmul.f32 %v4125_v47, %v4125_v47  ;;  %v4152_v43 = vmin.f32 %v1186_v12, -0.7 }
 0x1cd   :  { %v935_v58 = vpop.f32.mrb[3].mxu1  ;;  %5656 = vst [vmem:[#allocation4_spill] sm:$0xff] %v4137_v21  ;;  %v1191_v63 = vmax.f32 %v933_v11, -2.0  ;;  %v4143_v33 = vmin.f32 %v1189_v54, -0.7  ;;  %v1522_v38 = vmul.f32 %v4137_v21, %v4137_v21 }
 0x1ce   :  { %v778_v51 = vpop.f32.mrb[4].mxu0  ;;  %v4145_v46 = vmin.f32 %v1190_v32, -0.7  ;;  %v1376_v19 = vadd.f32 %v1375_v56, %v4137_v21  ;;  %5659 = vst [vmem:[#allocation7_spill] sm:$0xff] %v4152_v43  ;;  %v1192_v5 = vmax.f32 %v935_v58, -2.0  ;;  %v1616_v40 = vadd.f32 %v1521_v34, %v1520_v26 }
 0x1cf   :  { %v780_v6 = vpop.f32.mrb[5].mxu0  ;;  %v1195_v45 = vmax.f32 %v778_v51, -2.0  ;;  %5657 = vst [vmem:[#allocation5_spill] sm:$0xff] %v4143_v33  ;;  %v4164_v2 = vmin.f32 %v1191_v63, -0.7  ;;  %v1526_v15 = vmul.f32 %v4143_v33, %v4143_v33  ;;  %v1523_v0 = vmul.f32 %v4152_v43, %v4152_v43 }
 0x1d0   :  { %v939_v9 = vpop.f32.mrb[4].mxu1  ;;  %v1196_v42 = vmax.f32 %v780_v6, -2.0  ;;  %5658 = vst [vmem:[#allocation6_spill] sm:$0xff] %v4145_v46  ;;  %v1527_v30 = vmul.f32 %v4145_v46, %v4145_v46  ;;  %v1384_v27 = vadd.f32 %v4145_v46, %v4143_v33  ;;  %v4182_v8 = vadd.f32 %v1376_v19, %v4152_v43 }
 0x1d1   :  { %v4117_v10 = vpop.f32.mrb[5].mxu1  ;;  %v4158_v41 = vmin.f32 %v1195_v45, -0.7  ;;  %5662 = vst [vmem:[#allocation10_spill] sm:$0xff] %v4164_v2  ;;  %v1197_v1 = vmax.f32 %v939_v9, -2.0  ;;  %v1528_v18 = vmul.f32 %v4164_v2, %v4164_v2  ;;  %v1617_v57 = vadd.f32 %v1616_v40, %v1522_v38 }
 0x1d2   :  { %v784_v44 = vpop.f32.mrb[6].mxu0  ;;  %v4160_v23 = vmin.f32 %v1196_v42, -0.7  ;;  %v1198_v59 = vmax.f32 %v4117_v10, -2.0  ;;  %v4184_v36 = vmin.f32 %v1192_v5, -0.7  ;;  %v1624_v58 = vadd.f32 %v1527_v30, %v1526_v15 }
 0x1d3   :  { %v786_v39 = vpop.f32.mrb[7].mxu0  ;;  %5660 = vst [vmem:[#allocation8_spill] sm:$0xff] %v4158_v41  ;;  %v1201_v61 = vmax.f32 %v784_v44, -2.0  ;;  %v4201_v51 = vmin.f32 %v1197_v1, -0.7  ;;  %v1385_v60 = vadd.f32 %v1384_v27, %v4164_v2  ;;  %v1532_v44 = vmul.f32 %v4158_v41, %v4158_v41 }
 0x1d4   :  { %v4119_v28 = vpop.f32.mrb[6].mxu1  ;;  %5661 = vst [vmem:[#allocation9_spill] sm:$0xff] %v4160_v23  ;;  %v1202_v14 = vmax.f32 %v786_v39, -2.0  ;;  %5663 = vst [vmem:[#allocation11_spill] sm:$0xff] %v4184_v36  ;;  %v1392_v49 = vadd.f32 %v4160_v23, %v4158_v41  ;;  %v1533_v39 = vmul.f32 %v4160_v23, %v4160_v23  ;;  %v1625_v30 = vadd.f32 %v1624_v58, %v1528_v18 }
 0x1d5   :  { %v4121_v53 = vpop.f32.mrb[7].mxu1  ;;  %v4188_v17 = vmin.f32 %v1201_v61, -0.7  ;;  %v1203_v16 = vmax.f32 %v4119_v28, -2.0  ;;  %5666 = vst [vmem:[#allocation14_spill] sm:$0xff] %v4201_v51  ;;  %v1534_v63 = vmul.f32 %v4201_v51, %v4201_v51  ;;  %v4243_v61 = vadd.f32 %v1617_v57, %v1523_v0 }
 0x1d6   :  { %v4127_v13 = vpop.f32.mrb[8].mxu0  ;;  %v4195_v25 = vmin.f32 %v1202_v14, -0.7  ;;  %v1204_v62 = vmax.f32 %v4121_v53, -2.0  ;;  %v4213_v28 = vmin.f32 %v1198_v59, -0.7  ;;  %v1393_v20 = vadd.f32 %v1392_v49, %v4201_v51 }
 0x1d7   :  { %v4129_v55 = vpop.f32.mrb[9].mxu0  ;;  %5664 = vst [vmem:[#allocation12_spill] sm:$0xff] %v4188_v17  ;;  %v1207_v29 = vmax.f32 %v4127_v13, -2.0  ;;  %v1529_v13 = vmul.f32 %v4184_v36, %v4184_v36  ;;  %v4222_v54 = vmin.f32 %v1203_v16, -0.7  ;;  %v1632_v38 = vadd.f32 %v1533_v39, %v1532_v44 }
 0x1d8   :  { %v4131_v35 = vpop.f32.mrb[8].mxu1  ;;  %5665 = vst [vmem:[#allocation13_spill] sm:$0xff] %v4195_v25  ;;  %v1208_v6 = vmax.f32 %v4129_v55, -2.0  ;;  %5667 = vst [vmem:[#allocation15_spill] sm:$0xff] %v4213_v28  ;;  %v1538_v55 = vmul.f32 %v4188_v17, %v4188_v17  ;;  %v1400_v32 = vadd.f32 %v4195_v25, %v4188_v17  ;;  %v1539_v56 = vmul.f32 %v4195_v25, %v4195_v25 }
 0x1d9   :  { %v4133_v22 = vpop.f32.mrb[9].mxu1  ;;  %5668 = vst [vmem:[#allocation16_spill] sm:$0xff] %v4222_v54  ;;  %v4228_v12 = vmin.f32 %v1204_v62, -0.7  ;;  %v4230_v45 = vmin.f32 %v1207_v29, -0.7  ;;  %v1535_v14 = vmul.f32 %v4213_v28, %v4213_v28  ;;  %v4256_v59 = vadd.f32 %v1393_v20, %v4213_v28 }
 0x1da   :  { %v4147_v52 = vpop.f32.mrb[10].mxu0  ;;  %v4236_v26 = vmin.f32 %v1208_v6, -0.7  ;;  %v1209_v34 = vmax.f32 %v4131_v35, -2.0  ;;  %v1210_v40 = vmax.f32 %v4133_v22, -2.0  ;;  %v4253_v35 = vadd.f32 %v1385_v60, %v4184_v36 }
 0x1db   :  { %v4154_v31 = vpop.f32.mrb[11].mxu0  ;;  %5669 = vst [vmem:[#allocation17_spill] sm:$0xff] %v4228_v12  ;;  %5670 = vst [vmem:[#allocation18_spill] sm:$0xff] %v4230_v45  ;;  %v1640_v0 = vadd.f32 %v1539_v56, %v1538_v55  ;;  %v1401_v49 = vadd.f32 %v1400_v32, %v4222_v54  ;;  %v1540_v16 = vmul.f32 %v4222_v54, %v4222_v54  ;;  %v1213_v6 = vmax.f32 %v4147_v52, -2.0 }
 0x1dc   :  { %v4149_v3 = vpop.f32.mrb[10].mxu1  ;;  %5671 = vst [vmem:[#allocation19_spill] sm:$0xff] %v4236_v26  ;;  %v1541_v22 = vmul.f32 %v4228_v12, %v4228_v12  ;;  %v1545_v62 = vmul.f32 %v4236_v26, %v4236_v26  ;;  %v4271_v29 = vmin.f32 %v1209_v34, -0.7  ;;  %v4273_v58 = vmin.f32 %v1210_v40, -0.7 }
 0x1dd   :  { %v4156_v4 = vpop.f32.mrb[11].mxu1  ;;  %v1214_v57 = vmax.f32 %v4154_v31, -2.0  ;;  %v4281_v39 = vadd.f32 %v1625_v30, %v1529_v13  ;;  %v1215_v20 = vmax.f32 %v4149_v3, -2.0  ;;  %v1633_v34 = vadd.f32 %v1632_v38, %v1534_v63 }
 0x1de   :  { %v4166_v48 = vpop.f32.mrb[12].mxu0  ;;  %5672 = vst [vmem:[#allocation20_spill] sm:$0xff] %v4271_v29  ;;  %5673 = vst [vmem:[#allocation21_spill] sm:$0xff] %v4273_v58  ;;  %v1641_v13 = vadd.f32 %v1640_v0, %v1540_v16  ;;  %v4310_v38 = vmin.f32 %v1213_v6, -0.7 }
 0x1df   :  { %v4177_v37 = vpop.f32.mrb[13].mxu0  ;;  %v1219_v1 = vmax.f32 %v4166_v48, -2.0  ;;  %v1544_v48 = vmul.f32 %v4230_v45, %v4230_v45  ;;  %v4312_v0 = vmin.f32 %v1214_v57, -0.7  ;;  %v4329_v57 = vadd.f32 %v1633_v34, %v1535_v14 }
 0x1e0   :  { %v4179_v50 = vpop.f32.mrb[12].mxu1  ;;  %v1220_v27 = vmax.f32 %v4177_v37, -2.0  ;;  %v1408_v37 = vadd.f32 %v4236_v26, %v4230_v45  ;;  %v4295_v26 = vadd.f32 %v1401_v49, %v4228_v12  ;;  %5677 = vst [vmem:[#allocation25_spill] sm:$0xff] %v4310_v38 }
 0x1e1   :  { %v4191_v7 = vpop.f32.mrb[13].mxu1  ;;  %v4284_v55 = vmin.f32 %v1219_v1, -0.7  ;;  %v1648_v30 = vadd.f32 %v1545_v62, %v1544_v48  ;;  %v1216_v1 = vmax.f32 %v4156_v4, -2.0  ;;  %5678 = vst [vmem:[#allocation26_spill] sm:$0xff] %v4312_v0  ;;  %v1551_v14 = vmul.f32 %v4312_v0, %v4312_v0 }
 0x1e2   :  { %v4199_v11 = vpop.f32.mrb[14].mxu0  ;;  %v4286_v32 = vmin.f32 %v1220_v27, -0.7  ;;  %v1409_v3 = vadd.f32 %v1408_v37, %v4271_v29  ;;  %v1221_v27 = vmax.f32 %v4179_v50, -2.0  ;;  %v4316_v4 = vmin.f32 %v1215_v20, -0.7 }
 0x1e3   :  { %v4204_v9 = vpop.f32.mrb[15].mxu0  ;;  %5674 = vst [vmem:[#allocation22_spill] sm:$0xff] %v4284_v55  ;;  %v1225_v40 = vmax.f32 %v4199_v11, -2.0  ;;  %v1546_v11 = vmul.f32 %v4271_v29, %v4271_v29  ;;  %v1556_v50 = vmul.f32 %v4284_v55, %v4284_v55  ;;  %v1222_v48 = vmax.f32 %v4191_v7, -2.0 }
 0x1e4   :  { %v4206_v10 = vpop.f32.mrb[14].mxu1  ;;  %5675 = vst [vmem:[#allocation23_spill] sm:$0xff] %v4286_v32  ;;  %v1226_v52 = vmax.f32 %v4204_v9, -2.0  ;;  %v4308_v9 = vmul.f32 %v4273_v58, %v4273_v58  ;;  %5679 = vst [vmem:[#allocation27_spill] sm:$0xff] %v4316_v4  ;;  %v1557_v16 = vmul.f32 %v4286_v32, %v4286_v32  ;;  %v4331_v29 = vadd.f32 %v1641_v13, %v1541_v22 }
 0x1e5   :  { %v4215_v53 = vpop.f32.mrb[15].mxu1  ;;  %v4323_v37 = vmin.f32 %v1225_v40, -0.7  ;;  %v4333_v20 = vmin.f32 %v1216_v1, -0.7  ;;  %v4338_v54 = vadd.f32 %v1409_v3, %v4273_v58  ;;  %v4340_v25 = vadd.f32 %v1648_v30, %v1546_v11 }
 0x1e6   :  { %v4232_v42 = vpop.f32.mrb[16].mxu0  ;;  %5676 = vst [vmem:[#allocation24_spill] sm:$0xff] %v4308_v9  ;;  %v4325_v62 = vmin.f32 %v1226_v52, -0.7  ;;  %v4335_v12 = vmin.f32 %v1221_v27, -0.7  ;;  %v1550_v7 = vmul.f32 %v4310_v38, %v4310_v38  ;;  %v1416_v40 = vadd.f32 %v4312_v0, %v4310_v38 }
 0x1e7   :  { %v4239_v19 = vpop.f32.mrb[17].mxu0  ;;  %5680 = vst [vmem:[#allocation28_spill] sm:$0xff] %v4323_v37  ;;  %5682 = vst [vmem:[#allocation30_spill] sm:$0xff] %v4333_v20  ;;  %v1227_v22 = vmax.f32 %v4206_v10, -2.0  ;;  %v4355_v13 = vmul.f32 %v4316_v4, %v4316_v4  ;;  %v1664_v30 = vadd.f32 %v1557_v16, %v1556_v50  ;;  %v4357_v3 = vmin.f32 %v1222_v48, -0.7 }
 0x1e8   :  { %v4241_v5 = vpop.f32.mrb[16].mxu1  ;;  %5681 = vst [vmem:[#allocation29_spill] sm:$0xff] %v4325_v62  ;;  %5683 = vst [vmem:[#allocation31_spill] sm:$0xff] %v4335_v12  ;;  %v1228_v1 = vmax.f32 %v4215_v53, -2.0  ;;  %v1562_v11 = vmul.f32 %v4323_v37, %v4323_v37  ;;  %v1432_v10 = vadd.f32 %v4325_v62, %v4323_v37  ;;  %v1563_v0 = vmul.f32 %v4325_v62, %v4325_v62 }
 0x1e9   :  { %v4248_v15 = vpop.f32.mrb[17].mxu1  ;;  %5684 = vst [vmem:[#allocation32_spill] sm:$0xff] %v4340_v25  ;;  %5685 = vst [vmem:[#allocation33_spill] sm:$0xff] %v4355_v13  ;;  %v1231_v38 = vmax.f32 %v4232_v42, -2.0  ;;  %v4373_v50 = vmul.f32 %v4333_v20, %v4333_v20  ;;  %v1424_v53 = vadd.f32 %v4286_v32, %v4284_v55  ;;  %v1558_v16 = vmul.f32 %v4335_v12, %v4335_v12 }
 0x1ea   :  { %v4263_v18 = vpop.f32.mrb[18].mxu0  ;;  %5686 = vst [vmem:[#allocation34_spill] sm:$0xff] %v4357_v3  ;;  %v1232_v48 = vmax.f32 %v4239_v19, -2.0  ;;  %v4384_v62 = vadd.f32 %v1551_v14, %v1550_v7  ;;  %v4386_v42 = vmin.f32 %v1227_v22, -0.7  ;;  %v1233_v28 = vmax.f32 %v4241_v5, -2.0 }
 0x1eb   :  { %v4277_v60 = vpop.f32.mrb[19].mxu0  ;;  %5687 = vst [vmem:[#allocation35_spill] sm:$0xff] %v4373_v50  ;;  %v1237_v51 = vmax.f32 %v4263_v18, -2.0  ;;  %v4391_v23 = vadd.f32 %v1416_v40, %v4316_v4  ;;  %v1665_v32 = vadd.f32 %v1664_v30, %v1558_v16  ;;  %v1559_v55 = vmul.f32 %v4357_v3, %v4357_v3 }
 0x1ec   :  { %v4279_v44 = vpop.f32.mrb[18].mxu1  ;;  %5688 = vst [vmem:[#allocation36_spill] sm:$0xff] %v4384_v62  ;;  %5689 = vst [vmem:[#allocation37_spill] sm:$0xff] %v4386_v42  ;;  %v1238_v19 = vmax.f32 %v4277_v60, -2.0  ;;  %v1672_v41 = vadd.f32 %v1563_v0, %v1562_v11  ;;  %v1433_v36 = vadd.f32 %v1432_v10, %v4386_v42  ;;  %v4397_v7 = vmin.f32 %v1228_v1, -0.7 }
 0x1ed   :  { %v4288_v56 = vpop.f32.mrb[19].mxu1  ;;  %5690 = vst [vmem:[#allocation38_spill] sm:$0xff] %v4391_v23  ;;  %v4399_v14 = vmin.f32 %v1231_v38, -0.7  ;;  %v4406_v18 = vadd.f32 %v1424_v53, %v4335_v12  ;;  %v4408_v40 = vmin.f32 %v1232_v48, -0.7  ;;  %v1564_v38 = vmul.f32 %v4386_v42, %v4386_v42 }
 0x1ee   :  { %v4292_v31 = vpop.f32.mrb[20].mxu0  ;;  %5691 = vst [vmem:[#allocation39_spill] sm:$0xff] %v4397_v7  ;;  %v4418_v1 = vmin.f32 %v1233_v28, -0.7  ;;  %v1234_v10 = vmax.f32 %v4248_v15, -2.0  ;;  %v4425_v48 = vadd.f32 %v1665_v32, %v1559_v55  ;;  %v1240_v12 = vmax.f32 %v4288_v56, -2.0 }
 0x1ef   :  { %v4300_v45 = vpop.f32.mrb[21].mxu0  ;;  %5692 = vst [vmem:[#allocation40_spill] sm:$0xff] %v4399_v14  ;;  %5693 = vst [vmem:[#allocation41_spill] sm:$0xff] %v4406_v18  ;;  %v1243_v30 = vmax.f32 %v4292_v31, -2.0  ;;  %v4421_v16 = vmin.f32 %v1237_v51, -0.7  ;;  %v4431_v4 = vadd.f32 %v1672_v41, %v1564_v38  ;;  %v4434_v42 = vadd.f32 %v1433_v36, %v4397_v7 }
 0x1f0   :  { %v4302_v63 = vpop.f32.mrb[20].mxu1  ;;  %5694 = vst [vmem:[#allocation42_spill] sm:$0xff] %v4408_v40  ;;  %v1244_v60 = vmax.f32 %v4300_v45, -2.0  ;;  %5695 = vst [vmem:[#allocation43_spill] sm:$0xff] %v4418_v1  ;;  %v4427_v31 = vmin.f32 %v1238_v19, -0.7  ;;  %v1568_v15 = vmul.f32 %v4399_v14, %v4399_v14  ;;  %v1440_v55 = vadd.f32 %v4408_v40, %v4399_v14 }
 0x1f1   :  { %v4314_v49 = vpop.f32.mrb[21].mxu1  ;;  %5696 = vst [vmem:[#allocation44_spill] sm:$0xff] %v4421_v16  ;;  %5697 = vst [vmem:[#allocation45_spill] sm:$0xff] %v4425_v48  ;;  %v1239_v45 = vmax.f32 %v4279_v44, -2.0  ;;  %v1245_v28 = vmax.f32 %v4302_v63, -2.0  ;;  %v1569_v36 = vmul.f32 %v4408_v40, %v4408_v40  ;;  %v4454_v63 = vmul.f32 %v4418_v1, %v4418_v1 }
 0x1f2   :  { %v4327_v6 = vpop.f32.mrb[22].mxu0  ;;  %5698 = vst [vmem:[#allocation46_spill] sm:$0xff] %v4427_v31  ;;  %5699 = vst [vmem:[#allocation47_spill] sm:$0xff] %v4431_v4  ;;  %v1246_v51 = vmax.f32 %v4314_v49, -2.0  ;;  %v4442_v32 = vmin.f32 %v1243_v30, -0.7  ;;  %v1574_v19 = vmul.f32 %v4421_v16, %v4421_v16  ;;  %v1575_v38 = vmul.f32 %v4427_v31, %v4427_v31 }
 0x1f3   :  { %v4349_v34 = vpop.f32.mrb[23].mxu0  ;;  %5700 = vst [vmem:[#allocation48_spill] sm:$0xff] %v4434_v42  ;;  %v4444_v44 = vmin.f32 %v1244_v60, -0.7  ;;  %v4456_v49 = vmin.f32 %v1234_v10, -0.7  ;;  %v1448_v10 = vadd.f32 %v4427_v31, %v4421_v16 }
 0x1f4   :  { %v4351_v52 = vpop.f32.mrb[22].mxu1  ;;  %5701 = vst [vmem:[#allocation49_spill] sm:$0xff] %v4442_v32  ;;  %v4466_v2 = vmin.f32 %v1239_v45, -0.7  ;;  %v4468_v46 = vmin.f32 %v1240_v12, -0.7  ;;  %v1580_v47 = vmul.f32 %v4442_v32, %v4442_v32 }
 0x1f5   :  { %v4360_v27 = vpop.f32.mrb[23].mxu1  ;;  %5702 = vst [vmem:[#allocation50_spill] sm:$0xff] %v4444_v44  ;;  %5703 = vst [vmem:[#allocation51_spill] sm:$0xff] %v4456_v49  ;;  %v1249_v33 = vmax.f32 %v4327_v6, -2.0  ;;  %v4473_v40 = vmin.f32 %v1245_v28, -0.7  ;;  %v1581_v12 = vmul.f32 %v4444_v44, %v4444_v44  ;;  %v1456_v31 = vadd.f32 %v4444_v44, %v4442_v32 }
 0x1f6   :  { %v4369_v58 = vpop.f32.mrb[24].mxu0  ;;  %5704 = vst [vmem:[#allocation52_spill] sm:$0xff] %v4466_v2  ;;  %5705 = vst [vmem:[#allocation53_spill] sm:$0xff] %v4468_v46  ;;  %v4475_v14 = vmin.f32 %v1246_v51, -0.7  ;;  %v1250_v43 = vmax.f32 %v4349_v34, -2.0  ;;  %v4490_v51 = vadd.f32 %v1569_v36, %v1568_v15  ;;  %v1441_v34 = vadd.f32 %v1440_v55, %v4418_v1 }
 0x1f7   :  { %v4380_v37 = vpop.f32.mrb[25].mxu0  ;;  %5706 = vst [vmem:[#allocation54_spill] sm:$0xff] %v4473_v40  ;;  %v1251_v45 = vmax.f32 %v4351_v52, -2.0  ;;  %v1252_v6 = vmax.f32 %v4360_v27, -2.0  ;;  %v1255_v16 = vmax.f32 %v4369_v58, -2.0  ;;  %v4498_v4 = vmul.f32 %v4456_v49, %v4456_v49 }
 0x1f8   :  { %v4382_v17 = vpop.f32.mrb[24].mxu1  ;;  %5707 = vst [vmem:[#allocation55_spill] sm:$0xff] %v4475_v14  ;;  %v4500_v52 = vadd.f32 %v1575_v38, %v1574_v19  ;;  %v4504_v27 = vmul.f32 %v4466_v2, %v4466_v2  ;;  %v4506_v7 = vmin.f32 %v1249_v33, -0.7  ;;  %v1449_v55 = vadd.f32 %v1448_v10, %v4466_v2 }
 0x1f9   :  { %v4401_v22 = vpop.f32.mrb[25].mxu1  ;;  %v4513_v36 = vmul.f32 %v4468_v46, %v4468_v46  ;;  %v4517_v58 = vmul.f32 %v4473_v40, %v4473_v40  ;;  %v4519_v19 = vmin.f32 %v1250_v43, -0.7  ;;  %v4521_v38 = vadd.f32 %v1581_v12, %v1580_v47 }
 0x1fa   :  { %v4403_v5 = vpop.f32.mrb[26].mxu0  ;;  %5708 = vst [vmem:[#allocation56_spill] sm:$0xff] %v4506_v7  ;;  %v4525_v33 = vmul.f32 %v4475_v14, %v4475_v14  ;;  %v4527_v44 = vmin.f32 %v1251_v45, -0.7  ;;  %v4529_v32 = vmin.f32 %v1252_v6, -0.7  ;;  %v4532_v1 = vadd.f32 %v1456_v31, %v4473_v40 }
 0x1fb   :  { %v4412_v0 = vpop.f32.mrb[27].mxu0  ;;  %5710 = vst [vmem:[#allocation58_spill] sm:$0xff] %v4519_v19  ;;  %v4534_v48 = vmin.f32 %v1255_v16, -0.7  ;;  %v1256_v43 = vmax.f32 %v4380_v37, -2.0  ;;  %v1586_v18 = vmul.f32 %v4506_v7, %v4506_v7  ;;  %v1257_v45 = vmax.f32 %v4382_v17, -2.0 }
 0x1fc   :  { %v4414_v11 = vpop.f32.mrb[26].mxu1  ;;  %5711 = vst [vmem:[#allocation59_spill] sm:$0xff] %v4527_v44  ;;  %v1442_v6 = vadd.f32 %v1441_v34, %v4456_v49  ;;  %v1464_v50 = vadd.f32 %v4519_v19, %v4506_v7  ;;  %v1587_v16 = vmul.f32 %v4519_v19, %v4519_v19  ;;  %v1450_v34 = vadd.f32 %v1449_v55, %v4468_v46 }
 0x1fd   :  { %v4423_v53 = vpop.f32.mrb[27].mxu1  ;;  %5712 = vst [vmem:[#allocation60_spill] sm:$0xff] %v4534_v48  ;;  %v4556_v7 = vmul.f32 %v4529_v32, %v4529_v32  ;;  %v4560_v19 = vmin.f32 %v1256_v43, -0.7 }
 0x1fe   :  { %v4446_v56 = vpop.f32.mrb[28].mxu0  ;;  %v4568_v55 = vadd.f32 %v1587_v16, %v1586_v18  ;;  %v4571_v46 = vadd.f32 %v1464_v50, %v4527_v44 }
 0x1ff   :  { %v4460_v30 = vpop.f32.mrb[29].mxu0  ;;  %5715 = vst [vmem:[#allocation63_spill] sm:$0xff] %v4556_v7  ;;  %5716 = vst [vmem:[#allocation64_spill] sm:$0xff] %v4560_v19 }
 0x200   :  { %v4448_v41 = vpop.f32.mrb[28].mxu1 }
 0x201   :  { %v4462_v60 = vpop.f32.mrb[29].mxu1 }
 0x202   :  { %v4478_v21 = vpop.f32.mrb[30].mxu0 }
 0x203   :  { %v4486_v24 = vpop.f32.mrb[31].mxu0 }
 0x204   :  { %v4488_v28 = vpop.f32.mrb[30].mxu1 }
 0x205   :  { %v4508_v15 = vpop.f32.mrb[31].mxu1 }
 0x206   :  { %5709 = vst [vmem:[#allocation57_spill] sm:$0xff] %v4508_v15  ;;  %v1088_v10 = vpop.f32.mrb[32].mxu0 }
 0x207   :  { %v1187_v42 = vmax.f32 %v1088_v10, -2.0  ;;  %v1090_v47 = vpop.f32.mrb[33].mxu0  ;;  %v4549_v10 = vmul.f32 %v4527_v44, %v4527_v44 }
 0x208   :  { %v1136_v2 = vpop.f32.mrb[32].mxu1  ;;  %v1188_v3 = vmax.f32 %v1090_v47, -2.0 }
 0x209   :  { %v1138_v12 = vpop.f32.mrb[33].mxu1  ;;  %v4545_v31 = vmin.f32 %v1187_v42, -0.7  ;;  %v1235_v37 = vmax.f32 %v1136_v2, -2.0  ;;  %v1592_v42 = vmul.f32 %v4534_v48, %v4534_v48 }
 0x20a   :  { %v4551_v40 = vmin.f32 %v1188_v3, -0.7  ;;  %v1236_v62 = vmax.f32 %v1138_v12, -2.0  ;;  %v1094_v17 = vpop.f32.mrb[34].mxu0  ;;  %v4564_v3 = vmin.f32 %v1257_v45, -0.7 }
 0x20b   :  { %5713 = vst [vmem:[#allocation61_spill] sm:$0xff] %v4545_v31  ;;  %v4562_v2 = vmin.f32 %v1235_v37, -0.7  ;;  %v1096_v49 = vpop.f32.mrb[35].mxu0  ;;  %v1378_v15 = vadd.f32 %v4182_v8, %v4545_v31  ;;  %v1193_v37 = vmax.f32 %v1094_v17, -2.0  ;;  %v1524_v8 = vmul.f32 %v4545_v31, %v4545_v31 }
 0x20c   :  { %5714 = vst [vmem:[#allocation62_spill] sm:$0xff] %v4551_v40  ;;  %v1142_v47 = vpop.f32.mrb[34].mxu1  ;;  %5718 = vst [vmem:[#allocation66_spill] sm:$0xff] %v4564_v3  ;;  %v4566_v12 = vmin.f32 %v1236_v62, -0.7  ;;  %v1380_v43 = vsel %vm1379_vm3, %v4551_v40, 0.0  ;;  %v1525_v16 = vmul.f32 %v4551_v40, %v4551_v40 }
 0x20d   :  { %5717 = vst [vmem:[#allocation65_spill] sm:$0xff] %v4562_v2  ;;  %v1144_v13 = vpop.f32.mrb[35].mxu1  ;;  %v1241_v25 = vmax.f32 %v1142_v47, -2.0  ;;  %v1194_v23 = vmax.f32 %v1096_v49, -2.0  ;;  %v1443_v62 = vadd.f32 %v1442_v6, %v4562_v2  ;;  %v1381_v18 = vadd.f32 %v1380_v43, %v1378_v15 }
 0x20e   :  { %5719 = vst [vmem:[#allocation67_spill] sm:$0xff] %v4566_v12  ;;  %v1242_v9 = vmax.f32 %v1144_v13, -2.0  ;;  %v4580_v45 = vpop.f32.mrb[36].mxu0  ;;  %v1444_v50 = vsel %vm1379_vm3, %v4566_v12, 0.0  ;;  %v1258_v49 = vmax.f32 %v4401_v22, -2.0  ;;  %v1681_v15 = vadd.f32 %v4490_v51, %v4454_v63 }
 0x20f   :  { %v4577_v20 = vmin.f32 %v1241_v25, -0.7  ;;  %v4593_v17 = vpop.f32.mrb[37].mxu0  ;;  %v1445_v47 = vadd.f32 %v1444_v50, %v1443_v62  ;;  %v1261_v43 = vmax.f32 %v4403_v5, -2.0  ;;  %1382 = vadd.xlane.f32.xlu0 %v1381_v18  ;;  %v1619_v44 = vadd.f32 %v4243_v61, %v1524_v8 }
 0x210   :  { %v4582_v13 = vpop.f32.mrb[36].mxu1  ;;  %v4591_v25 = vmin.f32 %v1242_v9, -0.7  ;;  %v1620_v31 = vsel %vm1379_vm3, %v1525_v16, 0.0  ;;  %v1593_v9 = vmul.f32 %v4560_v19, %v4560_v19  ;;  %v4603_v22 = vmin.f32 %v1193_v37, -0.7 }
 0x211   :  { %5720 = vst [vmem:[#allocation68_spill] sm:$0xff] %v4577_v20  ;;  %v1150_v6 = vpop.f32.mrb[37].mxu1  ;;  %v1451_v40 = vadd.f32 %v1450_v34, %v4577_v20  ;;  %1446 = vadd.xlane.f32.xlu1 %v1445_v47  ;;  %v1572_v5 = vmul.f32 %v4562_v2, %v4562_v2  ;;  %v1573_v61 = vmul.f32 %v4566_v12, %v4566_v12  ;;  %v1262_v34 = vmax.f32 %v4412_v0, -2.0 }
 0x212   :  { %5721 = vst [vmem:[#allocation69_spill] sm:$0xff] %v4591_v25  ;;  %v4605_v7 = vpop.f32.mrb[38].mxu0  ;;  %v1472_v63 = vadd.f32 %v4560_v19, %v4534_v48  ;;  %v4617_v51 = vmul.f32 %v4564_v3, %v4564_v3  ;;  %v4620_v37 = vmin.f32 %v1194_v23, -0.7  ;;  %v4624_v50 = vmin.f32 %v1258_v49, -0.7 }
 0x213   :  { %v4622_v18 = vpop.f32.mrb[39].mxu0  ;;  %v1621_v16 = vadd.f32 %v1620_v31, %v1619_v44  ;;  %v1452_v47 = vsel %vm1379_vm3, %v4591_v25, 0.0  ;;  %v1682_v19 = vadd.f32 %v1681_v15, %v4498_v4  ;;  %v4631_v48 = vmin.f32 %v1261_v43, -0.7 }
 0x214   :  { %v4607_v62 = vpop.f32.mrb[38].mxu1  ;;  %5722 = vst [vmem:[#allocation70_spill] sm:$0xff] %v4617_v51  ;;  %5723 = vst [vmem:[#allocation71_spill] sm:$0xff] %v4620_v37  ;;  %v1263_v12 = vmax.f32 %v4414_v11, -2.0  ;;  %v1453_v2 = vadd.f32 %v1452_v47, %v1451_v40  ;;  %v1684_v23 = vsel %vm1379_vm3, %v1573_v61, 0.0  ;;  %v4635_v0 = vadd.f32 %v1593_v9, %v1592_v42 }
 0x215   :  { %v4626_v8 = vpop.f32.mrb[39].mxu1  ;;  %5724 = vst [vmem:[#allocation72_spill] sm:$0xff] %v4631_v48  ;;  %v1264_v49 = vmax.f32 %v4423_v53, -2.0  ;;  %1622 = vadd.xlane.f32.xlu1 %v1621_v16  ;;  %v1683_v31 = vadd.f32 %v1682_v19, %v1572_v5  ;;  %v1530_v4 = vmul.f32 %v4603_v22, %v4603_v22  ;;  %v4645_v15 = vadd.f32 %v1472_v63, %v4564_v3 }
 0x216   :  { %v4638_v51 = vpop.f32.mrb[40].mxu0  ;;  %v4647_v11 = vmin.f32 %v1262_v34, -0.7  ;;  %v1248_v40 = vmax.f32 %v1150_v6, -2.0  ;;  %1454 = vadd.xlane.f32.xlu0 %v1453_v2  ;;  %v1531_v53 = vmul.f32 %v4620_v37, %v4620_v37  ;;  %v4657_v19 = vmul.f32 %v4624_v50, %v4624_v50 }
 0x217   :  { %v4649_v42 = vpop.f32.mrb[41].mxu0  ;;  %v1247_v9 = vmax.f32 %v4582_v13, -2.0  ;;  %v1685_v5 = vadd.f32 %v1684_v23, %v1683_v31  ;;  %v1627_v61 = vadd.f32 %v4281_v39, %v1530_v4  ;;  %v1598_v6 = vmul.f32 %v4631_v48, %v4631_v48 }
 0x218   :  { %v4640_v44 = vpop.f32.mrb[40].mxu1  ;;  %5725 = vst [vmem:[#allocation73_spill] sm:$0xff] %v4647_v11  ;;  %5726 = vst [vmem:[#allocation74_spill] sm:$0xff] %v4657_v19  ;;  %v4663_v2 = vmin.f32 %v1263_v12, -0.7  ;;  %v1199_v63 = vmax.f32 %v4580_v45, -2.0  ;;  %v1579_v39 = vmul.f32 %v4591_v25, %v4591_v25  ;;  %v1387_v31 = vadd.f32 %v4253_v35, %v4603_v22 }
 0x219   :  { %v4651_v43 = vpop.f32.mrb[41].mxu1  ;;  %v1628_v34 = vsel %vm1379_vm3, %v1531_v53, 0.0  ;;  %v4667_v16 = vmin.f32 %v1264_v49, -0.7  ;;  %v1200_v47 = vmax.f32 %v4593_v17, -2.0  ;;  %1686 = vadd.xlane.f32.xlu1 %v1685_v5  ;;  %v1578_v49 = vmul.f32 %v4577_v20, %v4577_v20 }
 0x21a   :  { %5727 = vst [vmem:[#allocation75_spill] sm:$0xff] %v4663_v2  ;;  %v1629_v3 = vadd.f32 %v1628_v34, %v1627_v61  ;;  %v4670_v19 = vpop.f32.mrb[42].mxu0  ;;  %v4676_v23 = vmin.f32 %v1248_v40, -0.7  ;;  %v1689_v17 = vadd.f32 %v4500_v52, %v4504_v27  ;;  %v1480_v4 = vadd.f32 %v4647_v11, %v4631_v48 }
 0x21b   :  { %v4678_v12 = vpop.f32.mrb[43].mxu0  ;;  %v1267_v53 = vmax.f32 %v4446_v56, -2.0  ;;  %v4691_v40 = vmin.f32 %v1247_v9, -0.7  ;;  %v1388_v5 = vsel %vm1379_vm3, %v4620_v37, 0.0  ;;  %v1205_v34 = vmax.f32 %v4605_v7, -2.0 }
 0x21c   :  { %v4672_v13 = vpop.f32.mrb[42].mxu1  ;;  %1630 = vadd.xlane.f32.xlu0 %v1629_v3  ;;  %v4695_v61 = vmin.f32 %v1199_v63, -0.7  ;;  %v1690_v52 = vadd.f32 %v1689_v17, %v4513_v36  ;;  %v1389_v27 = vadd.f32 %v1388_v5, %v1387_v31  ;;  %v4699_v25 = vmin.f32 %v1200_v47, -0.7 }
 0x21d   :  { %v4680_v45 = vpop.f32.mrb[43].mxu1  ;;  %v1206_v35 = vmax.f32 %v4622_v18, -2.0  ;;  %v1692_v48 = vsel %vm1379_vm3, %v1579_v39, 0.0  ;;  %v1458_v3 = vadd.f32 %v4532_v1, %v4475_v14  ;;  %v1599_v63 = vmul.f32 %v4647_v11, %v4647_v11 }
 0x21e   :  { %5728 = vst [vmem:[#allocation76_spill] sm:$0xff] %v4695_v61  ;;  %v4703_v56 = vpop.f32.mrb[44].mxu0  ;;  %v1268_v7 = vmax.f32 %v4460_v30, -2.0  ;;  %v1691_v36 = vadd.f32 %v1690_v52, %v1578_v49  ;;  %1390 = vadd.xlane.f32.xlu1 %v1389_v27  ;;  %v1460_v18 = vsel %vm1379_vm3, %v4676_v23, 0.0  ;;  %v4720_v39 = vmul.f32 %v4663_v2, %v4663_v2 }
 0x21f   :  { %v4712_v47 = vpop.f32.mrb[45].mxu0  ;;  %v1269_v1 = vmax.f32 %v4448_v41, -2.0  ;;  %v1270_v31 = vmax.f32 %v4462_v60, -2.0  ;;  %v1459_v5 = vadd.f32 %v1458_v3, %v4691_v40  ;;  %v4725_v30 = vmin.f32 %v1267_v53, -0.7 }
 0x220   :  { %v4705_v9 = vpop.f32.mrb[44].mxu1  ;;  %v4727_v49 = vmin.f32 %v1205_v34, -0.7  ;;  %v1693_v52 = vadd.f32 %v1692_v48, %v1691_v36  ;;  %v1395_v27 = vadd.f32 %v4256_v59, %v4695_v61  ;;  %v4731_v11 = vmin.f32 %v1206_v35, -0.7 }
 0x221   :  { %v4714_v17 = vpop.f32.mrb[45].mxu1  ;;  %5729 = vst [vmem:[#allocation77_spill] sm:$0xff] %v4725_v30  ;;  %v1461_v14 = vadd.f32 %v1460_v18, %v1459_v5  ;;  %v1396_v20 = vsel %vm1379_vm3, %v4699_v25, 0.0  ;;  %v1536_v60 = vmul.f32 %v4695_v61, %v4695_v61  ;;  %v4743_v53 = vmul.f32 %v4667_v16, %v4667_v16 }
 0x222   :  { %v4735_v37 = vpop.f32.mrb[46].mxu0  ;;  %v4745_v48 = vmin.f32 %v1268_v7, -0.7  ;;  %v1273_v59 = vmax.f32 %v4478_v21, -2.0  ;;  %v1254_v34 = vmax.f32 %v4626_v8, -2.0  ;;  %1694 = vadd.xlane.f32.xlu0 %v1693_v52  ;;  %v4753_v36 = vadd.f32 %v1599_v63, %v1598_v6 }
 0x223   :  { %v4749_v35 = vpop.f32.mrb[47].mxu0  ;;  %v4756_v18 = vadd.f32 %v1480_v4, %v4663_v2  ;;  %v1274_v5 = vmax.f32 %v4486_v24, -2.0  ;;  %v1253_v61 = vmax.f32 %v4607_v62, -2.0  ;;  %1462 = vadd.xlane.f32.xlu1 %v1461_v14  ;;  %v4760_v7 = vmin.f32 %v1269_v1, -0.7 }
 0x224   :  { %v4737_v41 = vpop.f32.mrb[46].mxu1  ;;  %5730 = vst [vmem:[#allocation78_spill] sm:$0xff] %v4745_v48  ;;  %v4762_v21 = vmin.f32 %v1270_v31, -0.7  ;;  %v1397_v8 = vadd.f32 %v1396_v20, %v1395_v27  ;;  %v1537_v52 = vmul.f32 %v4699_v25, %v4699_v25  ;;  %v1604_v6 = vmul.f32 %v4725_v30, %v4725_v30 }
 0x225   :  { %v4751_v3 = vpop.f32.mrb[47].mxu1  ;;  %v1635_v63 = vadd.f32 %v4329_v57, %v1536_v60  ;;  %v1403_v4 = vadd.f32 %v4295_v26, %v4727_v49  ;;  %v1404_v24 = vsel %vm1379_vm3, %v4731_v11, 0.0  ;;  %v1488_v14 = vadd.f32 %v4745_v48, %v4725_v30 }
 0x226   :  { %v1605_v20 = vmul.f32 %v4745_v48, %v4745_v48  ;;  %v4777_v62 = vmin.f32 %v1273_v59, -0.7  ;;  %v4779_v1 = vmin.f32 %v1254_v34, -0.7  ;;  %1398 = vadd.xlane.f32.xlu0 %v1397_v8  ;;  %v4781_v31 = vmin.f32 %v1274_v5, -0.7 }
 0x227   :  { %v1275_v57 = vmax.f32 %v4488_v28, -2.0  ;;  %v4784_v27 = vmin.f32 %v1253_v61, -0.7  ;;  %v1211_v26 = vmax.f32 %v4638_v51, -2.0  ;;  %v1212_v60 = vmax.f32 %v4649_v42, -2.0 }
 0x228   :  { %v1636_v30 = vsel %vm1379_vm3, %v1537_v52, 0.0  ;;  %v1405_v2 = vadd.f32 %v1404_v24, %v1403_v4  ;;  %v1585_v59 = vmul.f32 %v4676_v23, %v4676_v23  ;;  %v1584_v34 = vmul.f32 %v4691_v40, %v4691_v40 }
 0x229   :  { %v1637_v48 = vadd.f32 %v1636_v30, %v1635_v63  ;;  %v1697_v5 = vadd.f32 %v4521_v38, %v4517_v58  ;;  %v1466_v28 = vadd.f32 %v4571_v46, %v4529_v32  ;;  %v1259_v51 = vmax.f32 %v4640_v44, -2.0 }
 0x22a   :  { %1406 = vadd.xlane.f32.xlu0 %v1405_v2  ;;  %v1468_v42 = vsel %vm1379_vm3, %v4779_v1, 0.0  ;;  %v1542_v61 = vmul.f32 %v4727_v49, %v4727_v49  ;;  %v1543_v30 = vmul.f32 %v4731_v11, %v4731_v11  ;;  %v4804_v8 = vmin.f32 %v1211_v26, -0.7 }
 0x22b   :  { %v1260_v52 = vmax.f32 %v4651_v43, -2.0  ;;  %1638 = vadd.xlane.f32.xlu1 %v1637_v48  ;;  %v1698_v58 = vadd.f32 %v1697_v5, %v4525_v33  ;;  %v1467_v46 = vadd.f32 %v1466_v28, %v4784_v27  ;;  %v4809_v38 = vmin.f32 %v1212_v60, -0.7 }
 0x22c   :  { %v1217_v44 = vmax.f32 %v4670_v19, -2.0  ;;  %v1700_v2 = vsel %vm1379_vm3, %v1585_v59, 0.0  ;;  %v1590_v63 = vmul.f32 %v4784_v27, %v4784_v27  ;;  %v1643_v26 = vadd.f32 %v4331_v29, %v1542_v61  ;;  %v5731_v29 = vld [vmem:[#allocation63_spill] sm:$0xff] }
 0x22d   :  { %v1699_v4 = vadd.f32 %v1698_v58, %v1584_v34  ;;  %v1469_v24 = vadd.f32 %v1468_v42, %v1467_v46  ;;  %v1705_v43 = vadd.f32 %v4568_v55, %v4549_v10  ;;  %v4818_v48 = vadd.f32 %v1605_v20, %v1604_v6 }
 0x22e   :  { %v1218_v33 = vmax.f32 %v4678_v12, -2.0  ;;  %v1644_v60 = vsel %vm1379_vm3, %v1543_v30, 0.0  ;;  %v1591_v19 = vmul.f32 %v4779_v1, %v4779_v1  ;;  %v4824_v59 = vmin.f32 %v1259_v51, -0.7 }
 0x22f   :  { %v1701_v5 = vadd.f32 %v1700_v2, %v1699_v4  ;;  %1470 = vadd.xlane.f32.xlu0 %v1469_v24  ;;  %v1411_v34 = vadd.f32 %v4338_v54, %v4804_v8  ;;  %v1706_v28 = vadd.f32 %v1705_v43, %v5731_v29  ;;  %v4830_v10 = vadd.f32 %v1488_v14, %v4760_v7  ;;  %v5733_v2 = vld [vmem:[#allocation38_spill] sm:$0xff]  ;;  %v5734_v4 = vld [vmem:[#allocation57_spill] sm:$0xff]  ;;  %v5735_v43 = vld [vmem:[#allocation24_spill] sm:$0xff] }
 0x230   :  { %v4832_v55 = vmin.f32 %v1260_v52, -0.7  ;;  %v1265_v12 = vmax.f32 %v4672_v13, -2.0  ;;  %v1412_v6 = vsel %vm1379_vm3, %v4809_v38, 0.0  ;;  %v4837_v20 = vmin.f32 %v1217_v44, -0.7 }
 0x231   :  { %1702 = vadd.xlane.f32.xlu1 %v1701_v5  ;;  %v1645_v51 = vadd.f32 %v1644_v60, %v1643_v26  ;;  %v1707_v42 = vadd.f32 %v1706_v28, %v1590_v63  ;;  %v1474_v54 = vadd.f32 %v4645_v15, %v4624_v50  ;;  %v4841_v61 = vmin.f32 %v1275_v57, -0.7  ;;  %v5732_v44 = vld [vmem:[#allocation30_spill] sm:$0xff] }
 0x232   :  { %v4843_v30 = vmin.f32 %v1218_v33, -0.7  ;;  %v1266_v14 = vmax.f32 %v4680_v45, -2.0  ;;  %v1708_v52 = vsel %vm1379_vm3, %v1591_v19, 0.0  ;;  %v1413_v13 = vadd.f32 %v1412_v6, %v1411_v34  ;;  %v5736_v33 = vld [vmem:[#allocation32_spill] sm:$0xff]  ;;  %v5737_v5 = vld [vmem:[#allocation70_spill] sm:$0xff] }
 0x233   :  { %1646 = vadd.xlane.f32.xlu0 %v1645_v51  ;;  %v1475_v58 = vadd.f32 %v1474_v54, %v4824_v59  ;;  %v1548_v46 = vmul.f32 %v4804_v8, %v4804_v8  ;;  %v1418_v63 = vadd.f32 %v5733_v2, %v5732_v44  ;;  %v1276_v15 = vmax.f32 %v5734_v4, -2.0 }
 0x234   :  { %v4853_v57 = vmin.f32 %v1265_v12, -0.7  ;;  %v1476_v24 = vsel %vm1379_vm3, %v4832_v55, 0.0  ;;  %v1549_v45 = vmul.f32 %v4809_v38, %v4809_v38  ;;  %v1709_v26 = vadd.f32 %v1708_v52, %v1707_v42  ;;  %v5738_v52 = vld [vmem:[#allocation33_spill] sm:$0xff] }
 0x235   :  { %1414 = vadd.xlane.f32.xlu1 %v1413_v13  ;;  %v1650_v60 = vadd.f32 %v5736_v33, %v5735_v43  ;;  %v1419_v19 = vadd.f32 %v1418_v63, %v4837_v20  ;;  %v1713_v34 = vadd.f32 %v4635_v0, %v5737_v5  ;;  %v4864_v29 = vmin.f32 %v1266_v14, -0.7  ;;  %v5739_v13 = vld [vmem:[#allocation36_spill] sm:$0xff]  ;;  %v5741_v5 = vld [vmem:[#allocation35_spill] sm:$0xff] }
 0x236   :  { %v1223_v28 = vmax.f32 %v4703_v56, -2.0  ;;  %v1420_v12 = vsel %vm1379_vm3, %v4843_v30, 0.0  ;;  %v1596_v6 = vmul.f32 %v4824_v59, %v4824_v59  ;;  %v1477_v51 = vadd.f32 %v1476_v24, %v1475_v58 }
 0x237   :  { %1710 = vadd.xlane.f32.xlu0 %v1709_v26  ;;  %v1651_v42 = vadd.f32 %v1650_v60, %v1548_v46  ;;  %v1482_v54 = vadd.f32 %v4756_v18, %v4667_v16  ;;  %v1657_v2 = vadd.f32 %v5739_v13, %v5738_v52  ;;  %v4877_v0 = vmul.f32 %v4777_v62, %v4777_v62  ;;  %v5740_v46 = vld [vmem:[#allocation74_spill] sm:$0xff] }
 0x238   :  { %v1224_v56 = vmax.f32 %v4712_v47, -2.0  ;;  %v1652_v14 = vsel %vm1379_vm3, %v1549_v45, 0.0  ;;  %v1597_v63 = vmul.f32 %v4832_v55, %v4832_v55  ;;  %v1421_v58 = vadd.f32 %v1420_v12, %v1419_v19 }
 0x239   :  { %1478 = vadd.xlane.f32.xlu1 %v1477_v51  ;;  %v1714_v24 = vadd.f32 %v1713_v34, %v5740_v46  ;;  %v1483_v18 = vadd.f32 %v1482_v54, %v4853_v57  ;;  %v1554_v26 = vmul.f32 %v4837_v20, %v4837_v20  ;;  %v4887_v43 = vmin.f32 %v1223_v28, -0.7  ;;  %v5742_v46 = vld [vmem:[#allocation34_spill] sm:$0xff] }
 0x23a   :  { %v1271_v33 = vmax.f32 %v4705_v9, -2.0  ;;  %v1484_v47 = vsel %vm1379_vm3, %v4864_v29, 0.0  ;;  %v1555_v45 = vmul.f32 %v4843_v30, %v4843_v30  ;;  %v1653_v60 = vadd.f32 %v1652_v14, %v1651_v42  ;;  %v5743_v42 = vld [vmem:[#allocation41_spill] sm:$0xff] }
 0x23b   :  { %1422 = vadd.xlane.f32.xlu0 %v1421_v58  ;;  %v1715_v19 = vadd.f32 %v1714_v24, %v1596_v6  ;;  %v1658_v34 = vadd.f32 %v1657_v2, %v5741_v5  ;;  %v1721_v12 = vadd.f32 %v4753_v36, %v4720_v39  ;;  %v4897_v51 = vmin.f32 %v1224_v56, -0.7 }
 0x23c   :  { %v1272_v28 = vmax.f32 %v4714_v17, -2.0  ;;  %v1229_v9 = vmax.f32 %v4735_v37, -2.0  ;;  %v1716_v54 = vsel %vm1379_vm3, %v1597_v63, 0.0  ;;  %v1485_v52 = vadd.f32 %v1484_v47, %v1483_v18 }
 0x23d   :  { %1654 = vadd.xlane.f32.xlu1 %v1653_v60  ;;  %v1659_v13 = vadd.f32 %v1658_v34, %v1554_v26  ;;  %v1426_v14 = vadd.f32 %v5743_v42, %v5742_v46  ;;  %v1602_v6 = vmul.f32 %v4853_v57, %v4853_v57  ;;  %v1496_v39 = vadd.f32 %v4781_v31, %v4777_v62  ;;  %v5744_v42 = vld [vmem:[#allocation48_spill] sm:$0xff] }
 0x23e   :  { %v1230_v36 = vmax.f32 %v4749_v35, -2.0  ;;  %v1660_v17 = vsel %vm1379_vm3, %v1555_v45, 0.0  ;;  %v1603_v37 = vmul.f32 %v4864_v29, %v4864_v29  ;;  %v4912_v2 = vmin.f32 %v1271_v33, -0.7 }
 0x23f   :  { %v1717_v56 = vadd.f32 %v1716_v54, %v1715_v19  ;;  %1486 = vadd.xlane.f32.xlu0 %v1485_v52  ;;  %v1427_v63 = vadd.f32 %v1426_v14, %v4887_v43  ;;  %v1722_v58 = vadd.f32 %v1721_v12, %v4743_v53  ;;  %v1611_v24 = vmul.f32 %v4781_v31, %v4781_v31 }
 0x240   :  { %v4918_v18 = vmin.f32 %v1272_v28, -0.7  ;;  %v1277_v35 = vmax.f32 %v4737_v41, -2.0  ;;  %v1428_v26 = vsel %vm1379_vm3, %v4897_v51, 0.0  ;;  %v4923_v47 = vmin.f32 %v1229_v9, -0.7 }
 0x241   :  { %1718 = vadd.xlane.f32.xlu1 %v1717_v56  ;;  %v1661_v33 = vadd.f32 %v1660_v17, %v1659_v13  ;;  %v1723_v45 = vadd.f32 %v1722_v58, %v1602_v6  ;;  %v1490_v60 = vadd.f32 %v4830_v10, %v4762_v21  ;;  %v1497_v53 = vadd.f32 %v1496_v39, %v4841_v61  ;;  %v5747_v56 = vld [vmem:[#allocation45_spill] sm:$0xff]  ;;  %v5748_v58 = vld [vmem:[#allocation39_spill] sm:$0xff] }
 0x242   :  { %v4928_v19 = vmin.f32 %v1230_v36, -0.7  ;;  %v1278_v5 = vmax.f32 %v4751_v3, -2.0  ;;  %v1724_v34 = vsel %vm1379_vm3, %v1603_v37, 0.0  ;;  %v1606_v41 = vmul.f32 %v4760_v7, %v4760_v7 }
 0x243   :  { %v1560_v12 = vmul.f32 %v4887_v43, %v4887_v43  ;;  %1662 = vadd.xlane.f32.xlu0 %v1661_v33  ;;  %v1429_v28 = vadd.f32 %v1428_v26, %v1427_v63  ;;  %v1491_v9 = vadd.f32 %v1490_v60, %v4912_v2  ;;  %v1607_v10 = vmul.f32 %v4762_v21, %v4762_v21 }
 0x244   :  { %v4941_v54 = vmin.f32 %v1276_v15, -0.7  ;;  %v1561_v3 = vmul.f32 %v4897_v51, %v4897_v51  ;;  %v1492_v52 = vsel %vm1379_vm3, %v4918_v18, 0.0  ;;  %v1729_v13 = vadd.f32 %v4818_v48, %v1606_v41 }
 0x245   :  { %v1435_v14 = vadd.f32 %v5744_v42, %v4923_v47  ;;  %v4950_v6 = vmin.f32 %v1277_v35, -0.7  ;;  %1430 = vadd.xlane.f32.xlu1 %v1429_v28  ;;  %v1725_v39 = vadd.f32 %v1724_v34, %v1723_v45  ;;  %v1736_v36 = vadd.f32 %v1611_v24, %v4877_v0 }
 0x246   :  { %v1498_v4 = vadd.f32 %v1497_v53, %v4941_v54  ;;  %v1436_v15 = vsel %vm1379_vm3, %v4928_v19, 0.0  ;;  %v4956_v17 = vmin.f32 %v1278_v5, -0.7  ;;  %v1608_v37 = vmul.f32 %v4912_v2, %v4912_v2 }
 0x247   :  { %5745 = vst [vmem:[#allocation63_spill] sm:$0xff] %v4950_v6  ;;  %1726 = vadd.xlane.f32.xlu0 %v1725_v39  ;;  %v1493_v48 = vadd.f32 %v1492_v52, %v1491_v9  ;;  %v1667_v63 = vadd.f32 %v5747_v56, %v1560_v12  ;;  %v1565_v35 = vmul.f32 %v5748_v58, %v5748_v58  ;;  %v1668_v26 = vsel %vm1379_vm3, %v1561_v3, 0.0  ;;  %v5749_v12 = vld [vmem:[#allocation47_spill] sm:$0xff] }
 0x248   :  { %5746 = vst [vmem:[#allocation30_spill] sm:$0xff] %v4956_v17  ;;  %v1612_v0 = vmul.f32 %v4841_v61, %v4841_v61  ;;  %v1609_v24 = vmul.f32 %v4918_v18, %v4918_v18  ;;  %v3054_v33 = vmov 0   ;;  %v1730_v45 = vadd.f32 %v1729_v13, %v1607_v10 }
 0x249   :  { %3008 = vset.pattern.permute.xlu1 %v3054_v33  ;;  %3009 = vset.pattern.permute.xlu0 %v3054_v33  ;;  %v1566_v60 = vmul.f32 %v4923_v47, %v4923_v47  ;;  %v1499_v53 = vadd.f32 %v1498_v4, %v4950_v6  ;;  %v1437_v5 = vadd.f32 %v1436_v15, %v1435_v14  ;;  %v1500_v41 = vsel %vm1379_vm3, %v4956_v17, 0.0 }
 0x24a   :  { %1494 = vadd.xlane.f32.xlu1 %v1493_v48  ;;  %v1567_v34 = vmul.f32 %v4928_v19, %v4928_v19  ;;  %v1674_v28 = vadd.f32 %v5749_v12, %v1565_v35  ;;  %v1737_v9 = vadd.f32 %v1736_v36, %v1612_v0  ;;  %v1669_v3 = vadd.f32 %v1668_v26, %v1667_v63 }
 0x24b   :  { %1438 = vadd.xlane.f32.xlu0 %v1437_v5  ;;  %v1731_v52 = vadd.f32 %v1730_v45, %v1608_v37  ;;  %v1732_v10 = vsel %vm1379_vm3, %v1609_v24, 0.0  ;;  %v1613_v13 = vmul.f32 %v4941_v54, %v4941_v54  ;;  %v1614_v42 = vmul.f32 %v4950_v6, %v4950_v6 }
 0x24c   :  { %v1501_v14 = vadd.f32 %v1500_v41, %v1499_v53  ;;  %v1675_v39 = vadd.f32 %v1674_v28, %v1566_v60  ;;  %v1615_v4 = vmul.f32 %v4956_v17, %v4956_v17  ;;  %v1676_v15 = vsel %vm1379_vm3, %v1567_v34, 0.0 }
 0x24d   :  { %v1738_v36 = vadd.f32 %v1737_v9, %v1613_v13  ;;  %v1733_v48 = vadd.f32 %v1732_v10, %v1731_v52 }
 0x24e   :  { %1670 = vadd.xlane.f32.xlu1 %v1669_v3  ;;  %v1677_v37 = vadd.f32 %v1676_v15, %v1675_v39  ;;  %v1740_v63 = vsel %vm1379_vm3, %v1615_v4, 0.0 }
 0x24f   :  { %1502 = vadd.xlane.f32.xlu0 %v1501_v14  ;;  %v1739_v56 = vadd.f32 %v1738_v36, %v1614_v42 }
 0x251   :  { %v1741_v35 = vadd.f32 %v1740_v63, %v1739_v56 }
 0x252   :  { %1734 = vadd.xlane.f32.xlu1 %v1733_v48 }
 0x253   :  { %1678 = vadd.xlane.f32.xlu0 %v1677_v37 }
 0x257   :  { %1742 = vadd.xlane.f32.xlu0 %v1741_v35 }
 0x29c   :  { %v1383_v0 = vpop.xlane.xlu0 %1382 }
 0x29d   :  { %v2388_v24 = vadd.f32 49.0, %v1383_v0 }
 0x29e   :  { %v1447_v26 = vpop.xlane.xlu1 %1446 }
 0x29f   :  { %v4985_v33 = vmul.f32 0.0017301039, %v2388_v24  ;;  %v2396_v45 = vadd.f32 49.0, %v1447_v26 }
 0x2a1   :  { %v1792_v34 = vmul.f32 %v4985_v33, %v4985_v33  ;;  %v4989_v41 = vmul.f32 0.0017301039, %v2396_v45 }
 0x2a2   :  { %v1623_v60 = vpop.xlane.xlu1 %1622 }
 0x2a3   :  { %v2404_v53 = vadd.f32 -34.3, %v1623_v60  ;;  %v1455_v5 = vpop.xlane.xlu0 %1454  ;;  %v1800_v52 = vmul.f32 %v4989_v41, %v4989_v41 }
 0x2a4   :  { %v2397_v14 = vadd.f32 49.0, %v1455_v5 }
 0x2a5   :  { %v1776_v12 = vmul.f32 0.0017301039, %v2404_v53 }
 0x2a6   :  { %v1687_v28 = vpop.xlane.xlu1 %1686  ;;  %v4993_v37 = vmul.f32 0.0017301039, %v2397_v14  ;;  %v1864_v14 = vld [vmem:[%s5558_s2 + $0x40] sm:$0xff] }
 0x2a7   :  { %v1808_v9 = vsub.f32 %v1776_v12, %v1792_v34  ;;  %v2412_v3 = vadd.f32 -34.3, %v1687_v28  ;;  %v1856_v34 = vld [vmem:[%s5558_s2] sm:$0xff] }
 0x2a8   :  { %v1801_v26 = vmul.f32 %v4993_v37, %v4993_v37 }
 0x2a9   :  { %v1824_v10 = vadd.f32 0.1, %v1808_v9  ;;  %v1784_v13 = vmul.f32 0.0017301039, %v2412_v3  ;;  %v1631_v42 = vpop.xlane.xlu0 %1630 }
 0x2aa   :  { %v2405_v15 = vadd.f32 -34.3, %v1631_v42 }
 0x2ab   :  { %3010 = vrsqrt.f32 %v1824_v10  ;;  %v1816_v39 = vsub.f32 %v1784_v13, %v1800_v52  ;;  %v1391_v4 = vpop.xlane.xlu1 %1390 }
 0x2ac   :  { %v2389_v36 = vadd.f32 49.0, %v1391_v4  ;;  %v1777_v35 = vmul.f32 0.0017301039, %v2405_v15 }
 0x2ad   :  { %v1832_v48 = vadd.f32 0.1, %v1816_v39 }
 0x2ae   :  { %v4995_v56 = vmul.f32 0.0017301039, %v2389_v36 }
 0x2af   :  { %3012 = vrsqrt.f32 %v1832_v48  ;;  %v1695_v63 = vpop.xlane.xlu0 %1694 }
 0x2b0   :  { %v2413_v0 = vadd.f32 -34.3, %v1695_v63  ;;  %v1793_v24 = vmul.f32 %v4995_v56, %v4995_v56  ;;  %v1463_v53 = vpop.xlane.xlu1 %1462 }
 0x2b1   :  { %v2398_v15 = vadd.f32 49.0, %v1463_v53 }
 0x2b2   :  { %v1785_v45 = vmul.f32 0.0017301039, %v2413_v0  ;;  %v1809_v60 = vsub.f32 %v1777_v35, %v1793_v24 }
 0x2b3   :  { %v1399_v5 = vpop.xlane.xlu0 %1398 }
 0x2b4   :  { %v1817_v12 = vsub.f32 %v1785_v45, %v1801_v26  ;;  %v1825_v28 = vadd.f32 0.1, %v1809_v60  ;;  %v2390_v9 = vadd.f32 49.0, %v1399_v5  ;;  %v5011_v26 = vmul.f32 0.0017301039, %v2398_v15  ;;  %v1857_v60 = vld [vmem:[%s5558_s2 + $0x8] sm:$0xff] }
 0x2b5   :  { %v3011_v3 = vpop.eup %3010  ;;  %v1888_v15 = vld [vmem:[%s5559_s3] sm:$0xff] }
 0x2b6   :  { %v1833_v52 = vadd.f32 0.1, %v1817_v12  ;;  %3014 = vrsqrt.f32 %v1825_v28  ;;  %v1872_v10 = vmul.f32 %v3011_v3, %v1856_v34  ;;  %v5004_v13 = vmul.f32 0.0017301039, %v2390_v9 }
 0x2b7   :  { %v1407_v42 = vpop.xlane.xlu0 %1406 }
 0x2b8   :  { %3016 = vrsqrt.f32 %v1833_v52  ;;  %v1639_v39 = vpop.xlane.xlu1 %1638  ;;  %1938 = vperm.xlu1 %3008, %v1872_v10   ;;  %v1794_v63 = vmul.f32 %v5004_v13, %v5004_v13  ;;  %v2391_v0 = vadd.f32 49.0, %v1407_v42  ;;  %v1865_v52 = vld [vmem:[%s5558_s2 + $0x48] sm:$0xff]  ;;  %v1904_v42 = vmul.f32 %v1872_v10, %v4985_v33 }
 0x2b9   :  { %v3013_v4 = vpop.eup %3012  ;;  %v2406_v36 = vadd.f32 -34.3, %v1639_v39  ;;  %v1802_v39 = vmul.f32 %v5011_v26, %v5011_v26 }
 0x2ba   :  { %v1880_v48 = vmul.f32 %v3013_v4, %v1864_v14  ;;  %v5016_v9 = vmul.f32 0.0017301039, %v2391_v0 }
 0x2bb   :  { %v1778_v35 = vmul.f32 0.0017301039, %v2406_v36 }
 0x2bc   :  { %v1471_v24 = vpop.xlane.xlu0 %1470  ;;  %1978 = vperm.xlu1 %3008, %v1880_v48   ;;  %v1795_v33 = vmul.f32 %v5016_v9, %v5016_v9  ;;  %v1912_v17 = vmul.f32 %v1880_v48, %v4989_v41  ;;  %v1858_v41 = vld [vmem:[%s5558_s2 + $0x10] sm:$0xff] }
 0x2bd   :  { %v1810_v45 = vsub.f32 %v1778_v35, %v1794_v63  ;;  %v2399_v53 = vadd.f32 49.0, %v1471_v24 }
 0x2be   :  { %v1703_v5 = vpop.xlane.xlu1 %1702 }
 0x2bf   :  { %v1826_v34 = vadd.f32 0.1, %v1810_v45  ;;  %v2414_v12 = vadd.f32 -34.3, %v1703_v5  ;;  %v5027_v24 = vmul.f32 0.0017301039, %v2399_v53  ;;  %v1920_v5 = vsub.f32 %v1888_v15, %v1904_v42 }
 0x2c0   :  { %v3015_v28 = vpop.eup %3014  ;;  %v1647_v3 = vpop.xlane.xlu0 %1646  ;;  %v1896_v53 = vld [vmem:[%s5559_s3 + $0x40] sm:$0xff] }
 0x2c1   :  { %v1873_v14 = vmul.f32 %v3015_v28, %v1857_v60  ;;  %3018 = vrsqrt.f32 %v1826_v34  ;;  %v1786_v4 = vmul.f32 0.0017301039, %v2414_v12  ;;  %v2407_v63 = vadd.f32 -34.3, %v1647_v3 }
 0x2c2   :  { %v3017_v36 = vpop.eup %3016  ;;  %v1415_v35 = vpop.xlane.xlu1 %1414  ;;  %v1928_v48 = vsub.f32 %v1896_v53, %v1912_v17 }
 0x2c3   :  { %v1818_v0 = vsub.f32 %v1786_v4, %v1802_v39  ;;  %v1881_v45 = vmul.f32 %v3017_v36, %v1865_v52  ;;  %1943 = vperm.xlu0 %3009, %v1873_v14   ;;  %v1779_v10 = vmul.f32 0.0017301039, %v2407_v63  ;;  %v2392_v12 = vadd.f32 49.0, %v1415_v35 }
 0x2c4   :  { %v1711_v60 = vpop.xlane.xlu0 %1710  ;;  %v1803_v52 = vmul.f32 %v5027_v24, %v5027_v24 }
 0x2c5   :  { %v1834_v34 = vadd.f32 0.1, %v1818_v0  ;;  %v2415_v28 = vadd.f32 -34.3, %v1711_v60  ;;  %1983 = vperm.xlu1 %3008, %v1881_v45   ;;  %v1811_v6 = vsub.f32 %v1779_v10, %v1795_v33  ;;  %v5037_v15 = vmul.f32 0.0017301039, %v2392_v12 }
 0x2c6   :  { %v1479_v3 = vpop.xlane.xlu1 %1478  ;;  %v1905_v60 = vmul.f32 %v1873_v14, %v4995_v56  ;;  %v1889_v12 = vld [vmem:[%s5559_s3 + $0x8] sm:$0xff]  ;;  %v1866_v56 = vld [vmem:[%s5558_s2 + $0x50] sm:$0xff] }
 0x2c7   :  { %3020 = vrsqrt.f32 %v1834_v34  ;;  %v1787_v39 = vmul.f32 0.0017301039, %v2415_v28  ;;  %2114 = vperm.xlu0 %3009, %v1920_v5   ;;  %v1827_v4 = vadd.f32 0.1, %v1811_v6  ;;  %v2400_v63 = vadd.f32 49.0, %v1479_v3 }
 0x2c8   :  { %v1423_v42 = vpop.xlane.xlu0 %1422  ;;  %v1796_v28 = vmul.f32 %v5037_v15, %v5037_v15  ;;  %v1921_v14 = vsub.f32 %v1889_v12, %v1905_v60 }
 0x2c9   :  { %v1819_v36 = vsub.f32 %v1787_v39, %v1803_v52  ;;  %3022 = vrsqrt.f32 %v1827_v4  ;;  %v2393_v5 = vadd.f32 49.0, %v1423_v42  ;;  %v5048_v3 = vmul.f32 0.0017301039, %v2400_v63  ;;  %v1897_v63 = vld [vmem:[%s5559_s3 + $0x48] sm:$0xff] }
 0x2ca   :  { %v1655_v35 = vpop.xlane.xlu1 %1654 }
 0x2cb   :  { %v3019_v0 = vpop.eup %3018  ;;  %v1835_v33 = vadd.f32 0.1, %v1819_v36  ;;  %v2408_v10 = vadd.f32 -34.3, %v1655_v35  ;;  %2154 = vperm.xlu0 %3009, %v1928_v48   ;;  %v5053_v4 = vmul.f32 0.0017301039, %v2393_v5  ;;  %v1804_v35 = vmul.f32 %v5048_v3, %v5048_v3 }
 0x2cc   :  { %v1487_v6 = vpop.xlane.xlu0 %1486  ;;  %v1874_v34 = vmul.f32 %v3019_v0, %v1858_v41  ;;  %v1913_v41 = vmul.f32 %v1881_v45, %v4993_v37 }
 0x2cd   :  { %v1780_v17 = vmul.f32 0.0017301039, %v2408_v10  ;;  %3024 = vrsqrt.f32 %v1835_v33  ;;  %v2401_v42 = vadd.f32 49.0, %v1487_v6 }
 0x2ce   :  { %v1719_v53 = vpop.xlane.xlu1 %1718  ;;  %1948 = vperm.xlu1 %3008, %v1874_v34   ;;  %v1906_v5 = vmul.f32 %v1874_v34, %v5004_v13  ;;  %v1859_v13 = vld [vmem:[%s5558_s2 + $0x18] sm:$0xff] }
 0x2cf   :  { %v1812_v52 = vsub.f32 %v1780_v17, %v1796_v28  ;;  %v2416_v39 = vadd.f32 -34.3, %v1719_v53  ;;  %v1890_v17 = vld [vmem:[%s5559_s3 + $0x10] sm:$0xff]  ;;  %v5065_v37 = vmul.f32 0.0017301039, %v2401_v42  ;;  %v1929_v53 = vsub.f32 %v1897_v63, %v1913_v41 }
 0x2d0   :  { %v1663_v36 = vpop.xlane.xlu0 %1662  ;;  %v1898_v63 = vld [vmem:[%s5559_s3 + $0x50] sm:$0xff] }
 0x2d1   :  { %v3021_v48 = vpop.eup %3020  ;;  %v1828_v0 = vadd.f32 0.1, %v1812_v52  ;;  %v1788_v33 = vmul.f32 0.0017301039, %v2416_v39  ;;  %v2409_v10 = vadd.f32 -34.3, %v1663_v36  ;;  %v1797_v39 = vmul.f32 %v5053_v4, %v5053_v4 }
 0x2d2   :  { %v1431_v28 = vpop.xlane.xlu1 %1430  ;;  %2119 = vperm.xlu1 %3008, %v1921_v14   ;;  %v1882_v60 = vmul.f32 %v3021_v48, %v1866_v56  ;;  %v1922_v48 = vsub.f32 %v1890_v17, %v1906_v5  ;;  %v1805_v41 = vmul.f32 %v5065_v37, %v5065_v37 }
 0x2d3   :  { %3026 = vrsqrt.f32 %v1828_v0  ;;  %v1820_v6 = vsub.f32 %v1788_v33, %v1804_v35  ;;  %v1781_v12 = vmul.f32 0.0017301039, %v2409_v10  ;;  %v3023_v52 = vpop.eup %3022  ;;  %v2394_v56 = vadd.f32 49.0, %v1431_v28 }
 0x2d4   :  { %v1727_v45 = vpop.xlane.xlu0 %1726  ;;  %1988 = vperm.xlu0 %3009, %v1882_v60   ;;  %v1914_v42 = vmul.f32 %v1882_v60, %v5011_v26  ;;  %v1875_v10 = vmul.f32 %v3023_v52, %v1859_v13  ;;  %v1867_v26 = vld [vmem:[%s5558_s2 + $0x58] sm:$0xff] }
 0x2d5   :  { %v1836_v14 = vadd.f32 0.1, %v1820_v6  ;;  %v2417_v36 = vadd.f32 -34.3, %v1727_v45  ;;  %v1813_v35 = vsub.f32 %v1781_v12, %v1797_v39  ;;  %v5078_v6 = vmul.f32 0.0017301039, %v2394_v56 }
 0x2d6   :  { %2159 = vperm.xlu1 %3008, %v1929_v53   ;;  %v1930_v12 = vsub.f32 %v1898_v63, %v1914_v42  ;;  %v1860_v39 = vld [vmem:[%s5558_s2 + $0x20] sm:$0xff] }
 0x2d7   :  { %v1495_v34 = vpop.xlane.xlu1 %1494  ;;  %3028 = vrsqrt.f32 %v1836_v14  ;;  %v1789_v0 = vmul.f32 0.0017301039, %v2417_v36  ;;  %v3025_v28 = vpop.eup %3024  ;;  %v1829_v17 = vadd.f32 0.1, %v1813_v35  ;;  %v1798_v36 = vmul.f32 %v5078_v6, %v5078_v6 }
 0x2d8   :  { %2124 = vperm.xlu0 %3009, %v1922_v48   ;;  %v1439_v33 = vpop.xlane.xlu0 %1438  ;;  %v2402_v45 = vadd.f32 49.0, %v1495_v34  ;;  %v1883_v14 = vmul.f32 %v3025_v28, %v1867_v26  ;;  %v1907_v28 = vmul.f32 %v1875_v10, %v5016_v9  ;;  %v1892_v9 = vld [vmem:[%s5559_s3 + $0x20] sm:$0xff] }
 0x2d9   :  { %v1821_v60 = vsub.f32 %v1789_v0, %v1805_v41  ;;  %3030 = vrsqrt.f32 %v1829_v17  ;;  %v1868_v41 = vld [vmem:[%s5558_s2 + $0x60] sm:$0xff]  ;;  %v1891_v17 = vld [vmem:[%s5559_s3 + $0x18] sm:$0xff] }
 0x2da   :  { %1953 = vperm.xlu1 %3008, %v1875_v10   ;;  %v5088_v13 = vmul.f32 0.0017301039, %v2402_v45 }
 0x2db   :  { %v1671_v5 = vpop.xlane.xlu1 %1670  ;;  %v1837_v48 = vadd.f32 0.1, %v1821_v60 }
 0x2dc   :  { %v2410_v53 = vadd.f32 -34.3, %v1671_v5  ;;  %2164 = vperm.xlu0 %3009, %v1930_v12   ;;  %v1503_v52 = vpop.xlane.xlu0 %1502  ;;  %v1806_v45 = vmul.f32 %v5088_v13, %v5088_v13 }
 0x2dd   :  { %v3027_v56 = vpop.eup %3026  ;;  %3032 = vrsqrt.f32 %v1837_v48  ;;  %v2403_v48 = vadd.f32 49.0, %v1503_v52 }
 0x2de   :  { %v1782_v34 = vmul.f32 0.0017301039, %v2410_v53  ;;  %1993 = vperm.xlu1 %3008, %v1883_v14   ;;  %v1876_v42 = vmul.f32 %v3027_v56, %v1860_v39  ;;  %v2395_v53 = vadd.f32 49.0, %v1439_v33  ;;  %v1923_v33 = vsub.f32 %v1891_v17, %v1907_v28  ;;  %v1900_v28 = vld [vmem:[%s5559_s3 + $0x60] sm:$0xff]  ;;  %v1862_v17 = vld [vmem:[%s5558_s2 + $0x30] sm:$0xff] }
 0x2df   :  { %v1735_v0 = vpop.xlane.xlu1 %1734 }
 0x2e0   :  { %v1814_v35 = vsub.f32 %v1782_v34, %v1798_v36  ;;  %v2418_v63 = vadd.f32 -34.3, %v1735_v0  ;;  %v1679_v5 = vpop.xlane.xlu0 %1678  ;;  %v1908_v56 = vmul.f32 %v1876_v42, %v5037_v15  ;;  %v1915_v0 = vmul.f32 %v1883_v14, %v5027_v24  ;;  %v1899_v15 = vld [vmem:[%s5559_s3 + $0x58] sm:$0xff] }
 0x2e1   :  { %v3029_v26 = vpop.eup %3028  ;;  %v2411_v34 = vadd.f32 -34.3, %v1679_v5 }
 0x2e2   :  { %v1830_v12 = vadd.f32 0.1, %v1814_v35  ;;  %v1790_v60 = vmul.f32 0.0017301039, %v2418_v63  ;;  %1958 = vperm.xlu1 %3008, %v1876_v42   ;;  %v1884_v39 = vmul.f32 %v3029_v26, %v1868_v41  ;;  %v5104_v35 = vmul.f32 0.0017301039, %v2395_v53 }
 0x2e3   :  { %v1924_v42 = vsub.f32 %v1892_v9, %v1908_v56  ;;  %v1783_v5 = vmul.f32 0.0017301039, %v2411_v34  ;;  %v1931_v24 = vsub.f32 %v1899_v15, %v1915_v0  ;;  %v3031_v14 = vpop.eup %3030  ;;  %v1869_v9 = vld [vmem:[%s5558_s2 + $0x68] sm:$0xff] }
 0x2e4   :  { %3034 = vrsqrt.f32 %v1830_v12  ;;  %v1822_v36 = vsub.f32 %v1790_v60, %v1806_v45  ;;  %1998 = vperm.xlu0 %3009, %v1884_v39   ;;  %v1743_v10 = vpop.xlane.xlu0 %1742  ;;  %v1916_v41 = vmul.f32 %v1884_v39, %v5048_v3  ;;  %v1799_v52 = vmul.f32 %v5104_v35, %v5104_v35  ;;  %v1861_v12 = vld [vmem:[%s5558_s2 + $0x28] sm:$0xff] }
 0x2e5   :  { %v2419_v26 = vadd.f32 -34.3, %v1743_v10  ;;  %v1775_v45 = vmul.f32 0.0017301039, %v2403_v48  ;;  %v1877_v56 = vmul.f32 %v3031_v14, %v1861_v12 }
 0x2e6   :  { %v1838_v63 = vadd.f32 0.1, %v1822_v36  ;;  %2129 = vperm.xlu1 %3008, %v1923_v33   ;;  %v1932_v3 = vsub.f32 %v1900_v28, %v1916_v41  ;;  %v1815_v53 = vsub.f32 %v1783_v5, %v1799_v52 }
 0x2e7   :  { %v1791_v60 = vmul.f32 0.0017301039, %v2419_v26  ;;  %v3033_v39 = vpop.eup %3032  ;;  %v1807_v34 = vmul.f32 %v1775_v45, %v1775_v45  ;;  %v1894_v26 = vld [vmem:[%s5559_s3 + $0x30] sm:$0xff]  ;;  %v1909_v28 = vmul.f32 %v1877_v56, %v5053_v4  ;;  %v1901_v4 = vld [vmem:[%s5559_s3 + $0x68] sm:$0xff] }
 0x2e8   :  { %3036 = vrsqrt.f32 %v1838_v63  ;;  %2134 = vperm.xlu0 %3009, %v1924_v42   ;;  %v1831_v33 = vadd.f32 0.1, %v1815_v53  ;;  %v1870_v63 = vld [vmem:[%s5558_s2 + $0x70] sm:$0xff]  ;;  %v1885_v48 = vmul.f32 %v3033_v39, %v1869_v9  ;;  %v1895_v9 = vld [vmem:[%s5559_s3 + $0x38] sm:$0xff] }
 0x2e9   :  { %v1823_v0 = vsub.f32 %v1791_v60, %v1807_v34 }
 0x2ea   :  { %2169 = vperm.xlu1 %3008, %v1931_v24   ;;  %3038 = vrsqrt.f32 %v1831_v33  ;;  %v1893_v24 = vld [vmem:[%s5559_s3 + $0x28] sm:$0xff] }
 0x2eb   :  { %v1839_v5 = vadd.f32 0.1, %v1823_v0  ;;  %v1925_v12 = vsub.f32 %v1893_v24, %v1909_v28  ;;  %v1903_v0 = vld [vmem:[%s5559_s3 + $0x78] sm:$0xff]  ;;  %v5752_v28 = vld [vmem:[#allocation4_spill] sm:$0xff] }
 0x2ec   :  { %2174 = vperm.xlu0 %3009, %v1932_v3   ;;  %v1917_v3 = vmul.f32 %v1885_v48, %v5065_v37  ;;  %v1871_v37 = vld [vmem:[%s5558_s2 + $0x78] sm:$0xff] }
 0x2ed   :  { %3040 = vrsqrt.f32 %v1839_v5 }
 0x2ee   :  { %v3035_v36 = vpop.eup %3034  ;;  %1963 = vperm.xlu1 %3008, %v1877_v56   ;;  %v1933_v60 = vsub.f32 %v1901_v4, %v1917_v3 }
 0x2ef   :  { %v1878_v10 = vmul.f32 %v3035_v36, %v1862_v17 }
 0x2f1   :  { %v1910_v41 = vmul.f32 %v1878_v10, %v5078_v6  ;;  %v1902_v6 = vld [vmem:[%s5559_s3 + $0x70] sm:$0xff] }
 0x2f2   :  { %v3037_v15 = vpop.eup %3036  ;;  %2003 = vperm.xlu1 %3008, %v1885_v48  }
 0x2f3   :  { %v1886_v42 = vmul.f32 %v3037_v15, %v1870_v63  ;;  %v1926_v14 = vsub.f32 %v1894_v26, %v1910_v41  ;;  %v5750_v41 = vld [vmem:[#allocation2_spill] sm:$0xff] }
 0x2f4   :  { %v3039_v17 = vpop.eup %3038 }
 0x2f5   :  { %2008 = vperm.xlu0 %3009, %v1886_v42   ;;  %v1918_v52 = vmul.f32 %v1886_v42, %v5088_v13  ;;  %v1863_v13 = vld [vmem:[%s5558_s2 + $0x38] sm:$0xff] }
 0x2f6   :  { %1968 = vperm.xlu1 %3008, %v1878_v10   ;;  %v1879_v39 = vmul.f32 %v3039_v17, %v1863_v13 }
 0x2f7   :  { %v1934_v53 = vsub.f32 %v1902_v6, %v1918_v52  ;;  %v3041_v56 = vpop.eup %3040  ;;  %v5754_v6 = vld [vmem:[#allocation61_spill] sm:$0xff] }
 0x2f8   :  { %v1887_v36 = vmul.f32 %v3041_v56, %v1871_v37  ;;  %v1911_v34 = vmul.f32 %v1879_v39, %v5104_v35  ;;  %v5751_v35 = vld [vmem:[#allocation3_spill] sm:$0xff]  ;;  %v5756_v37 = vld [vmem:[#allocation40_spill] sm:$0xff] }
 0x2f9   :  { %2144 = vperm.xlu0 %3009, %v1926_v14   ;;  %v5753_v14 = vld [vmem:[#allocation7_spill] sm:$0xff] }
 0x2fa   :  { %2139 = vperm.xlu1 %3008, %v1925_v12   ;;  %v1927_v10 = vsub.f32 %v1895_v9, %v1911_v34  ;;  %v1919_v33 = vmul.f32 %v1887_v36, %v1775_v45  ;;  %v5755_v12 = vld [vmem:[#allocation62_spill] sm:$0xff] }
 0x2fb   :  { %v5757_v34 = vld [vmem:[#allocation42_spill] sm:$0xff] }
 0x2fc   :  { %v1935_v63 = vsub.f32 %v1903_v0, %v1919_v33  ;;  %v5759_v0 = vld [vmem:[#allocation51_spill] sm:$0xff] }
 0x2fd   :  { %2184 = vperm.xlu0 %3009, %v1934_v53  }
 0x2fe   :  { %2179 = vperm.xlu1 %3008, %v1933_v60  }
 0x302   :  { %1973 = vperm.xlu1 %3008, %v1879_v39  }
 0x306   :  { %2013 = vperm.xlu1 %3008, %v1887_v36  }
 0x30a   :  { %2149 = vperm.xlu1 %3008, %v1927_v10   ;;  %v5758_v10 = vld [vmem:[#allocation43_spill] sm:$0xff] }
 0x30e   :  { %2189 = vperm.xlu1 %3008, %v1935_v63  }
 0x337   :  { %v1939_v48 = vpop.permute.xlu1 %1938 }
 0x338   :  { %v2016_v5 = vmul.f32 %v1939_v48, %v5750_v41  ;;  %v2017_v26 = vmul.f32 %v1939_v48, %v5751_v35  ;;  %v2018_v24 = vmul.f32 %v1939_v48, %v5752_v28  ;;  %v2019_v52 = vmul.f32 %v1939_v48, %v5753_v14  ;;  %v5761_v35 = vld [vmem:[#allocation67_spill] sm:$0xff] }
 0x339   :  { %v2020_v45 = vmul.f32 %v1939_v48, %v5754_v6  ;;  %v2021_v3 = vmul.f32 %v1939_v48, %v5755_v12  ;;  %v5760_v48 = vld [vmem:[#allocation65_spill] sm:$0xff] }
 0x33b   :  { %v1979_v42 = vpop.permute.xlu1 %1978 }
 0x33c   :  { %v2064_v36 = vmul.f32 %v1979_v42, %v5756_v37  ;;  %v2065_v9 = vmul.f32 %v1979_v42, %v5757_v34  ;;  %v2066_v33 = vmul.f32 %v1979_v42, %v5758_v10  ;;  %v2067_v63 = vmul.f32 %v1979_v42, %v5759_v0 }
 0x342   :  { %v1944_v15 = vpop.permute.xlu0 %1943 }
 0x343   :  { %v2026_v37 = vmul.f32 %v1944_v15, %v4603_v22 }
 0x344   :  { %v1984_v41 = vpop.permute.xlu1 %1983 }
 0x346   :  { %v2115_v4 = vpop.permute.xlu0 %2114 }
 0x347   :  { %v2192_v53 = vadd.f32 %v2115_v4, %v2016_v5  ;;  %v2193_v60 = vadd.f32 %v2115_v4, %v2017_v26  ;;  %v2194_v17 = vadd.f32 %v2115_v4, %v2018_v24  ;;  %v2195_v13 = vadd.f32 %v2115_v4, %v2019_v52 }
 0x348   :  { %v2196_v39 = vadd.f32 %v2115_v4, %v2020_v45  ;;  %v2197_v56 = vadd.f32 %v2115_v4, %v2021_v3  ;;  %v2068_v5 = vmul.f32 %v1979_v42, %v5760_v48  ;;  %v2069_v26 = vmul.f32 %v1979_v42, %v5761_v35  ;;  %v5762_v42 = vld [vmem:[#allocation5_spill] sm:$0xff]  ;;  %v5767_v48 = vld [vmem:[#allocation44_spill] sm:$0xff]  ;;  %v5768_v35 = vld [vmem:[#allocation46_spill] sm:$0xff] }
 0x349   :  { %2288 = vst [vmem:[%s5560_s4] sm:$0xff] %v2192_v53  ;;  %2289 = vst [vmem:[%s5560_s4 + $0x8] sm:$0xff] %v2193_v60  ;;  %v2022_v4 = vmul.f32 %v1944_v15, %v5762_v42  ;;  %v5763_v53 = vld [vmem:[#allocation6_spill] sm:$0xff]  ;;  %v5771_v42 = vld [vmem:[#allocation68_spill] sm:$0xff] }
 0x34a   :  { %2290 = vst [vmem:[%s5560_s4 + $0x10] sm:$0xff] %v2194_v17  ;;  %2291 = vst [vmem:[%s5560_s4 + $0x18] sm:$0xff] %v2195_v13  ;;  %v2155_v28 = vpop.permute.xlu0 %2154  ;;  %v2023_v60 = vmul.f32 %v1944_v15, %v5763_v53  ;;  %v5764_v17 = vld [vmem:[#allocation10_spill] sm:$0xff]  ;;  %v2074_v22 = vmul.f32 %v1984_v41, %v5771_v42  ;;  %v5772_v53 = vld [vmem:[#allocation69_spill] sm:$0xff] }
 0x34b   :  { %2292 = vst [vmem:[%s5560_s4 + $0x20] sm:$0xff] %v2196_v39  ;;  %2293 = vst.msk [vmem:[%s5560_s4 + $0x28] sm:$0xff] %vm1379_vm3, %v2197_v56  ;;  %v2240_v24 = vadd.f32 %v2155_v28, %v2064_v36  ;;  %v2241_v14 = vadd.f32 %v2155_v28, %v2065_v9  ;;  %v2242_v52 = vadd.f32 %v2155_v28, %v2066_v33  ;;  %v5765_v39 = vld [vmem:[#allocation11_spill] sm:$0xff] }
 0x34c   :  { %v2243_v6 = vadd.f32 %v2155_v28, %v2067_v63  ;;  %v2244_v45 = vadd.f32 %v2155_v28, %v2068_v5  ;;  %v2245_v12 = vadd.f32 %v2155_v28, %v2069_v26  ;;  %v2024_v13 = vmul.f32 %v1944_v15, %v5764_v17  ;;  %v5766_v36 = vld [vmem:[#allocation71_spill] sm:$0xff]  ;;  %v5774_v17 = vld [vmem:[#allocation9_spill] sm:$0xff] }
 0x34d   :  { %v1949_v3 = vpop.permute.xlu1 %1948  ;;  %2336 = vst [vmem:[%s5560_s4 + $0x180] sm:$0xff] %v2240_v24  ;;  %2337 = vst [vmem:[%s5560_s4 + $0x188] sm:$0xff] %v2241_v14  ;;  %v2025_v56 = vmul.f32 %v1944_v15, %v5765_v39  ;;  %v2027_v34 = vmul.f32 %v1944_v15, %v5766_v36  ;;  %v2070_v5 = vmul.f32 %v1984_v41, %v5767_v48 }
 0x34e   :  { %2338 = vst [vmem:[%s5560_s4 + $0x190] sm:$0xff] %v2242_v52  ;;  %2339 = vst [vmem:[%s5560_s4 + $0x198] sm:$0xff] %v2243_v6  ;;  %v2071_v26 = vmul.f32 %v1984_v41, %v5768_v35  ;;  %v5769_v52 = vld [vmem:[#allocation52_spill] sm:$0xff]  ;;  %v2075_v15 = vmul.f32 %v1984_v41, %v5772_v53  ;;  %v2033_v48 = vmul.f32 %v1949_v3, %v4699_v25 }
 0x34f   :  { %2340 = vst [vmem:[%s5560_s4 + $0x1a0] sm:$0xff] %v2244_v45  ;;  %2341 = vst.msk [vmem:[%s5560_s4 + $0x1a8] sm:$0xff] %vm1379_vm3, %v2245_v12  ;;  %v2072_v6 = vmul.f32 %v1984_v41, %v5769_v52  ;;  %v5770_v45 = vld [vmem:[#allocation53_spill] sm:$0xff] }
 0x350   :  { %v2073_v12 = vmul.f32 %v1984_v41, %v5770_v45  ;;  %v2029_v41 = vmul.f32 %v1949_v3, %v5774_v17 }
 0x351   :  { %v2120_v9 = vpop.permute.xlu1 %2119 }
 0x352   :  { %v2198_v10 = vadd.f32 %v2120_v9, %v2022_v4  ;;  %v2199_v33 = vadd.f32 %v2120_v9, %v2023_v60  ;;  %v2200_v0 = vadd.f32 %v2120_v9, %v2024_v13  ;;  %v2201_v63 = vadd.f32 %v2120_v9, %v2025_v56  ;;  %v5773_v4 = vld [vmem:[#allocation8_spill] sm:$0xff]  ;;  %v5775_v13 = vld [vmem:[#allocation14_spill] sm:$0xff]  ;;  %v5776_v56 = vld [vmem:[#allocation15_spill] sm:$0xff] }
 0x353   :  { %v2202_v28 = vadd.f32 %v2120_v9, %v2026_v37  ;;  %v2203_v24 = vadd.f32 %v2120_v9, %v2027_v34  ;;  %v1989_v14 = vpop.permute.xlu0 %1988  ;;  %v2028_v60 = vmul.f32 %v1949_v3, %v5773_v4  ;;  %v2030_v39 = vmul.f32 %v1949_v3, %v5775_v13 }
 0x354   :  { %2294 = vst [vmem:[%s5560_s4 + $0x30] sm:$0xff] %v2198_v10  ;;  %2295 = vst [vmem:[%s5560_s4 + $0x38] sm:$0xff] %v2199_v33  ;;  %v2031_v37 = vmul.f32 %v1949_v3, %v5776_v56  ;;  %v2081_v13 = vmul.f32 %v1989_v14, %v4676_v23  ;;  %v5782_v23 = vld [vmem:[#allocation12_spill] sm:$0xff] }
 0x355   :  { %2296 = vst [vmem:[%s5560_s4 + $0x40] sm:$0xff] %v2200_v0  ;;  %2297 = vst [vmem:[%s5560_s4 + $0x48] sm:$0xff] %v2201_v63  ;;  %v2160_v36 = vpop.permute.xlu1 %2159  ;;  %v5777_v0 = vld [vmem:[#allocation76_spill] sm:$0xff] }
 0x356   :  { %2298 = vst [vmem:[%s5560_s4 + $0x50] sm:$0xff] %v2202_v28  ;;  %2299 = vst.msk [vmem:[%s5560_s4 + $0x58] sm:$0xff] %vm1379_vm3, %v2203_v24  ;;  %v2246_v34 = vadd.f32 %v2160_v36, %v2070_v5  ;;  %v2247_v9 = vadd.f32 %v2160_v36, %v2071_v26  ;;  %v2248_v10 = vadd.f32 %v2160_v36, %v2072_v6 }
 0x357   :  { %v2249_v33 = vadd.f32 %v2160_v36, %v2073_v12  ;;  %v2032_v63 = vmul.f32 %v1949_v3, %v5777_v0  ;;  %v2250_v35 = vadd.f32 %v2160_v36, %v2074_v22  ;;  %v2251_v52 = vadd.f32 %v2160_v36, %v2075_v15  ;;  %v2125_v45 = vpop.permute.xlu0 %2124  ;;  %v5778_v12 = vld [vmem:[#allocation49_spill] sm:$0xff]  ;;  %v5779_v22 = vld [vmem:[#allocation50_spill] sm:$0xff] }
 0x358   :  { %2342 = vst [vmem:[%s5560_s4 + $0x1b0] sm:$0xff] %v2246_v34  ;;  %2343 = vst [vmem:[%s5560_s4 + $0x1b8] sm:$0xff] %v2247_v9  ;;  %v2204_v25 = vadd.f32 %v2125_v45, %v2028_v60  ;;  %v2205_v3 = vadd.f32 %v2125_v45, %v2029_v41  ;;  %v2206_v5 = vadd.f32 %v2125_v45, %v2030_v39  ;;  %v5780_v15 = vld [vmem:[#allocation54_spill] sm:$0xff]  ;;  %v5781_v60 = vld [vmem:[#allocation55_spill] sm:$0xff] }
 0x359   :  { %2344 = vst [vmem:[%s5560_s4 + $0x1c0] sm:$0xff] %v2248_v10  ;;  %2345 = vst [vmem:[%s5560_s4 + $0x1c8] sm:$0xff] %v2249_v33  ;;  %v2207_v26 = vadd.f32 %v2125_v45, %v2031_v37  ;;  %v2208_v28 = vadd.f32 %v2125_v45, %v2032_v63  ;;  %v2209_v24 = vadd.f32 %v2125_v45, %v2033_v48  ;;  %v1954_v6 = vpop.permute.xlu1 %1953  ;;  %v5784_v48 = vld [vmem:[#allocation16_spill] sm:$0xff] }
 0x35a   :  { %2346 = vst [vmem:[%s5560_s4 + $0x1d0] sm:$0xff] %v2250_v35  ;;  %2347 = vst.msk [vmem:[%s5560_s4 + $0x1d8] sm:$0xff] %vm1379_vm3, %v2251_v52  ;;  %v2076_v42 = vmul.f32 %v1989_v14, %v5778_v12  ;;  %v2077_v53 = vmul.f32 %v1989_v14, %v5779_v22  ;;  %v2078_v4 = vmul.f32 %v1989_v14, %v5780_v15  ;;  %v5785_v52 = vld [vmem:[#allocation17_spill] sm:$0xff]  ;;  %v5788_v12 = vld [vmem:[#allocation59_spill] sm:$0xff] }
 0x35b   :  { %v2079_v17 = vmul.f32 %v1989_v14, %v5781_v60  ;;  %2300 = vst [vmem:[%s5560_s4 + $0x60] sm:$0xff] %v2204_v25  ;;  %2301 = vst [vmem:[%s5560_s4 + $0x68] sm:$0xff] %v2205_v3  ;;  %v2080_v41 = vmul.f32 %v1989_v14, %v4691_v40  ;;  %v2165_v39 = vpop.permute.xlu0 %2164  ;;  %v2034_v40 = vmul.f32 %v1954_v6, %v5782_v23  ;;  %v5783_v14 = vld [vmem:[#allocation13_spill] sm:$0xff]  ;;  %v5789_v60 = vld [vmem:[#allocation18_spill] sm:$0xff] }
 0x35c   :  { %2302 = vst [vmem:[%s5560_s4 + $0x70] sm:$0xff] %v2206_v5  ;;  %2303 = vst [vmem:[%s5560_s4 + $0x78] sm:$0xff] %v2207_v26  ;;  %v2252_v56 = vadd.f32 %v2165_v39, %v2076_v42  ;;  %v2253_v37 = vadd.f32 %v2165_v39, %v2077_v53  ;;  %v2254_v36 = vadd.f32 %v2165_v39, %v2078_v4  ;;  %v5786_v5 = vld [vmem:[#allocation56_spill] sm:$0xff] }
 0x35d   :  { %2304 = vst [vmem:[%s5560_s4 + $0x80] sm:$0xff] %v2208_v28  ;;  %2305 = vst.msk [vmem:[%s5560_s4 + $0x88] sm:$0xff] %vm1379_vm3, %v2209_v24  ;;  %v2255_v34 = vadd.f32 %v2165_v39, %v2079_v17  ;;  %v2256_v9 = vadd.f32 %v2165_v39, %v2080_v41  ;;  %v2257_v10 = vadd.f32 %v2165_v39, %v2081_v13  ;;  %v1994_v33 = vpop.permute.xlu1 %1993  ;;  %v5787_v28 = vld [vmem:[#allocation58_spill] sm:$0xff]  ;;  %v5790_v41 = vld [vmem:[#allocation19_spill] sm:$0xff] }
 0x35e   :  { %2348 = vst [vmem:[%s5560_s4 + $0x1e0] sm:$0xff] %v2252_v56  ;;  %2349 = vst [vmem:[%s5560_s4 + $0x1e8] sm:$0xff] %v2253_v37  ;;  %v2035_v0 = vmul.f32 %v1954_v6, %v5783_v14  ;;  %v2036_v35 = vmul.f32 %v1954_v6, %v5784_v48  ;;  %v2037_v45 = vmul.f32 %v1954_v6, %v5785_v52 }
 0x35f   :  { %2350 = vst [vmem:[%s5560_s4 + $0x1f0] sm:$0xff] %v2254_v36  ;;  %2351 = vst [vmem:[%s5560_s4 + $0x1f8] sm:$0xff] %v2255_v34  ;;  %v2038_v25 = vmul.f32 %v1954_v6, %v4727_v49  ;;  %v2039_v3 = vmul.f32 %v1954_v6, %v4731_v11  ;;  %v2082_v26 = vmul.f32 %v1994_v33, %v5786_v5  ;;  %v5791_v49 = vld [vmem:[#allocation20_spill] sm:$0xff]  ;;  %v5792_v11 = vld [vmem:[#allocation21_spill] sm:$0xff] }
 0x360   :  { %2352 = vst [vmem:[%s5560_s4 + $0x200] sm:$0xff] %v2256_v9  ;;  %2353 = vst.msk [vmem:[%s5560_s4 + $0x208] sm:$0xff] %vm1379_vm3, %v2257_v10  ;;  %v2083_v24 = vmul.f32 %v1994_v33, %v5787_v28  ;;  %v2084_v42 = vmul.f32 %v1994_v33, %v5788_v12  ;;  %v2085_v22 = vmul.f32 %v1994_v33, %v4529_v32 }
 0x361   :  { %v1959_v63 = vpop.permute.xlu1 %1958  ;;  %v2086_v15 = vmul.f32 %v1994_v33, %v4784_v27  ;;  %v2087_v4 = vmul.f32 %v1994_v33, %v4779_v1  ;;  %v5793_v27 = vld [vmem:[#allocation60_spill] sm:$0xff] }
 0x362   :  { %v2040_v17 = vmul.f32 %v1959_v63, %v5789_v60  ;;  %v2041_v13 = vmul.f32 %v1959_v63, %v5790_v41  ;;  %v2042_v39 = vmul.f32 %v1959_v63, %v5791_v49  ;;  %v2043_v6 = vmul.f32 %v1959_v63, %v5792_v11  ;;  %v5794_v1 = vld [vmem:[#allocation64_spill] sm:$0xff] }
 0x363   :  { %v1999_v53 = vpop.permute.xlu0 %1998  ;;  %v2044_v56 = vmul.f32 %v1959_v63, %v4804_v8  ;;  %v2045_v37 = vmul.f32 %v1959_v63, %v4809_v38  ;;  %v5795_v63 = vld [vmem:[#allocation66_spill] sm:$0xff] }
 0x364   :  { %v2088_v23 = vmul.f32 %v1999_v53, %v5793_v27  ;;  %v2089_v33 = vmul.f32 %v1999_v53, %v5794_v1  ;;  %v2093_v41 = vmul.f32 %v1999_v53, %v4832_v55  ;;  %v5799_v27 = vld [vmem:[#allocation72_spill] sm:$0xff]  ;;  %v5800_v1 = vld [vmem:[#allocation73_spill] sm:$0xff] }
 0x365   :  { %v2130_v36 = vpop.permute.xlu1 %2129 }
 0x366   :  { %v2210_v34 = vadd.f32 %v2130_v36, %v2034_v40  ;;  %v2211_v32 = vadd.f32 %v2130_v36, %v2035_v0  ;;  %v2212_v9 = vadd.f32 %v2130_v36, %v2036_v35  ;;  %v2213_v10 = vadd.f32 %v2130_v36, %v2037_v45 }
 0x367   :  { %v2214_v14 = vadd.f32 %v2130_v36, %v2038_v25  ;;  %v2215_v48 = vadd.f32 %v2130_v36, %v2039_v3  ;;  %v2135_v52 = vpop.permute.xlu0 %2134  ;;  %v2090_v35 = vmul.f32 %v1999_v53, %v5795_v63  ;;  %v2091_v45 = vmul.f32 %v1999_v53, %v4624_v50  ;;  %v5798_v36 = vld [vmem:[#allocation27_spill] sm:$0xff] }
 0x368   :  { %2306 = vst [vmem:[%s5560_s4 + $0x90] sm:$0xff] %v2210_v34  ;;  %2307 = vst [vmem:[%s5560_s4 + $0x98] sm:$0xff] %v2211_v32  ;;  %v2216_v8 = vadd.f32 %v2135_v52, %v2040_v17  ;;  %v2217_v38 = vadd.f32 %v2135_v52, %v2041_v13  ;;  %v2218_v40 = vadd.f32 %v2135_v52, %v2042_v39 }
 0x369   :  { %2308 = vst [vmem:[%s5560_s4 + $0xa0] sm:$0xff] %v2212_v9  ;;  %2309 = vst [vmem:[%s5560_s4 + $0xa8] sm:$0xff] %v2213_v10  ;;  %v2219_v0 = vadd.f32 %v2135_v52, %v2043_v6  ;;  %v2220_v25 = vadd.f32 %v2135_v52, %v2044_v56  ;;  %v2221_v3 = vadd.f32 %v2135_v52, %v2045_v37  ;;  %v2170_v5 = vpop.permute.xlu1 %2169  ;;  %v5797_v6 = vld [vmem:[#allocation26_spill] sm:$0xff] }
 0x36a   :  { %2310 = vst [vmem:[%s5560_s4 + $0xb0] sm:$0xff] %v2214_v14  ;;  %2311 = vst.msk [vmem:[%s5560_s4 + $0xb8] sm:$0xff] %vm1379_vm3, %v2215_v48  ;;  %v2258_v50 = vadd.f32 %v2170_v5, %v2082_v26  ;;  %v2259_v28 = vadd.f32 %v2170_v5, %v2083_v24  ;;  %v2260_v12 = vadd.f32 %v2170_v5, %v2084_v42  ;;  %v5801_v14 = vld [vmem:[#allocation75_spill] sm:$0xff] }
 0x36b   :  { %2312 = vst [vmem:[%s5560_s4 + $0xc0] sm:$0xff] %v2216_v8  ;;  %2313 = vst [vmem:[%s5560_s4 + $0xc8] sm:$0xff] %v2217_v38  ;;  %v2261_v60 = vadd.f32 %v2170_v5, %v2085_v22  ;;  %v2092_v17 = vmul.f32 %v1999_v53, %v4824_v59  ;;  %v2262_v13 = vadd.f32 %v2170_v5, %v2086_v15  ;;  %v2175_v39 = vpop.permute.xlu0 %2174  ;;  %v5802_v38 = vld [vmem:[#allocation22_spill] sm:$0xff] }
 0x36c   :  { %2314 = vst [vmem:[%s5560_s4 + $0xd0] sm:$0xff] %v2218_v40  ;;  %2315 = vst [vmem:[%s5560_s4 + $0xd8] sm:$0xff] %v2219_v0  ;;  %v2263_v49 = vadd.f32 %v2170_v5, %v2087_v4  ;;  %v2264_v59 = vadd.f32 %v2175_v39, %v2088_v23  ;;  %v2265_v55 = vadd.f32 %v2175_v39, %v2089_v33  ;;  %v5796_v4 = vld [vmem:[#allocation25_spill] sm:$0xff]  ;;  %v5803_v0 = vld [vmem:[#allocation23_spill] sm:$0xff] }
 0x36d   :  { %2316 = vst [vmem:[%s5560_s4 + $0xe0] sm:$0xff] %v2220_v25  ;;  %2317 = vst.msk [vmem:[%s5560_s4 + $0xe8] sm:$0xff] %vm1379_vm3, %v2221_v3  ;;  %v2266_v26 = vadd.f32 %v2175_v39, %v2090_v35  ;;  %v2267_v24 = vadd.f32 %v2175_v39, %v2091_v45  ;;  %v2268_v42 = vadd.f32 %v2175_v39, %v2092_v17  ;;  %v1964_v53 = vpop.permute.xlu1 %1963  ;;  %v5804_v35 = vld [vmem:[#allocation31_spill] sm:$0xff]  ;;  %v5805_v3 = vld [vmem:[#allocation77_spill] sm:$0xff] }
 0x36e   :  { %2354 = vst [vmem:[%s5560_s4 + $0x210] sm:$0xff] %v2258_v50  ;;  %2355 = vst [vmem:[%s5560_s4 + $0x218] sm:$0xff] %v2259_v28  ;;  %v2269_v22 = vadd.f32 %v2175_v39, %v2093_v41  ;;  %v2046_v11 = vmul.f32 %v1964_v53, %v5796_v4  ;;  %v2047_v56 = vmul.f32 %v1964_v53, %v5797_v6  ;;  %v5806_v50 = vld [vmem:[#allocation78_spill] sm:$0xff] }
 0x36f   :  { %2356 = vst [vmem:[%s5560_s4 + $0x220] sm:$0xff] %v2260_v12  ;;  %2357 = vst [vmem:[%s5560_s4 + $0x228] sm:$0xff] %v2261_v60  ;;  %v2048_v34 = vmul.f32 %v1964_v53, %v5798_v36  ;;  %v2049_v32 = vmul.f32 %v1964_v53, %v5732_v44  ;;  %v2050_v9 = vmul.f32 %v1964_v53, %v4837_v20 }
 0x370   :  { %2358 = vst [vmem:[%s5560_s4 + $0x230] sm:$0xff] %v2262_v13  ;;  %2359 = vst.msk [vmem:[%s5560_s4 + $0x238] sm:$0xff] %vm1379_vm3, %v2263_v49  ;;  %v2051_v10 = vmul.f32 %v1964_v53, %v4843_v30 }
 0x371   :  { %2360 = vst [vmem:[%s5560_s4 + $0x240] sm:$0xff] %v2264_v59  ;;  %2361 = vst [vmem:[%s5560_s4 + $0x248] sm:$0xff] %v2265_v55  ;;  %v2004_v15 = vpop.permute.xlu1 %2003 }
 0x372   :  { %2362 = vst [vmem:[%s5560_s4 + $0x250] sm:$0xff] %v2266_v26  ;;  %2363 = vst [vmem:[%s5560_s4 + $0x258] sm:$0xff] %v2267_v24  ;;  %v2094_v23 = vmul.f32 %v2004_v15, %v5799_v27  ;;  %v2095_v33 = vmul.f32 %v2004_v15, %v5800_v1  ;;  %v2096_v48 = vmul.f32 %v2004_v15, %v5801_v14  ;;  %v5807_v27 = vld [vmem:[#allocation28_spill] sm:$0xff]  ;;  %v5808_v1 = vld [vmem:[#allocation29_spill] sm:$0xff] }
 0x373   :  { %2364 = vst [vmem:[%s5560_s4 + $0x260] sm:$0xff] %v2268_v42  ;;  %2365 = vst.msk [vmem:[%s5560_s4 + $0x268] sm:$0xff] %vm1379_vm3, %v2269_v22  ;;  %v2097_v52 = vmul.f32 %v2004_v15, %v4667_v16  ;;  %v2098_v4 = vmul.f32 %v2004_v15, %v4853_v57  ;;  %v5809_v14 = vld [vmem:[#allocation37_spill] sm:$0xff] }
 0x374   :  { %v2009_v37 = vpop.permute.xlu0 %2008 }
 0x375   :  { %v1969_v8 = vpop.permute.xlu1 %1968  ;;  %v2100_v5 = vmul.f32 %v2009_v37, %v5805_v3  ;;  %v2101_v28 = vmul.f32 %v2009_v37, %v5806_v50  ;;  %v2102_v39 = vmul.f32 %v2009_v37, %v4760_v7  ;;  %v2104_v26 = vmul.f32 %v2009_v37, %v4912_v2 }
 0x376   :  { %v2052_v40 = vmul.f32 %v1969_v8, %v5802_v38  ;;  %v2053_v63 = vmul.f32 %v1969_v8, %v5803_v0  ;;  %v2054_v45 = vmul.f32 %v1969_v8, %v5804_v35  ;;  %v2055_v44 = vmul.f32 %v1969_v8, %v5742_v46 }
 0x377   :  { %v2056_v20 = vmul.f32 %v1969_v8, %v4887_v43  ;;  %v2057_v30 = vmul.f32 %v1969_v8, %v4897_v51  ;;  %v2103_v46 = vmul.f32 %v2009_v37, %v4762_v21  ;;  %v2105_v24 = vmul.f32 %v2009_v37, %v4918_v18 }
 0x378   :  { %v2145_v25 = vpop.permute.xlu0 %2144 }
 0x379   :  { %v2228_v12 = vadd.f32 %v2145_v25, %v2052_v40  ;;  %v2229_v16 = vadd.f32 %v2145_v25, %v2053_v63  ;;  %v2230_v60 = vadd.f32 %v2145_v25, %v2054_v45  ;;  %v2231_v17 = vadd.f32 %v2145_v25, %v2055_v44  ;;  %v2140_v49 = vpop.permute.xlu1 %2139 }
 0x37a   :  { %v2232_v41 = vadd.f32 %v2145_v25, %v2056_v20  ;;  %v2233_v13 = vadd.f32 %v2145_v25, %v2057_v30  ;;  %v2222_v43 = vadd.f32 %v2140_v49, %v2046_v11  ;;  %v2223_v7 = vadd.f32 %v2140_v49, %v2047_v56  ;;  %v5810_v25 = vld [vmem:[#allocation63_spill] sm:$0xff] }
 0x37b   :  { %2324 = vst [vmem:[%s5560_s4 + $0x120] sm:$0xff] %v2228_v12  ;;  %2325 = vst [vmem:[%s5560_s4 + $0x128] sm:$0xff] %v2229_v16  ;;  %v2224_v51 = vadd.f32 %v2140_v49, %v2048_v34  ;;  %v2225_v21 = vadd.f32 %v2140_v49, %v2049_v32  ;;  %v2226_v59 = vadd.f32 %v2140_v49, %v2050_v9 }
 0x37c   :  { %2326 = vst [vmem:[%s5560_s4 + $0x130] sm:$0xff] %v2230_v60  ;;  %2327 = vst [vmem:[%s5560_s4 + $0x138] sm:$0xff] %v2231_v17  ;;  %v2227_v55 = vadd.f32 %v2140_v49, %v2051_v10  ;;  %v2185_v42 = vpop.permute.xlu0 %2184  ;;  %v2099_v11 = vmul.f32 %v2004_v15, %v4864_v29 }
 0x37d   :  { %2328 = vst [vmem:[%s5560_s4 + $0x140] sm:$0xff] %v2232_v41  ;;  %2329 = vst.msk [vmem:[%s5560_s4 + $0x148] sm:$0xff] %vm1379_vm3, %v2233_v13  ;;  %v2276_v2 = vadd.f32 %v2185_v42, %v2100_v5  ;;  %v2277_v22 = vadd.f32 %v2185_v42, %v2101_v28  ;;  %v2278_v18 = vadd.f32 %v2185_v42, %v2102_v39  ;;  %v2180_v37 = vpop.permute.xlu1 %2179  ;;  %v5811_v5 = vld [vmem:[#allocation30_spill] sm:$0xff] }
 0x37e   :  { %2318 = vst [vmem:[%s5560_s4 + $0xf0] sm:$0xff] %v2222_v43  ;;  %2319 = vst [vmem:[%s5560_s4 + $0xf8] sm:$0xff] %v2223_v7  ;;  %v2279_v53 = vadd.f32 %v2185_v42, %v2103_v46  ;;  %v2280_v6 = vadd.f32 %v2185_v42, %v2104_v26  ;;  %v2281_v56 = vadd.f32 %v2185_v42, %v2105_v24 }
 0x37f   :  { %2320 = vst [vmem:[%s5560_s4 + $0x100] sm:$0xff] %v2224_v51  ;;  %2321 = vst [vmem:[%s5560_s4 + $0x108] sm:$0xff] %v2225_v21  ;;  %v2270_v57 = vadd.f32 %v2180_v37, %v2094_v23  ;;  %v2271_v29 = vadd.f32 %v2180_v37, %v2095_v33  ;;  %v2272_v15 = vadd.f32 %v2180_v37, %v2096_v48 }
 0x380   :  { %2322 = vst [vmem:[%s5560_s4 + $0x110] sm:$0xff] %v2226_v59  ;;  %2323 = vst.msk [vmem:[%s5560_s4 + $0x118] sm:$0xff] %vm1379_vm3, %v2227_v55  ;;  %v2273_v36 = vadd.f32 %v2180_v37, %v2097_v52  ;;  %v2274_v34 = vadd.f32 %v2180_v37, %v2098_v4  ;;  %v2275_v32 = vadd.f32 %v2180_v37, %v2099_v11 }
 0x381   :  { %2372 = vst [vmem:[%s5560_s4 + $0x2a0] sm:$0xff] %v2276_v2  ;;  %2373 = vst [vmem:[%s5560_s4 + $0x2a8] sm:$0xff] %v2277_v22  ;;  %v1974_v9 = vpop.permute.xlu1 %1973 }
 0x382   :  { %2374 = vst [vmem:[%s5560_s4 + $0x2b0] sm:$0xff] %v2278_v18  ;;  %2375 = vst [vmem:[%s5560_s4 + $0x2b8] sm:$0xff] %v2279_v53  ;;  %v2058_v23 = vmul.f32 %v1974_v9, %v5807_v27  ;;  %v2059_v33 = vmul.f32 %v1974_v9, %v5808_v1  ;;  %v2060_v48 = vmul.f32 %v1974_v9, %v5809_v14 }
 0x383   :  { %2376 = vst [vmem:[%s5560_s4 + $0x2c0] sm:$0xff] %v2280_v6  ;;  %2377 = vst.msk [vmem:[%s5560_s4 + $0x2c8] sm:$0xff] %vm1379_vm3, %v2281_v56  ;;  %v2061_v52 = vmul.f32 %v1974_v9, %v5748_v58  ;;  %v2062_v8 = vmul.f32 %v1974_v9, %v4923_v47  ;;  %v2063_v38 = vmul.f32 %v1974_v9, %v4928_v19 }
 0x384   :  { %2366 = vst [vmem:[%s5560_s4 + $0x270] sm:$0xff] %v2270_v57  ;;  %2367 = vst [vmem:[%s5560_s4 + $0x278] sm:$0xff] %v2271_v29 }
 0x385   :  { %2368 = vst [vmem:[%s5560_s4 + $0x280] sm:$0xff] %v2272_v15  ;;  %2369 = vst [vmem:[%s5560_s4 + $0x288] sm:$0xff] %v2273_v36  ;;  %v2014_v10 = vpop.permute.xlu1 %2013 }
 0x386   :  { %2370 = vst [vmem:[%s5560_s4 + $0x290] sm:$0xff] %v2274_v34  ;;  %2371 = vst.msk [vmem:[%s5560_s4 + $0x298] sm:$0xff] %vm1379_vm3, %v2275_v32  ;;  %v2106_v47 = vmul.f32 %v2014_v10, %v4777_v62  ;;  %v2107_v19 = vmul.f32 %v2014_v10, %v4781_v31  ;;  %v2108_v58 = vmul.f32 %v2014_v10, %v4841_v61 }
 0x387   :  { %v2109_v30 = vmul.f32 %v2014_v10, %v4941_v54  ;;  %v2110_v3 = vmul.f32 %v2014_v10, %v5810_v25  ;;  %v2111_v50 = vmul.f32 %v2014_v10, %v5811_v5 }
 0x389   :  { %v2150_v40 = vpop.permute.xlu1 %2149 }
 0x38a   :  { %v2234_v0 = vadd.f32 %v2150_v40, %v2058_v23  ;;  %v2235_v63 = vadd.f32 %v2150_v40, %v2059_v33  ;;  %v2236_v35 = vadd.f32 %v2150_v40, %v2060_v48  ;;  %v2237_v45 = vadd.f32 %v2150_v40, %v2061_v52 }
 0x38b   :  { %v2238_v44 = vadd.f32 %v2150_v40, %v2062_v8  ;;  %v2239_v20 = vadd.f32 %v2150_v40, %v2063_v38 }
 0x38c   :  { %2330 = vst [vmem:[%s5560_s4 + $0x150] sm:$0xff] %v2234_v0  ;;  %2331 = vst [vmem:[%s5560_s4 + $0x158] sm:$0xff] %v2235_v63 }
 0x38d   :  { %2332 = vst [vmem:[%s5560_s4 + $0x160] sm:$0xff] %v2236_v35  ;;  %2333 = vst [vmem:[%s5560_s4 + $0x168] sm:$0xff] %v2237_v45  ;;  %v2190_v62 = vpop.permute.xlu1 %2189 }
 0x38e   :  { %2334 = vst [vmem:[%s5560_s4 + $0x170] sm:$0xff] %v2238_v44  ;;  %2335 = vst.msk [vmem:[%s5560_s4 + $0x178] sm:$0xff] %vm1379_vm3, %v2239_v20  ;;  %v2282_v28 = vadd.f32 %v2190_v62, %v2106_v47  ;;  %v2283_v31 = vadd.f32 %v2190_v62, %v2107_v19  ;;  %v2284_v12 = vadd.f32 %v2190_v62, %v2108_v58 }
 0x38f   :  { %v2285_v61 = vadd.f32 %v2190_v62, %v2109_v30  ;;  %v2286_v16 = vadd.f32 %v2190_v62, %v2110_v3  ;;  %v2287_v54 = vadd.f32 %v2190_v62, %v2111_v50 }
 0x390   :  { %2378 = vst [vmem:[%s5560_s4 + $0x2d0] sm:$0xff] %v2282_v28  ;;  %2379 = vst [vmem:[%s5560_s4 + $0x2d8] sm:$0xff] %v2283_v31 }
 0x391   :  { %2380 = vst [vmem:[%s5560_s4 + $0x2e0] sm:$0xff] %v2284_v12  ;;  %2381 = vst [vmem:[%s5560_s4 + $0x2e8] sm:$0xff] %v2285_v61 }
 0x392   :  { %2382 = vst [vmem:[%s5560_s4 + $0x2f0] sm:$0xff] %v2286_v16  ;;  %2383 = vst.msk [vmem:[%s5560_s4 + $0x2f8] sm:$0xff] %vm1379_vm3, %v2287_v54 }

</bundles_post_ra>
